<compile_context>
chip_gen: v7x
topology: tpu7x:2x2x1
jax: 0.10.0
libtpu: 0.0.40
codegen_flags: <defaults>
</compile_context>

<pallas_src>
import functools

import jax
import jax.numpy as jnp
import numpy as np
from jax import lax
from jax.experimental import pallas as pl
from jax.experimental.pallas import tpu as pltpu

_LANE = 128
_VMEM_LIMIT = 48 * 1024 * 1024  # safe on v5e/v6e (128 MiB) and v7x (64 MiB)


# ------------------------------ helpers ------------------------------------

def _round_up(x, m):
    return ((x + m - 1) // m) * m


def _divisors(n):
    return [d for d in range(1, n + 1) if n % d == 0]


def _choose_down_rows(n_rows, row_tile):
    """Row tile (divisor of n_rows) for the downconv matmul grid."""
    divs = _divisors(n_rows)
    if row_tile is not None:
        return max(d for d in divs if d <= max(1, row_tile))
    cap = 32
    cands = [d for d in divs if d <= cap and n_rows // d >= 2]
    if not cands:
        cands = [d for d in divs if d <= cap] or [divs[0]]
    return max(cands)


def _choose_conv_rows(h, row_tile):
    """Output-row tile for the 5x5 conv. Must divide h; multi-tile needs th+2<=h."""
    divs = _divisors(h)
    valid = [d for d in divs if d == h or (d >= 2 and d + 2 <= h)]
    if row_tile is not None:
        cands = [d for d in valid if d <= max(2, row_tile)]
        return max(cands) if cands else h
    cap = 16
    cands = [d for d in valid if d <= cap and h // d >= 2]
    if not cands:
        cands = [d for d in valid if d <= cap] or [h]
    return max(cands)


# ------------------------- downconv (k=2, s=2) + PReLU ----------------------

def _downconv_kernel(x_ref, w_ref, b_ref, a_ref, o_ref):
    # x_ref: (TH, 2, Wo, 2*Cin)  - kh on dim 1, (kw,cin) merged on the lane axis
    # w_ref: (2, 2*Cin, Cp), b_ref: (1, Cp) f32, a_ref: (1, 1) f32 in SMEM
    # o_ref: (TH, Wpad, Cp)      - zero W-halo written around the interior
    th, _, wo, k2 = x_ref.shape
    wpad, cp = o_ref.shape[1], o_ref.shape[2]

    xall = x_ref[...]
    x0 = xall[:, 0].reshape(th * wo, k2)
    x1 = xall[:, 1].reshape(th * wo, k2)
    acc = jnp.dot(x0, w_ref[0], preferred_element_type=jnp.float32)
    acc = acc + jnp.dot(x1, w_ref[1], preferred_element_type=jnp.float32)

    y = acc + b_ref[...]
    alpha = a_ref[0, 0]
    y = jnp.where(y > 0, y, alpha * y)
    y = y.reshape(th, wo, cp).astype(o_ref.dtype)

    o_ref[:, 2:2 + wo, :] = y
    o_ref[:, 0:2, :] = jnp.zeros((th, 2, cp), o_ref.dtype)
    o_ref[:, 2 + wo:wpad, :] = jnp.zeros((th, wpad - wo - 2, cp), o_ref.dtype)


def _downconv_prelu(x_nhwc, w, b, a, *, cp, wpad, cdt, row_tile):
    bsz, h0, w0, cin = x_nhwc.shape
    cout = w.shape[0]
    ho, wo = h0 // 2, w0 // 2

    # Space-to-depth is a pure row-major reshape (no HBM relayout pass):
    #   (B,H,W,Cin) -> (B*Ho, kh=2, Wo, kw*Cin)
    xr = x_nhwc.astype(cdt).reshape(bsz * ho, 2, wo, 2 * cin)

    wt = jnp.transpose(w, (2, 3, 1, 0)).reshape(2, 2 * cin, cout).astype(cdt)
    wk = jnp.zeros((2, 2 * cin, cp), cdt).at[:, :, :cout].set(wt)
    bk = jnp.zeros((1, cp), jnp.float32).at[0, :cout].set(b.astype(jnp.float32))
    ak = jnp.asarray(a, jnp.float32).reshape(1, 1)

    n_rows = bsz * ho
    th = _choose_down_rows(n_rows, row_tile)

    return pl.pallas_call(
        _downconv_kernel,
        out_shape=jax.ShapeDtypeStruct((n_rows, wpad, cp), cdt),
        grid_spec=pltpu.PrefetchScalarGridSpec(
            num_scalar_prefetch=0,
            grid=(n_rows // th,),
            in_specs=[
                pl.BlockSpec((th, 2, wo, 2 * cin), lambda m: (m, 0, 0, 0)),
                pl.BlockSpec((2, 2 * cin, cp), lambda m: (0, 0, 0)),
                pl.BlockSpec((1, cp), lambda m: (0, 0)),
                pl.BlockSpec(memory_space=pltpu.MemorySpace.SMEM),
            ],
            out_specs=pl.BlockSpec((th, wpad, cp), lambda m: (m, 0, 0)),
        ),
        compiler_params=pltpu.CompilerParams(
            dimension_semantics=("parallel",),
            vmem_limit_bytes=_VMEM_LIMIT),
    )(xr, wk, bk, ak)


# ----------------------- 5x5 conv (pad=2) + PReLU [+ residual] --------------

def _make_conv5x5_kernel(h, th, wdim, wpad, cp, n_tiles, fuse_residual):
    def kernel(*refs):
        if fuse_residual:
            x_hbm, w_ref, b_ref, a_ref, res_ref, o_ref, xbuf, sem = refs
        else:
            x_hbm, w_ref, b_ref, a_ref, o_ref, xbuf, sem = refs
            res_ref = None
        bb = pl.program_id(0)
        tt = pl.program_id(1)
        zrow = jnp.zeros((2, wpad, cp), xbuf.dtype)

        # -- fetch input rows [tt*th-2, tt*th+th+2), zero-filling the H halo --
        # (W halo is already zero in the inter-layer layout; padding is on-chip,
        #  no jnp.pad HBM pass.)
        if n_tiles == 1:
            xbuf[0:2, :, :] = zrow
            xbuf[th + 2:th + 4, :, :] = zrow
            cpy = pltpu.make_async_copy(x_hbm.at[bb], xbuf.at[pl.ds(2, th)], sem)
            cpy.start()
            cpy.wait()
        else:
            @pl.when(tt == 0)
            def _():
                xbuf[0:2, :, :] = zrow
                cpy = pltpu.make_async_copy(
                    x_hbm.at[bb, pl.ds(0, th + 2)], xbuf.at[pl.ds(2, th + 2)], sem)
                cpy.start()
                cpy.wait()

            @pl.when(tt == n_tiles - 1)
            def _():
                xbuf[th + 2:th + 4, :, :] = zrow
                cpy = pltpu.make_async_copy(
                    x_hbm.at[bb, pl.ds(h - th - 2, th + 2)],
                    xbuf.at[pl.ds(0, th + 2)], sem)
                cpy.start()
                cpy.wait()

            if n_tiles > 2:
                @pl.when(jnp.logical_and(tt > 0, tt < n_tiles - 1))
                def _():
                    cpy = pltpu.make_async_copy(
                        x_hbm.at[bb, pl.ds(tt * th - 2, th + 4)],
                        xbuf.at[pl.ds(0, th + 4)], sem)
                    cpy.start()
                    cpy.wait()

        # -- 5 deep MXU contractions: the 5 kx taps are folded into K = 5*Cp --
        xv = xbuf[...]                                             # (th+4, wpad, cp)
        patch = jnp.concatenate([xv[:, kx:kx + wdim, :] for kx in range(5)],
                                axis=-1)                           # (th+4, w, 5*cp)
        patch = patch.reshape((th + 4) * wdim, 5 * cp)
        acc = jnp.zeros((th * wdim, cp), jnp.float32)
        for ky in range(5):
            acc = acc + jnp.dot(patch[ky * wdim:(ky + th) * wdim, :], w_ref[ky],
                                preferred_element_type=jnp.float32)

        y = acc + b_ref[...]
        alpha = a_ref[0, 0]
        y = jnp.where(y > 0, y, alpha * y)
        y = y.reshape(th, wdim, cp)
        if fuse_residual:
            y = y + res_ref[...][:, 2:2 + wdim, :].astype(jnp.float32)

        o_ref[:, 2:2 + wdim, :] = y.astype(o_ref.dtype)
        o_ref[:, 0:2, :] = jnp.zeros((th, 2, cp), o_ref.dtype)
        o_ref[:, 2 + wdim:wpad, :] = jnp.zeros((th, wpad - wdim - 2, cp), o_ref.dtype)

    return kernel


def _conv5x5_prelu(x_act, w, b, a, *, bsz, h, w_out, wpad, cp, cdt, row_tile,
                   residual=None):
    """One Conv2d(C->C, k=5, p=2) + PReLU layer (optionally fused residual add).

    x_act / residual / output layout: (bsz*h, wpad, cp) with a zero W-halo of 2
    columns on each side of the interior [2, 2+w_out) and channels padded to cp.
    """
    cout = w.shape[0]
    th = _choose_conv_rows(h, row_tile)
    n_tiles = h // th

    wt = jnp.transpose(w, (2, 3, 1, 0)).astype(cdt)            # (ky, kx, cin, cout)
    wk = jnp.zeros((5, 5, cp, cp), cdt).at[:, :, :cout, :cout].set(wt)
    wk = wk.reshape(5, 5 * cp, cp)                             # [ky][kx*cp+cin, cout]
    bk = jnp.zeros((1, cp), jnp.float32).at[0, :cout].set(b.astype(jnp.float32))
    ak = jnp.asarray(a, jnp.float32).reshape(1, 1)

    x4 = x_act.reshape(bsz, h, wpad, cp)
    fuse = residual is not None
    kernel = _make_conv5x5_kernel(h, th, w_out, wpad, cp, n_tiles, fuse)

    in_specs = [
        pl.BlockSpec(memory_space=pl.ANY),                        # rows via manual DMA
        pl.BlockSpec((5, 5 * cp, cp), lambda bb, tt: (0, 0, 0)),  # weights (resident)
        pl.BlockSpec((1, cp), lambda bb, tt: (0, 0)),             # bias
        pl.BlockSpec(memory_space=pltpu.MemorySpace.SMEM),        # PReLU slope
    ]
    args = [x4, wk, bk, ak]
    if fuse:
        in_specs.append(
            pl.BlockSpec((th, wpad, cp), lambda bb, tt: (bb * n_tiles + tt, 0, 0)))
        args.append(residual)

    return pl.pallas_call(
        kernel,
        out_shape=jax.ShapeDtypeStruct((bsz * h, wpad, cp), cdt),
        grid_spec=pltpu.PrefetchScalarGridSpec(
            num_scalar_prefetch=0,
            grid=(bsz, n_tiles),
            in_specs=in_specs,
            out_specs=pl.BlockSpec((th, wpad, cp),
                                   lambda bb, tt: (bb * n_tiles + tt, 0, 0)),
            scratch_shapes=[
                pltpu.VMEM((th + 4, wpad, cp), cdt),   # haloed input row tile
                pltpu.SemaphoreType.DMA(()),
            ],
        ),
        compiler_params=pltpu.CompilerParams(
            dimension_semantics=("parallel", "parallel"),
            vmem_limit_bytes=_VMEM_LIMIT),
    )(*args)


# ------------------------------ Down.forward --------------------------------

def down_forward(x_nchw, params, *, compute_dtype=jnp.float32, row_tile=None):
    """Down.forward: NCHW in, NCHW float32 out."""
    bsz, cin, h0, w0 = x_nchw.shape
    assert h0 % 2 == 0 and w0 % 2 == 0
    cout = params["w_down"].shape[0]
    ho, wo = h0 // 2, w0 // 2
    cp = _round_up(cout, _LANE)          # lane-dense channel padding
    wpad = _round_up(wo + 4, 8)          # zero W-halo baked into the layout
    cdt = compute_dtype

    x_nhwc = jnp.transpose(x_nchw, (0, 2, 3, 1))
    out = _downconv_prelu(x_nhwc, params["w_down"], params["b_down"],
                          params["a_down"], cp=cp, wpad=wpad, cdt=cdt,
                          row_tile=row_tile)                     # (B*Ho, Wpad, Cp)

    n_conv = len(params["w_conv"])
    if n_conv == 0:
        y = out.astype(jnp.float32) * 2.0   # degenerate: out + Identity(out)
    else:
        z = out
        for i in range(n_conv):
            res = out if i == n_conv - 1 else None   # residual fused in last layer
            z = _conv5x5_prelu(z, params["w_conv"][i], params["b_conv"][i],
                               params["a_conv"][i], bsz=bsz, h=ho, w_out=wo,
                               wpad=wpad, cp=cp, cdt=cdt, row_tile=row_tile,
                               residual=res)
        y = z.astype(jnp.float32)

    y = y.reshape(bsz, ho, wpad, cp)[:, :, 2:2 + wo, :cout]
    return jnp.transpose(y, (0, 3, 1, 2))


# ------------------ deterministic params + pure-JAX reference ----------------

def init_params(key, in_channels, out_channels, n_conv):
    keys = jax.random.split(key, 2 + 2 * n_conv)
    params = {
        "w_down": 0.1 * jax.random.normal(keys[0], (out_channels, in_channels, 2, 2),
                                          jnp.float32),
        "b_down": 0.1 * jax.random.normal(keys[1], (out_channels,), jnp.float32),
        "a_down": jnp.array(0.25, jnp.float32),
        "w_conv": [], "b_conv": [], "a_conv": [],
    }
    for i in range(n_conv):
        params["w_conv"].append(0.05 * jax.random.normal(
            keys[2 + 2 * i], (out_channels, out_channels, 5, 5), jnp.float32))
        params["b_conv"].append(0.1 * jax.random.normal(
            keys[3 + 2 * i], (out_channels,), jnp.float32))
        params["a_conv"].append(jnp.array(0.25 + 0.05 * i, jnp.float32))
    return params


def _prelu_ref(x, a):
    return jnp.where(x > 0, x, a * x)


def down_ref(x_nchw, params):
    y = lax.conv_general_dilated(x_nchw, params["w_down"], (2, 2), "VALID",
                                 dimension_numbers=("NCHW", "OIHW", "NCHW"))
    y = y + params["b_down"][None, :, None, None]
    out = _prelu_ref(y, params["a_down"])
    z = out
    for w, b, a in zip(params["w_conv"], params["b_conv"], params["a_conv"]):
        z = lax.conv_general_dilated(z, w, (1, 1), ((2, 2), (2, 2)),
                                     dimension_numbers=("NCHW", "OIHW", "NCHW"))
        z = z + b[None, :, None, None]
        z = _prelu_ref(z, a)
    return out + z


if __name__ == "__main__":
    key = jax.random.PRNGKey(0)
    kx, kp = jax.random.split(key)

    B, Cin, H, W = 2, 4, 16, 16
    Cout, n_conv = 8, 2

    x = jax.random.normal(kx, (B, Cin, H, W), jnp.float32)
    params = init_params(kp, Cin, Cout, n_conv)
    y_ref = down_ref(x, params)

    # (compute dtype, forced row tile, tolerance) -- exercises single-tile,
    # first/interior/last halo branches, and the bf16 MXU path.
    configs = [
        (jnp.float32, None, 1e-3),
        (jnp.float32, 2, 1e-3),
        (jnp.bfloat16, 8, 1e-1),
    ]
    for cdt, rt, tol in configs:
        fn = jax.jit(functools.partial(down_forward, compute_dtype=cdt, row_tile=rt))
        y = jax.block_until_ready(fn(x, params))
        np.testing.assert_allclose(np.asarray(y), np.asarray(y_ref),
                                   atol=tol, rtol=tol)

    print("KERNEL_OK")
</pallas_src>

<mosaic_0001>
module attributes {stable_mosaic.version = 11 : i64} {
  func.func @_downconv_kernel(%arg0: i32, %arg1: memref<8x2x8x8xf32, #tpu.memory_space<vmem>>, %arg2: memref<2x8x128xf32, #tpu.memory_space<vmem>>, %arg3: memref<1x128xf32, #tpu.memory_space<vmem>>, %arg4: memref<1x1xf32, #tpu.memory_space<smem>>, %arg5: memref<8x16x128xf32, #tpu.memory_space<vmem>>) attributes {dimension_semantics = [#tpu.dimension_semantics<parallel>], iteration_bounds = array<i64: 2>, scalar_prefetch = 0 : i64, scratch_operands = 0 : i64, tpu.core_type = #tpu.core_type<tc>, window_params = [{transform_indices = @transform_0, window_bounds = array<i64: 8, 2, 8, 8>}, {pipeline_mode = #tpu.pipeline_mode<synchronous>, transform_indices = @transform_1, window_bounds = array<i64: 2, 8, 128>}, {pipeline_mode = #tpu.pipeline_mode<synchronous>, transform_indices = @transform_2, window_bounds = array<i64: 1, 128>}, {transform_indices = @transform_3, window_bounds = array<i64: 1, 1>}, {transform_indices = @transform_4, window_bounds = array<i64: 8, 16, 128>}]} {
    %c0 = arith.constant 0 : index
    %c0_0 = arith.constant 0 : index
    %c0_1 = arith.constant 0 : index
    %c0_2 = arith.constant 0 : index
    %0 = vector.load %arg1[%c0, %c0_0, %c0_1, %c0_2] : memref<8x2x8x8xf32, #tpu.memory_space<vmem>>, vector<8x2x8x8xf32>
    %1 = vector.extract_strided_slice %0 {offsets = [0, 0, 0, 0], sizes = [8, 1, 8, 8], strides = [1, 1, 1, 1]} : vector<8x2x8x8xf32> to vector<8x1x8x8xf32>
    %2 = vector.shape_cast %1 : vector<8x1x8x8xf32> to vector<8x8x8xf32>
    %3 = vector.shape_cast %2 : vector<8x8x8xf32> to vector<64x8xf32>
    %4 = vector.extract_strided_slice %0 {offsets = [0, 1, 0, 0], sizes = [8, 1, 8, 8], strides = [1, 1, 1, 1]} : vector<8x2x8x8xf32> to vector<8x1x8x8xf32>
    %5 = vector.shape_cast %4 : vector<8x1x8x8xf32> to vector<8x8x8xf32>
    %6 = vector.shape_cast %5 : vector<8x8x8xf32> to vector<64x8xf32>
    %c0_3 = arith.constant 0 : index
    %c0_4 = arith.constant 0 : index
    %c0_5 = arith.constant 0 : index
    %7 = vector.load %arg2[%c0_3, %c0_4, %c0_5] : memref<2x8x128xf32, #tpu.memory_space<vmem>>, vector<1x8x128xf32>
    %8 = vector.shape_cast %7 : vector<1x8x128xf32> to vector<8x128xf32>
    %cst = arith.constant dense<0.000000e+00> : vector<64x128xf32>
    %9 = tpu.matmul %3, %8, %cst {dimension_numbers = #tpu.dot_dimension_numbers<[1], [0], [0], [1], [0, 0, 1, 1], [], []>} : vector<64x8xf32>, vector<8x128xf32>, vector<64x128xf32> -> vector<64x128xf32>
    %c1 = arith.constant 1 : index
    %c0_6 = arith.constant 0 : index
    %c0_7 = arith.constant 0 : index
    %10 = vector.load %arg2[%c1, %c0_6, %c0_7] : memref<2x8x128xf32, #tpu.memory_space<vmem>>, vector<1x8x128xf32>
    %11 = vector.shape_cast %10 : vector<1x8x128xf32> to vector<8x128xf32>
    %cst_8 = arith.constant dense<0.000000e+00> : vector<64x128xf32>
    %12 = tpu.matmul %6, %11, %cst_8 {dimension_numbers = #tpu.dot_dimension_numbers<[1], [0], [0], [1], [0, 0, 1, 1], [], []>} : vector<64x8xf32>, vector<8x128xf32>, vector<64x128xf32> -> vector<64x128xf32>
    %13 = arith.addf %9, %12 : vector<64x128xf32>
    %c0_9 = arith.constant 0 : index
    %c0_10 = arith.constant 0 : index
    %14 = vector.load %arg3[%c0_9, %c0_10] : memref<1x128xf32, #tpu.memory_space<vmem>>, vector<1x128xf32>
    %15 = vector.broadcast %14 : vector<1x128xf32> to vector<64x128xf32>
    %16 = arith.addf %13, %15 : vector<64x128xf32>
    %c0_11 = arith.constant 0 : index
    %c0_12 = arith.constant 0 : index
    %17 = memref.load %arg4[%c0_11, %c0_12] : memref<1x1xf32, #tpu.memory_space<smem>>
    %cst_13 = arith.constant 0.000000e+00 : f32
    %18 = vector.broadcast %cst_13 : f32 to vector<64x128xf32>
    %19 = arith.cmpf ogt, %16, %18 : vector<64x128xf32>
    %20 = vector.broadcast %17 : f32 to vector<64x128xf32>
    %21 = arith.mulf %20, %16 : vector<64x128xf32>
    %22 = arith.select %19, %16, %21 : vector<64x128xi1>, vector<64x128xf32>
    %23 = vector.shape_cast %22 : vector<64x128xf32> to vector<8x8x128xf32>
    %c0_14 = arith.constant 0 : index
    %c2 = arith.constant 2 : index
    %c0_15 = arith.constant 0 : index
    %24 = vector.load %arg5[%c0_14, %c2, %c0_15] : memref<8x16x128xf32, #tpu.memory_space<vmem>>, vector<8x8x128xf32>
    tpu.vector_store %arg5[%c0_14, %c2, %c0_15], %23 {strides = array<i32>} : memref<8x16x128xf32, #tpu.memory_space<vmem>>, vector<8x8x128xf32>,
    %cst_16 = arith.constant 0.000000e+00 : f32
    %25 = vector.broadcast %cst_16 : f32 to vector<8x2x128xf32>
    %c0_17 = arith.constant 0 : index
    %c0_18 = arith.constant 0 : index
    %c0_19 = arith.constant 0 : index
    %26 = vector.load %arg5[%c0_17, %c0_18, %c0_19] : memref<8x16x128xf32, #tpu.memory_space<vmem>>, vector<8x2x128xf32>
    tpu.vector_store %arg5[%c0_17, %c0_18, %c0_19], %25 {strides = array<i32>} : memref<8x16x128xf32, #tpu.memory_space<vmem>>, vector<8x2x128xf32>,
    %cst_20 = arith.constant 0.000000e+00 : f32
    %27 = vector.broadcast %cst_20 : f32 to vector<8x6x128xf32>
    %c0_21 = arith.constant 0 : index
    %c10 = arith.constant 10 : index
    %c0_22 = arith.constant 0 : index
    %28 = vector.load %arg5[%c0_21, %c10, %c0_22] : memref<8x16x128xf32, #tpu.memory_space<vmem>>, vector<8x6x128xf32>
    tpu.vector_store %arg5[%c0_21, %c10, %c0_22], %27 {strides = array<i32>} : memref<8x16x128xf32, #tpu.memory_space<vmem>>, vector<8x6x128xf32>,
    return
  }
  func.func @transform_0(%arg0: i32) -> (i32, i32, i32, i32) {
    %c0_i32 = arith.constant 0 : i32
    %c0_i32_0 = arith.constant 0 : i32
    %c0_i32_1 = arith.constant 0 : i32
    %c0_i32_2 = arith.constant 0 : i32
    return %arg0, %c0_i32, %c0_i32_0, %c0_i32_1 : i32, i32, i32, i32
  }
  func.func @transform_1(%arg0: i32) -> (i32, i32, i32) {
    %c0_i32 = arith.constant 0 : i32
    %c0_i32_0 = arith.constant 0 : i32
    %c0_i32_1 = arith.constant 0 : i32
    %c0_i32_2 = arith.constant 0 : i32
    return %c0_i32, %c0_i32_0, %c0_i32_1 : i32, i32, i32
  }
  func.func @transform_2(%arg0: i32) -> (i32, i32) {
    %c0_i32 = arith.constant 0 : i32
    %c0_i32_0 = arith.constant 0 : i32
    %c0_i32_1 = arith.constant 0 : i32
    return %c0_i32, %c0_i32_0 : i32, i32
  }
  func.func @transform_3(%arg0: i32) -> (i32, i32) {
    %c0_i32 = arith.constant 0 : i32
    %c0_i32_0 = arith.constant 0 : i32
    %c0_i32_1 = arith.constant 0 : i32
    return %c0_i32, %c0_i32_0 : i32, i32
  }
  func.func @transform_4(%arg0: i32) -> (i32, i32, i32) {
    %c0_i32 = arith.constant 0 : i32
    %c0_i32_0 = arith.constant 0 : i32
    %c0_i32_1 = arith.constant 0 : i32
    return %arg0, %c0_i32, %c0_i32_0 : i32, i32, i32
  }
}

module attributes {stable_mosaic.version = 11 : i64} {
  func.func @kernel(%arg0: i32, %arg1: i32, %arg2: memref<2x8x16x128xf32, #tpu.memory_space<any>>, %arg3: memref<5x640x128xf32, #tpu.memory_space<vmem>>, %arg4: memref<1x128xf32, #tpu.memory_space<vmem>>, %arg5: memref<1x1xf32, #tpu.memory_space<smem>>, %arg6: memref<4x16x128xf32, #tpu.memory_space<vmem>>, %arg7: memref<8x16x128xf32, #tpu.memory_space<vmem>>, %arg8: memref<!tpu.dma_semaphore, #tpu.memory_space<semaphore_mem>>) attributes {dimension_semantics = [#tpu.dimension_semantics<parallel>, #tpu.dimension_semantics<parallel>], iteration_bounds = array<i64: 2, 2>, scalar_prefetch = 0 : i64, scratch_operands = 2 : i64, tpu.core_type = #tpu.core_type<tc>, window_params = [{}, {pipeline_mode = #tpu.pipeline_mode<synchronous>, transform_indices = @transform_1, window_bounds = array<i64: 5, 640, 128>}, {pipeline_mode = #tpu.pipeline_mode<synchronous>, transform_indices = @transform_2, window_bounds = array<i64: 1, 128>}, {transform_indices = @transform_3, window_bounds = array<i64: 1, 1>}, {transform_indices = @transform_4, window_bounds = array<i64: 4, 16, 128>}]} {
    %cst = arith.constant 0.000000e+00 : f32
    %0 = vector.broadcast %cst : f32 to vector<2x16x128xf32>
    %c0_i32 = arith.constant 0 : i32
    %1 = arith.cmpi eq, %arg1, %c0_i32 : i32
    %2 = arith.extui %1 : i1 to i32
    %c0_i32_0 = arith.constant 0 : i32
    %3 = arith.cmpi ne, %2, %c0_i32_0 : i32
    scf.if %3 {
      %c0_36 = arith.constant 0 : index
      %c0_37 = arith.constant 0 : index
      %c0_38 = arith.constant 0 : index
      %56 = vector.load %arg7[%c0_36, %c0_37, %c0_38] : memref<8x16x128xf32, #tpu.memory_space<vmem>>, vector<2x16x128xf32>
      tpu.vector_store %arg7[%c0_36, %c0_37, %c0_38], %0 {strides = array<i32>} : memref<8x16x128xf32, #tpu.memory_space<vmem>>, vector<2x16x128xf32>,
      %c0_i32_39 = arith.constant 0 : i32
      %c0_i32_40 = arith.constant 0 : i32
      %c0_i32_41 = arith.constant 0 : i32
      %57 = tpu.memref_slice %arg2[%arg0, %c0_i32_39, %c0_i32_40, %c0_i32_41] : memref<2x8x16x128xf32, #tpu.memory_space<any>> -> memref<1x6x16x128xf32, #tpu.memory_space<any>>
      %58 = tpu.memref_squeeze %57 : memref<1x6x16x128xf32, #tpu.memory_space<any>> -> memref<6x16x128xf32, #tpu.memory_space<any>>
      %c2_i32 = arith.constant 2 : i32
      %c0_i32_42 = arith.constant 0 : i32
      %c0_i32_43 = arith.constant 0 : i32
      %59 = tpu.memref_slice %arg7[%c2_i32, %c0_i32_42, %c0_i32_43] : memref<8x16x128xf32, #tpu.memory_space<vmem>> -> memref<6x16x128xf32, #tpu.memory_space<vmem>>
      tpu.enqueue_dma source(%58 : memref<6x16x128xf32, #tpu.memory_space<any>>) target(%59 : memref<6x16x128xf32, #tpu.memory_space<vmem>>) target_semaphore(%arg8 : memref<!tpu.dma_semaphore, #tpu.memory_space<semaphore_mem>>)
      %c0_i32_44 = arith.constant 0 : i32
      %c0_i32_45 = arith.constant 0 : i32
      %c0_i32_46 = arith.constant 0 : i32
      %60 = tpu.memref_slice %arg2[%arg0, %c0_i32_44, %c0_i32_45, %c0_i32_46] : memref<2x8x16x128xf32, #tpu.memory_space<any>> -> memref<1x6x16x128xf32, #tpu.memory_space<any>>
      %61 = tpu.memref_squeeze %60 : memref<1x6x16x128xf32, #tpu.memory_space<any>> -> memref<6x16x128xf32, #tpu.memory_space<any>>
      %c2_i32_47 = arith.constant 2 : i32
      %c0_i32_48 = arith.constant 0 : i32
      %c0_i32_49 = arith.constant 0 : i32
      %62 = tpu.memref_slice %arg7[%c2_i32_47, %c0_i32_48, %c0_i32_49] : memref<8x16x128xf32, #tpu.memory_space<vmem>> -> memref<6x16x128xf32, #tpu.memory_space<vmem>>
      tpu.wait_dma2 semaphore(%arg8 : memref<!tpu.dma_semaphore, #tpu.memory_space<semaphore_mem>>) src(%61 : memref<6x16x128xf32, #tpu.memory_space<any>>) dst(%62 : memref<6x16x128xf32, #tpu.memory_space<vmem>>)
    } else {
    }
    %c1_i32 = arith.constant 1 : i32
    %4 = arith.cmpi eq, %arg1, %c1_i32 : i32
    %5 = arith.extui %4 : i1 to i32
    %c0_i32_1 = arith.constant 0 : i32
    %6 = arith.cmpi ne, %5, %c0_i32_1 : i32
    scf.if %6 {
      %c6 = arith.constant 6 : index
      %c0_36 = arith.constant 0 : index
      %c0_37 = arith.constant 0 : index
      %56 = vector.load %arg7[%c6, %c0_36, %c0_37] : memref<8x16x128xf32, #tpu.memory_space<vmem>>, vector<2x16x128xf32>
      tpu.vector_store %arg7[%c6, %c0_36, %c0_37], %0 {strides = array<i32>} : memref<8x16x128xf32, #tpu.memory_space<vmem>>, vector<2x16x128xf32>,
      %c2_i32 = arith.constant 2 : i32
      %c0_i32_38 = arith.constant 0 : i32
      %c0_i32_39 = arith.constant 0 : i32
      %57 = tpu.memref_slice %arg2[%arg0, %c2_i32, %c0_i32_38, %c0_i32_39] : memref<2x8x16x128xf32, #tpu.memory_space<any>> -> memref<1x6x16x128xf32, #tpu.memory_space<any>>
      %58 = tpu.memref_squeeze %57 : memref<1x6x16x128xf32, #tpu.memory_space<any>> -> memref<6x16x128xf32, #tpu.memory_space<any>>
      %c0_i32_40 = arith.constant 0 : i32
      %c0_i32_41 = arith.constant 0 : i32
      %c0_i32_42 = arith.constant 0 : i32
      %59 = tpu.memref_slice %arg7[%c0_i32_40, %c0_i32_41, %c0_i32_42] : memref<8x16x128xf32, #tpu.memory_space<vmem>> -> memref<6x16x128xf32, #tpu.memory_space<vmem>>
      tpu.enqueue_dma source(%58 : memref<6x16x128xf32, #tpu.memory_space<any>>) target(%59 : memref<6x16x128xf32, #tpu.memory_space<vmem>>) target_semaphore(%arg8 : memref<!tpu.dma_semaphore, #tpu.memory_space<semaphore_mem>>)
      %c2_i32_43 = arith.constant 2 : i32
      %c0_i32_44 = arith.constant 0 : i32
      %c0_i32_45 = arith.constant 0 : i32
      %60 = tpu.memref_slice %arg2[%arg0, %c2_i32_43, %c0_i32_44, %c0_i32_45] : memref<2x8x16x128xf32, #tpu.memory_space<any>> -> memref<1x6x16x128xf32, #tpu.memory_space<any>>
      %61 = tpu.memref_squeeze %60 : memref<1x6x16x128xf32, #tpu.memory_space<any>> -> memref<6x16x128xf32, #tpu.memory_space<any>>
      %c0_i32_46 = arith.constant 0 : i32
      %c0_i32_47 = arith.constant 0 : i32
      %c0_i32_48 = arith.constant 0 : i32
      %62 = tpu.memref_slice %arg7[%c0_i32_46, %c0_i32_47, %c0_i32_48] : memref<8x16x128xf32, #tpu.memory_space<vmem>> -> memref<6x16x128xf32, #tpu.memory_space<vmem>>
      tpu.wait_dma2 semaphore(%arg8 : memref<!tpu.dma_semaphore, #tpu.memory_space<semaphore_mem>>) src(%61 : memref<6x16x128xf32, #tpu.memory_space<any>>) dst(%62 : memref<6x16x128xf32, #tpu.memory_space<vmem>>)
    } else {
    }
    %c0 = arith.constant 0 : index
    %c0_2 = arith.constant 0 : index
    %c0_3 = arith.constant 0 : index
    %7 = vector.load %arg7[%c0, %c0_2, %c0_3] : memref<8x16x128xf32, #tpu.memory_space<vmem>>, vector<8x16x128xf32>
    %8 = vector.extract_strided_slice %7 {offsets = [0, 0, 0], sizes = [8, 8, 128], strides = [1, 1, 1]} : vector<8x16x128xf32> to vector<8x8x128xf32>
    %9 = vector.extract_strided_slice %7 {offsets = [0, 1, 0], sizes = [8, 8, 128], strides = [1, 1, 1]} : vector<8x16x128xf32> to vector<8x8x128xf32>
    %10 = vector.extract_strided_slice %7 {offsets = [0, 2, 0], sizes = [8, 8, 128], strides = [1, 1, 1]} : vector<8x16x128xf32> to vector<8x8x128xf32>
    %11 = vector.extract_strided_slice %7 {offsets = [0, 3, 0], sizes = [8, 8, 128], strides = [1, 1, 1]} : vector<8x16x128xf32> to vector<8x8x128xf32>
    %12 = vector.extract_strided_slice %7 {offsets = [0, 4, 0], sizes = [8, 8, 128], strides = [1, 1, 1]} : vector<8x16x128xf32> to vector<8x8x128xf32>
    %13 = tpu.concatenate %8, %9, %10, %11, %12 in 2 : vector<8x8x128xf32>, vector<8x8x128xf32>, vector<8x8x128xf32>, vector<8x8x128xf32>, vector<8x8x128xf32> -> vector<8x8x640xf32>
    %14 = vector.shape_cast %13 : vector<8x8x640xf32> to vector<64x640xf32>
    %cst_4 = arith.constant 0.000000e+00 : f32
    %15 = vector.broadcast %cst_4 : f32 to vector<32x128xf32>
    %16 = vector.extract_strided_slice %14 {offsets = [0, 0], sizes = [32, 640], strides = [1, 1]} : vector<64x640xf32> to vector<32x640xf32>
    %c0_5 = arith.constant 0 : index
    %c0_6 = arith.constant 0 : index
    %c0_7 = arith.constant 0 : index
    %17 = vector.load %arg3[%c0_5, %c0_6, %c0_7] : memref<5x640x128xf32, #tpu.memory_space<vmem>>, vector<1x640x128xf32>
    %18 = vector.shape_cast %17 : vector<1x640x128xf32> to vector<640x128xf32>
    %cst_8 = arith.constant dense<0.000000e+00> : vector<32x128xf32>
    %19 = tpu.matmul %16, %18, %cst_8 {dimension_numbers = #tpu.dot_dimension_numbers<[1], [0], [0], [1], [0, 0, 1, 1], [], []>} : vector<32x640xf32>, vector<640x128xf32>, vector<32x128xf32> -> vector<32x128xf32>
    %20 = arith.addf %15, %19 : vector<32x128xf32>
    %21 = vector.extract_strided_slice %14 {offsets = [8, 0], sizes = [32, 640], strides = [1, 1]} : vector<64x640xf32> to vector<32x640xf32>
    %c1 = arith.constant 1 : index
    %c0_9 = arith.constant 0 : index
    %c0_10 = arith.constant 0 : index
    %22 = vector.load %arg3[%c1, %c0_9, %c0_10] : memref<5x640x128xf32, #tpu.memory_space<vmem>>, vector<1x640x128xf32>
    %23 = vector.shape_cast %22 : vector<1x640x128xf32> to vector<640x128xf32>
    %cst_11 = arith.constant dense<0.000000e+00> : vector<32x128xf32>
    %24 = tpu.matmul %21, %23, %cst_11 {dimension_numbers = #tpu.dot_dimension_numbers<[1], [0], [0], [1], [0, 0, 1, 1], [], []>} : vector<32x640xf32>, vector<640x128xf32>, vector<32x128xf32> -> vector<32x128xf32>
    %25 = arith.addf %20, %24 : vector<32x128xf32>
    %26 = vector.extract_strided_slice %14 {offsets = [16, 0], sizes = [32, 640], strides = [1, 1]} : vector<64x640xf32> to vector<32x640xf32>
    %c2 = arith.constant 2 : index
    %c0_12 = arith.constant 0 : index
    %c0_13 = arith.constant 0 : index
    %27 = vector.load %arg3[%c2, %c0_12, %c0_13] : memref<5x640x128xf32, #tpu.memory_space<vmem>>, vector<1x640x128xf32>
    %28 = vector.shape_cast %27 : vector<1x640x128xf32> to vector<640x128xf32>
    %cst_14 = arith.constant dense<0.000000e+00> : vector<32x128xf32>
    %29 = tpu.matmul %26, %28, %cst_14 {dimension_numbers = #tpu.dot_dimension_numbers<[1], [0], [0], [1], [0, 0, 1, 1], [], []>} : vector<32x640xf32>, vector<640x128xf32>, vector<32x128xf32> -> vector<32x128xf32>
    %30 = arith.addf %25, %29 : vector<32x128xf32>
    %31 = vector.extract_strided_slice %14 {offsets = [24, 0], sizes = [32, 640], strides = [1, 1]} : vector<64x640xf32> to vector<32x640xf32>
    %c3 = arith.constant 3 : index
    %c0_15 = arith.constant 0 : index
    %c0_16 = arith.constant 0 : index
    %32 = vector.load %arg3[%c3, %c0_15, %c0_16] : memref<5x640x128xf32, #tpu.memory_space<vmem>>, vector<1x640x128xf32>
    %33 = vector.shape_cast %32 : vector<1x640x128xf32> to vector<640x128xf32>
    %cst_17 = arith.constant dense<0.000000e+00> : vector<32x128xf32>
    %34 = tpu.matmul %31, %33, %cst_17 {dimension_numbers = #tpu.dot_dimension_numbers<[1], [0], [0], [1], [0, 0, 1, 1], [], []>} : vector<32x640xf32>, vector<640x128xf32>, vector<32x128xf32> -> vector<32x128xf32>
    %35 = arith.addf %30, %34 : vector<32x128xf32>
    %36 = vector.extract_strided_slice %14 {offsets = [32, 0], sizes = [32, 640], strides = [1, 1]} : vector<64x640xf32> to vector<32x640xf32>
    %c4 = arith.constant 4 : index
    %c0_18 = arith.constant 0 : index
    %c0_19 = arith.constant 0 : index
    %37 = vector.load %arg3[%c4, %c0_18, %c0_19] : memref<5x640x128xf32, #tpu.memory_space<vmem>>, vector<1x640x128xf32>
    %38 = vector.shape_cast %37 : vector<1x640x128xf32> to vector<640x128xf32>
    %cst_20 = arith.constant dense<0.000000e+00> : vector<32x128xf32>
    %39 = tpu.matmul %36, %38, %cst_20 {dimension_numbers = #tpu.dot_dimension_numbers<[1], [0], [0], [1], [0, 0, 1, 1], [], []>} : vector<32x640xf32>, vector<640x128xf32>, vector<32x128xf32> -> vector<32x128xf32>
    %40 = arith.addf %35, %39 : vector<32x128xf32>
    %c0_21 = arith.constant 0 : index
    %c0_22 = arith.constant 0 : index
    %41 = vector.load %arg4[%c0_21, %c0_22] : memref<1x128xf32, #tpu.memory_space<vmem>>, vector<1x128xf32>
    %42 = vector.broadcast %41 : vector<1x128xf32> to vector<32x128xf32>
    %43 = arith.addf %40, %42 : vector<32x128xf32>
    %c0_23 = arith.constant 0 : index
    %c0_24 = arith.constant 0 : index
    %44 = memref.load %arg5[%c0_23, %c0_24] : memref<1x1xf32, #tpu.memory_space<smem>>
    %cst_25 = arith.constant 0.000000e+00 : f32
    %45 = vector.broadcast %cst_25 : f32 to vector<32x128xf32>
    %46 = arith.cmpf ogt, %43, %45 : vector<32x128xf32>
    %47 = vector.broadcast %44 : f32 to vector<32x128xf32>
    %48 = arith.mulf %47, %43 : vector<32x128xf32>
    %49 = arith.select %46, %43, %48 : vector<32x128xi1>, vector<32x128xf32>
    %50 = vector.shape_cast %49 : vector<32x128xf32> to vector<4x8x128xf32>
    %c0_26 = arith.constant 0 : index
    %c2_27 = arith.constant 2 : index
    %c0_28 = arith.constant 0 : index
    %51 = vector.load %arg6[%c0_26, %c2_27, %c0_28] : memref<4x16x128xf32, #tpu.memory_space<vmem>>, vector<4x8x128xf32>
    tpu.vector_store %arg6[%c0_26, %c2_27, %c0_28], %50 {strides = array<i32>} : memref<4x16x128xf32, #tpu.memory_space<vmem>>, vector<4x8x128xf32>,
    %cst_29 = arith.constant 0.000000e+00 : f32
    %52 = vector.broadcast %cst_29 : f32 to vector<4x2x128xf32>
    %c0_30 = arith.constant 0 : index
    %c0_31 = arith.constant 0 : index
    %c0_32 = arith.constant 0 : index
    %53 = vector.load %arg6[%c0_30, %c0_31, %c0_32] : memref<4x16x128xf32, #tpu.memory_space<vmem>>, vector<4x2x128xf32>
    tpu.vector_store %arg6[%c0_30, %c0_31, %c0_32], %52 {strides = array<i32>} : memref<4x16x128xf32, #tpu.memory_space<vmem>>, vector<4x2x128xf32>,
    %cst_33 = arith.constant 0.000000e+00 : f32
    %54 = vector.broadcast %cst_33 : f32 to vector<4x6x128xf32>
    %c0_34 = arith.constant 0 : index
    %c10 = arith.constant 10 : index
    %c0_35 = arith.constant 0 : index
    %55 = vector.load %arg6[%c0_34, %c10, %c0_35] : memref<4x16x128xf32, #tpu.memory_space<vmem>>, vector<4x6x128xf32>
    tpu.vector_store %arg6[%c0_34, %c10, %c0_35], %54 {strides = array<i32>} : memref<4x16x128xf32, #tpu.memory_space<vmem>>, vector<4x6x128xf32>,
    return
  }
  func.func @transform_1(%arg0: i32, %arg1: i32) -> (i32, i32, i32) {
    %c0_i32 = arith.constant 0 : i32
    %c0_i32_0 = arith.constant 0 : i32
    %c0_i32_1 = arith.constant 0 : i32
    %c0_i32_2 = arith.constant 0 : i32
    return %c0_i32, %c0_i32_0, %c0_i32_1 : i32, i32, i32
  }
  func.func @transform_2(%arg0: i32, %arg1: i32) -> (i32, i32) {
    %c0_i32 = arith.constant 0 : i32
    %c0_i32_0 = arith.constant 0 : i32
    %c0_i32_1 = arith.constant 0 : i32
    return %c0_i32, %c0_i32_0 : i32, i32
  }
  func.func @transform_3(%arg0: i32, %arg1: i32) -> (i32, i32) {
    %c0_i32 = arith.constant 0 : i32
    %c0_i32_0 = arith.constant 0 : i32
    %c0_i32_1 = arith.constant 0 : i32
    return %c0_i32, %c0_i32_0 : i32, i32
  }
  func.func @transform_4(%arg0: i32, %arg1: i32) -> (i32, i32, i32) {
    %c2_i32 = arith.constant 2 : i32
    %0 = arith.muli %arg0, %c2_i32 : i32
    %1 = arith.addi %0, %arg1 : i32
    %c0_i32 = arith.constant 0 : i32
    %c0_i32_0 = arith.constant 0 : i32
    %c0_i32_1 = arith.constant 0 : i32
    return %1, %c0_i32, %c0_i32_0 : i32, i32, i32
  }
}

module attributes {stable_mosaic.version = 11 : i64} {
  func.func @kernel(%arg0: i32, %arg1: i32, %arg2: memref<2x8x16x128xf32, #tpu.memory_space<any>>, %arg3: memref<5x640x128xf32, #tpu.memory_space<vmem>>, %arg4: memref<1x128xf32, #tpu.memory_space<vmem>>, %arg5: memref<1x1xf32, #tpu.memory_space<smem>>, %arg6: memref<4x16x128xf32, #tpu.memory_space<vmem>>, %arg7: memref<4x16x128xf32, #tpu.memory_space<vmem>>, %arg8: memref<8x16x128xf32, #tpu.memory_space<vmem>>, %arg9: memref<!tpu.dma_semaphore, #tpu.memory_space<semaphore_mem>>) attributes {dimension_semantics = [#tpu.dimension_semantics<parallel>, #tpu.dimension_semantics<parallel>], iteration_bounds = array<i64: 2, 2>, scalar_prefetch = 0 : i64, scratch_operands = 2 : i64, tpu.core_type = #tpu.core_type<tc>, window_params = [{}, {pipeline_mode = #tpu.pipeline_mode<synchronous>, transform_indices = @transform_1, window_bounds = array<i64: 5, 640, 128>}, {pipeline_mode = #tpu.pipeline_mode<synchronous>, transform_indices = @transform_2, window_bounds = array<i64: 1, 128>}, {transform_indices = @transform_3, window_bounds = array<i64: 1, 1>}, {transform_indices = @transform_4, window_bounds = array<i64: 4, 16, 128>}, {transform_indices = @transform_5, window_bounds = array<i64: 4, 16, 128>}]} {
    %cst = arith.constant 0.000000e+00 : f32
    %0 = vector.broadcast %cst : f32 to vector<2x16x128xf32>
    %c0_i32 = arith.constant 0 : i32
    %1 = arith.cmpi eq, %arg1, %c0_i32 : i32
    %2 = arith.extui %1 : i1 to i32
    %c0_i32_0 = arith.constant 0 : i32
    %3 = arith.cmpi ne, %2, %c0_i32_0 : i32
    scf.if %3 {
      %c0_39 = arith.constant 0 : index
      %c0_40 = arith.constant 0 : index
      %c0_41 = arith.constant 0 : index
      %59 = vector.load %arg8[%c0_39, %c0_40, %c0_41] : memref<8x16x128xf32, #tpu.memory_space<vmem>>, vector<2x16x128xf32>
      tpu.vector_store %arg8[%c0_39, %c0_40, %c0_41], %0 {strides = array<i32>} : memref<8x16x128xf32, #tpu.memory_space<vmem>>, vector<2x16x128xf32>,
      %c0_i32_42 = arith.constant 0 : i32
      %c0_i32_43 = arith.constant 0 : i32
      %c0_i32_44 = arith.constant 0 : i32
      %60 = tpu.memref_slice %arg2[%arg0, %c0_i32_42, %c0_i32_43, %c0_i32_44] : memref<2x8x16x128xf32, #tpu.memory_space<any>> -> memref<1x6x16x128xf32, #tpu.memory_space<any>>
      %61 = tpu.memref_squeeze %60 : memref<1x6x16x128xf32, #tpu.memory_space<any>> -> memref<6x16x128xf32, #tpu.memory_space<any>>
      %c2_i32 = arith.constant 2 : i32
      %c0_i32_45 = arith.constant 0 : i32
      %c0_i32_46 = arith.constant 0 : i32
      %62 = tpu.memref_slice %arg8[%c2_i32, %c0_i32_45, %c0_i32_46] : memref<8x16x128xf32, #tpu.memory_space<vmem>> -> memref<6x16x128xf32, #tpu.memory_space<vmem>>
      tpu.enqueue_dma source(%61 : memref<6x16x128xf32, #tpu.memory_space<any>>) target(%62 : memref<6x16x128xf32, #tpu.memory_space<vmem>>) target_semaphore(%arg9 : memref<!tpu.dma_semaphore, #tpu.memory_space<semaphore_mem>>)
      %c0_i32_47 = arith.constant 0 : i32
      %c0_i32_48 = arith.constant 0 : i32
      %c0_i32_49 = arith.constant 0 : i32
      %63 = tpu.memref_slice %arg2[%arg0, %c0_i32_47, %c0_i32_48, %c0_i32_49] : memref<2x8x16x128xf32, #tpu.memory_space<any>> -> memref<1x6x16x128xf32, #tpu.memory_space<any>>
      %64 = tpu.memref_squeeze %63 : memref<1x6x16x128xf32, #tpu.memory_space<any>> -> memref<6x16x128xf32, #tpu.memory_space<any>>
      %c2_i32_50 = arith.constant 2 : i32
      %c0_i32_51 = arith.constant 0 : i32
      %c0_i32_52 = arith.constant 0 : i32
      %65 = tpu.memref_slice %arg8[%c2_i32_50, %c0_i32_51, %c0_i32_52] : memref<8x16x128xf32, #tpu.memory_space<vmem>> -> memref<6x16x128xf32, #tpu.memory_space<vmem>>
      tpu.wait_dma2 semaphore(%arg9 : memref<!tpu.dma_semaphore, #tpu.memory_space<semaphore_mem>>) src(%64 : memref<6x16x128xf32, #tpu.memory_space<any>>) dst(%65 : memref<6x16x128xf32, #tpu.memory_space<vmem>>)
    } else {
    }
    %c1_i32 = arith.constant 1 : i32
    %4 = arith.cmpi eq, %arg1, %c1_i32 : i32
    %5 = arith.extui %4 : i1 to i32
    %c0_i32_1 = arith.constant 0 : i32
    %6 = arith.cmpi ne, %5, %c0_i32_1 : i32
    scf.if %6 {
      %c6 = arith.constant 6 : index
      %c0_39 = arith.constant 0 : index
      %c0_40 = arith.constant 0 : index
      %59 = vector.load %arg8[%c6, %c0_39, %c0_40] : memref<8x16x128xf32, #tpu.memory_space<vmem>>, vector<2x16x128xf32>
      tpu.vector_store %arg8[%c6, %c0_39, %c0_40], %0 {strides = array<i32>} : memref<8x16x128xf32, #tpu.memory_space<vmem>>, vector<2x16x128xf32>,
      %c2_i32 = arith.constant 2 : i32
      %c0_i32_41 = arith.constant 0 : i32
      %c0_i32_42 = arith.constant 0 : i32
      %60 = tpu.memref_slice %arg2[%arg0, %c2_i32, %c0_i32_41, %c0_i32_42] : memref<2x8x16x128xf32, #tpu.memory_space<any>> -> memref<1x6x16x128xf32, #tpu.memory_space<any>>
      %61 = tpu.memref_squeeze %60 : memref<1x6x16x128xf32, #tpu.memory_space<any>> -> memref<6x16x128xf32, #tpu.memory_space<any>>
      %c0_i32_43 = arith.constant 0 : i32
      %c0_i32_44 = arith.constant 0 : i32
      %c0_i32_45 = arith.constant 0 : i32
      %62 = tpu.memref_slice %arg8[%c0_i32_43, %c0_i32_44, %c0_i32_45] : memref<8x16x128xf32, #tpu.memory_space<vmem>> -> memref<6x16x128xf32, #tpu.memory_space<vmem>>
      tpu.enqueue_dma source(%61 : memref<6x16x128xf32, #tpu.memory_space<any>>) target(%62 : memref<6x16x128xf32, #tpu.memory_space<vmem>>) target_semaphore(%arg9 : memref<!tpu.dma_semaphore, #tpu.memory_space<semaphore_mem>>)
      %c2_i32_46 = arith.constant 2 : i32
      %c0_i32_47 = arith.constant 0 : i32
      %c0_i32_48 = arith.constant 0 : i32
      %63 = tpu.memref_slice %arg2[%arg0, %c2_i32_46, %c0_i32_47, %c0_i32_48] : memref<2x8x16x128xf32, #tpu.memory_space<any>> -> memref<1x6x16x128xf32, #tpu.memory_space<any>>
      %64 = tpu.memref_squeeze %63 : memref<1x6x16x128xf32, #tpu.memory_space<any>> -> memref<6x16x128xf32, #tpu.memory_space<any>>
      %c0_i32_49 = arith.constant 0 : i32
      %c0_i32_50 = arith.constant 0 : i32
      %c0_i32_51 = arith.constant 0 : i32
      %65 = tpu.memref_slice %arg8[%c0_i32_49, %c0_i32_50, %c0_i32_51] : memref<8x16x128xf32, #tpu.memory_space<vmem>> -> memref<6x16x128xf32, #tpu.memory_space<vmem>>
      tpu.wait_dma2 semaphore(%arg9 : memref<!tpu.dma_semaphore, #tpu.memory_space<semaphore_mem>>) src(%64 : memref<6x16x128xf32, #tpu.memory_space<any>>) dst(%65 : memref<6x16x128xf32, #tpu.memory_space<vmem>>)
    } else {
    }
    %c0 = arith.constant 0 : index
    %c0_2 = arith.constant 0 : index
    %c0_3 = arith.constant 0 : index
    %7 = vector.load %arg8[%c0, %c0_2, %c0_3] : memref<8x16x128xf32, #tpu.memory_space<vmem>>, vector<8x16x128xf32>
    %8 = vector.extract_strided_slice %7 {offsets = [0, 0, 0], sizes = [8, 8, 128], strides = [1, 1, 1]} : vector<8x16x128xf32> to vector<8x8x128xf32>
    %9 = vector.extract_strided_slice %7 {offsets = [0, 1, 0], sizes = [8, 8, 128], strides = [1, 1, 1]} : vector<8x16x128xf32> to vector<8x8x128xf32>
    %10 = vector.extract_strided_slice %7 {offsets = [0, 2, 0], sizes = [8, 8, 128], strides = [1, 1, 1]} : vector<8x16x128xf32> to vector<8x8x128xf32>
    %11 = vector.extract_strided_slice %7 {offsets = [0, 3, 0], sizes = [8, 8, 128], strides = [1, 1, 1]} : vector<8x16x128xf32> to vector<8x8x128xf32>
    %12 = vector.extract_strided_slice %7 {offsets = [0, 4, 0], sizes = [8, 8, 128], strides = [1, 1, 1]} : vector<8x16x128xf32> to vector<8x8x128xf32>
    %13 = tpu.concatenate %8, %9, %10, %11, %12 in 2 : vector<8x8x128xf32>, vector<8x8x128xf32>, vector<8x8x128xf32>, vector<8x8x128xf32>, vector<8x8x128xf32> -> vector<8x8x640xf32>
    %14 = vector.shape_cast %13 : vector<8x8x640xf32> to vector<64x640xf32>
    %cst_4 = arith.constant 0.000000e+00 : f32
    %15 = vector.broadcast %cst_4 : f32 to vector<32x128xf32>
    %16 = vector.extract_strided_slice %14 {offsets = [0, 0], sizes = [32, 640], strides = [1, 1]} : vector<64x640xf32> to vector<32x640xf32>
    %c0_5 = arith.constant 0 : index
    %c0_6 = arith.constant 0 : index
    %c0_7 = arith.constant 0 : index
    %17 = vector.load %arg3[%c0_5, %c0_6, %c0_7] : memref<5x640x128xf32, #tpu.memory_space<vmem>>, vector<1x640x128xf32>
    %18 = vector.shape_cast %17 : vector<1x640x128xf32> to vector<640x128xf32>
    %cst_8 = arith.constant dense<0.000000e+00> : vector<32x128xf32>
    %19 = tpu.matmul %16, %18, %cst_8 {dimension_numbers = #tpu.dot_dimension_numbers<[1], [0], [0], [1], [0, 0, 1, 1], [], []>} : vector<32x640xf32>, vector<640x128xf32>, vector<32x128xf32> -> vector<32x128xf32>
    %20 = arith.addf %15, %19 : vector<32x128xf32>
    %21 = vector.extract_strided_slice %14 {offsets = [8, 0], sizes = [32, 640], strides = [1, 1]} : vector<64x640xf32> to vector<32x640xf32>
    %c1 = arith.constant 1 : index
    %c0_9 = arith.constant 0 : index
    %c0_10 = arith.constant 0 : index
    %22 = vector.load %arg3[%c1, %c0_9, %c0_10] : memref<5x640x128xf32, #tpu.memory_space<vmem>>, vector<1x640x128xf32>
    %23 = vector.shape_cast %22 : vector<1x640x128xf32> to vector<640x128xf32>
    %cst_11 = arith.constant dense<0.000000e+00> : vector<32x128xf32>
    %24 = tpu.matmul %21, %23, %cst_11 {dimension_numbers = #tpu.dot_dimension_numbers<[1], [0], [0], [1], [0, 0, 1, 1], [], []>} : vector<32x640xf32>, vector<640x128xf32>, vector<32x128xf32> -> vector<32x128xf32>
    %25 = arith.addf %20, %24 : vector<32x128xf32>
    %26 = vector.extract_strided_slice %14 {offsets = [16, 0], sizes = [32, 640], strides = [1, 1]} : vector<64x640xf32> to vector<32x640xf32>
    %c2 = arith.constant 2 : index
    %c0_12 = arith.constant 0 : index
    %c0_13 = arith.constant 0 : index
    %27 = vector.load %arg3[%c2, %c0_12, %c0_13] : memref<5x640x128xf32, #tpu.memory_space<vmem>>, vector<1x640x128xf32>
    %28 = vector.shape_cast %27 : vector<1x640x128xf32> to vector<640x128xf32>
    %cst_14 = arith.constant dense<0.000000e+00> : vector<32x128xf32>
    %29 = tpu.matmul %26, %28, %cst_14 {dimension_numbers = #tpu.dot_dimension_numbers<[1], [0], [0], [1], [0, 0, 1, 1], [], []>} : vector<32x640xf32>, vector<640x128xf32>, vector<32x128xf32> -> vector<32x128xf32>
    %30 = arith.addf %25, %29 : vector<32x128xf32>
    %31 = vector.extract_strided_slice %14 {offsets = [24, 0], sizes = [32, 640], strides = [1, 1]} : vector<64x640xf32> to vector<32x640xf32>
    %c3 = arith.constant 3 : index
    %c0_15 = arith.constant 0 : index
    %c0_16 = arith.constant 0 : index
    %32 = vector.load %arg3[%c3, %c0_15, %c0_16] : memref<5x640x128xf32, #tpu.memory_space<vmem>>, vector<1x640x128xf32>
    %33 = vector.shape_cast %32 : vector<1x640x128xf32> to vector<640x128xf32>
    %cst_17 = arith.constant dense<0.000000e+00> : vector<32x128xf32>
    %34 = tpu.matmul %31, %33, %cst_17 {dimension_numbers = #tpu.dot_dimension_numbers<[1], [0], [0], [1], [0, 0, 1, 1], [], []>} : vector<32x640xf32>, vector<640x128xf32>, vector<32x128xf32> -> vector<32x128xf32>
    %35 = arith.addf %30, %34 : vector<32x128xf32>
    %36 = vector.extract_strided_slice %14 {offsets = [32, 0], sizes = [32, 640], strides = [1, 1]} : vector<64x640xf32> to vector<32x640xf32>
    %c4 = arith.constant 4 : index
    %c0_18 = arith.constant 0 : index
    %c0_19 = arith.constant 0 : index
    %37 = vector.load %arg3[%c4, %c0_18, %c0_19] : memref<5x640x128xf32, #tpu.memory_space<vmem>>, vector<1x640x128xf32>
    %38 = vector.shape_cast %37 : vector<1x640x128xf32> to vector<640x128xf32>
    %cst_20 = arith.constant dense<0.000000e+00> : vector<32x128xf32>
    %39 = tpu.matmul %36, %38, %cst_20 {dimension_numbers = #tpu.dot_dimension_numbers<[1], [0], [0], [1], [0, 0, 1, 1], [], []>} : vector<32x640xf32>, vector<640x128xf32>, vector<32x128xf32> -> vector<32x128xf32>
    %40 = arith.addf %35, %39 : vector<32x128xf32>
    %c0_21 = arith.constant 0 : index
    %c0_22 = arith.constant 0 : index
    %41 = vector.load %arg4[%c0_21, %c0_22] : memref<1x128xf32, #tpu.memory_space<vmem>>, vector<1x128xf32>
    %42 = vector.broadcast %41 : vector<1x128xf32> to vector<32x128xf32>
    %43 = arith.addf %40, %42 : vector<32x128xf32>
    %c0_23 = arith.constant 0 : index
    %c0_24 = arith.constant 0 : index
    %44 = memref.load %arg5[%c0_23, %c0_24] : memref<1x1xf32, #tpu.memory_space<smem>>
    %cst_25 = arith.constant 0.000000e+00 : f32
    %45 = vector.broadcast %cst_25 : f32 to vector<32x128xf32>
    %46 = arith.cmpf ogt, %43, %45 : vector<32x128xf32>
    %47 = vector.broadcast %44 : f32 to vector<32x128xf32>
    %48 = arith.mulf %47, %43 : vector<32x128xf32>
    %49 = arith.select %46, %43, %48 : vector<32x128xi1>, vector<32x128xf32>
    %50 = vector.shape_cast %49 : vector<32x128xf32> to vector<4x8x128xf32>
    %c0_26 = arith.constant 0 : index
    %c0_27 = arith.constant 0 : index
    %c0_28 = arith.constant 0 : index
    %51 = vector.load %arg6[%c0_26, %c0_27, %c0_28] : memref<4x16x128xf32, #tpu.memory_space<vmem>>, vector<4x16x128xf32>
    %52 = vector.extract_strided_slice %51 {offsets = [0, 2, 0], sizes = [4, 8, 128], strides = [1, 1, 1]} : vector<4x16x128xf32> to vector<4x8x128xf32>
    %53 = arith.addf %50, %52 : vector<4x8x128xf32>
    %c0_29 = arith.constant 0 : index
    %c2_30 = arith.constant 2 : index
    %c0_31 = arith.constant 0 : index
    %54 = vector.load %arg7[%c0_29, %c2_30, %c0_31] : memref<4x16x128xf32, #tpu.memory_space<vmem>>, vector<4x8x128xf32>
    tpu.vector_store %arg7[%c0_29, %c2_30, %c0_31], %53 {strides = array<i32>} : memref<4x16x128xf32, #tpu.memory_space<vmem>>, vector<4x8x128xf32>,
    %cst_32 = arith.constant 0.000000e+00 : f32
    %55 = vector.broadcast %cst_32 : f32 to vector<4x2x128xf32>
    %c0_33 = arith.constant 0 : index
    %c0_34 = arith.constant 0 : index
    %c0_35 = arith.constant 0 : index
    %56 = vector.load %arg7[%c0_33, %c0_34, %c0_35] : memref<4x16x128xf32, #tpu.memory_space<vmem>>, vector<4x2x128xf32>
    tpu.vector_store %arg7[%c0_33, %c0_34, %c0_35], %55 {strides = array<i32>} : memref<4x16x128xf32, #tpu.memory_space<vmem>>, vector<4x2x128xf32>,
    %cst_36 = arith.constant 0.000000e+00 : f32
    %57 = vector.broadcast %cst_36 : f32 to vector<4x6x128xf32>
    %c0_37 = arith.constant 0 : index
    %c10 = arith.constant 10 : index
    %c0_38 = arith.constant 0 : index
    %58 = vector.load %arg7[%c0_37, %c10, %c0_38] : memref<4x16x128xf32, #tpu.memory_space<vmem>>, vector<4x6x128xf32>
    tpu.vector_store %arg7[%c0_37, %c10, %c0_38], %57 {strides = array<i32>} : memref<4x16x128xf32, #tpu.memory_space<vmem>>, vector<4x6x128xf32>,
    return
  }
  func.func @transform_1(%arg0: i32, %arg1: i32) -> (i32, i32, i32) {
    %c0_i32 = arith.constant 0 : i32
    %c0_i32_0 = arith.constant 0 : i32
    %c0_i32_1 = arith.constant 0 : i32
    %c0_i32_2 = arith.constant 0 : i32
    return %c0_i32, %c0_i32_0, %c0_i32_1 : i32, i32, i32
  }
  func.func @transform_2(%arg0: i32, %arg1: i32) -> (i32, i32) {
    %c0_i32 = arith.constant 0 : i32
    %c0_i32_0 = arith.constant 0 : i32
    %c0_i32_1 = arith.constant 0 : i32
    return %c0_i32, %c0_i32_0 : i32, i32
  }
  func.func @transform_3(%arg0: i32, %arg1: i32) -> (i32, i32) {
    %c0_i32 = arith.constant 0 : i32
    %c0_i32_0 = arith.constant 0 : i32
    %c0_i32_1 = arith.constant 0 : i32
    return %c0_i32, %c0_i32_0 : i32, i32
  }
  func.func @transform_4(%arg0: i32, %arg1: i32) -> (i32, i32, i32) {
    %c2_i32 = arith.constant 2 : i32
    %0 = arith.muli %arg0, %c2_i32 : i32
    %1 = arith.addi %0, %arg1 : i32
    %c0_i32 = arith.constant 0 : i32
    %c0_i32_0 = arith.constant 0 : i32
    %c0_i32_1 = arith.constant 0 : i32
    return %1, %c0_i32, %c0_i32_0 : i32, i32, i32
  }
  func.func @transform_5(%arg0: i32, %arg1: i32) -> (i32, i32, i32) {
    %c2_i32 = arith.constant 2 : i32
    %0 = arith.muli %arg0, %c2_i32 : i32
    %1 = arith.addi %0, %arg1 : i32
    %c0_i32 = arith.constant 0 : i32
    %c0_i32_0 = arith.constant 0 : i32
    %c0_i32_1 = arith.constant 0 : i32
    return %1, %c0_i32, %c0_i32_0 : i32, i32, i32
  }
}

</mosaic_0001>

<bundles_post_ra>
// kernel: down_forward.3
= control target key start
LH: loop header
LB: loop body
LE: loop exit
PB: predicated region body
PF: predicated region fallthrough
CT: control target
= control target key end

     0   :  { %s741_s17 = smov 0   ;;  %s827_s0 = inlined_call_operand.vmem [shape: f32[16,2,8,8], index: 0, kind: input, shape index: {}]   ;;  %s828_s1 = inlined_call_operand.vmem [shape: f32[2,8,128], index: 1, kind: input, shape index: {}]   ;;  %s829_s2 = inlined_call_operand.vmem [shape: f32[1,128], index: 2, kind: input, shape index: {}]   ;;  %s830_s3 = inlined_call_operand.<no memory space> [shape: f32[1,1], index: 3, kind: input, shape index: {}]   ;;  %s831_s4 = inlined_call_operand.vmem [shape: f32[16,16,128], index: 4, kind: output, shape index: {}]  }
   0x1   :  { %9 = sst [smem:[#allocation2]] %s830_s3 }
   0x2 LB: > { %s608_s18 = sadd.s32 4294967295, %s710_s17   ;;  %p612_p0 = scmp.ge.s32.totalorder %s710_s17, 1  ;;  %s710_s17 = sphi %s741_s17, %s15_s17  }
   0x3   : > { %p165_p1 = scmp.lt.s32.totalorder %s710_s17, 3 }
   0x5   : > { %p166_p2 = pnand %p612_p0, %p165_p1 }
   0x6   : > { %v619_v0 = vld [vmem:[%s828_s1 + $0x8] sm:$0xff] (!%p166_p2)  ;;  %v223_v1 = vld [vmem:[%s828_s1] sm:$0xff] (!%p166_p2)  ;;  %s613_s22 = sshll.u32 (!%p166_p2), %s608_s18, 3  ;;  %vm226_vm0 = vcmask (!%p166_p2), 64512   ;;  %v712_v3 = vmov (!%p166_p2), 0.0   ;;  %s500_s30 = sld [smem:[#allocation2]] (!%p166_p2) }
   0x7   : > { %169 = sbr.rel (%p166_p2) target bundleno = 252 (0xfc), region = 36  ;;  %659 = vmatprep.subr.mxu1 (!%p166_p2), %v619_v0  ;;  %673 = vmatprep.subr.mxu0 (!%p166_p2), %v223_v1  ;;  %p194_p3 = scmp.lt.s32.totalorder (!%p166_p2), %s613_s22, 15  ;;  %v636_v21 = vld [vmem:[%s829_s2] ss:$0 sm:$0xff] (!%p166_p2) }
   0x8   : > { %660 = vmatpush3.msra.mxu1 (!%p166_p2), %v619_v0  ;;  %674 = vmatpush3.msra.mxu0 (!%p166_p2), %v223_v1 }
   0xc   : > { %v509_v25 = vstv (!%p166_p2), %s500_s30 }
   0xe   : > { %s833_s22 = smov (!%p194_p3, %s613_s22), 15 }
   0xf   : > { %s639_s23 = sshll.u32 %s833_s22, 4 }
  0x10   : > { %s758_s26 = scalar_lea.vmem %s827_s0, %s639_s23  ;;  %s763_s29 = scalar_lea.vmem %s831_s4, %s639_s23 }
  0x11   : > { %v208_v2 = vld [vmem:[%s758_s26 + $0x8] sm:$0xff]  ;;  %534 = vst [vmem:[%s763_s29] sm:$0x3] %v712_v3  ;;  %535 = vst [vmem:[%s763_s29 + $0x10] sm:$0x3] %v712_v3  ;;  %v207_v4 = vld [vmem:[%s758_s26] sm:$0xff] }
  0x12   : > { %536 = vst [vmem:[%s763_s29 + $0x20] sm:$0x3] %v712_v3  ;;  %537 = vst [vmem:[%s763_s29 + $0x30] sm:$0x3] %v712_v3  ;;  %v210_v5 = vld [vmem:[%s758_s26 + $0x18] sm:$0xff]  ;;  %661 = vmatprep.mubr.msk.f32.mxu1 %vm226_vm0, %v208_v2  ;;  %675 = vmatprep.mubr.msk.f32.mxu0 %vm226_vm0, %v207_v4  ;;  %v209_v6 = vld [vmem:[%s758_s26 + $0x10] sm:$0xff] }
  0x13   : > { %538 = vst [vmem:[%s763_s29 + $0x40] sm:$0x3] %v712_v3  ;;  %539 = vst [vmem:[%s763_s29 + $0x50] sm:$0x3] %v712_v3  ;;  %v212_v7 = vld [vmem:[%s758_s26 + $0x28] sm:$0xff]  ;;  %v211_v8 = vld [vmem:[%s758_s26 + $0x20] sm:$0xff]  ;;  %662 = vmatmul.mubr.msk.f32.vlgmr.msra.gmra.mrb[0].mxu1 %vm226_vm0, %v210_v5  ;;  %676 = vmatmul.mubr.msk.f32.vlgmr.msra.gmra.mrb[0].mxu0 %vm226_vm0, %v209_v6 }
  0x14   : > { %540 = vst [vmem:[%s763_s29 + $0x60] sm:$0x3] %v712_v3  ;;  %541 = vst [vmem:[%s763_s29 + $0x70] sm:$0x3] %v712_v3  ;;  %664 = vmatprep.mubr.msk.f32.mxu1 %vm226_vm0, %v212_v7  ;;  %678 = vmatprep.mubr.msk.f32.mxu0 %vm226_vm0, %v211_v8  ;;  %v214_v9 = vld [vmem:[%s758_s26 + $0x38] sm:$0xff]  ;;  %v213_v10 = vld [vmem:[%s758_s26 + $0x30] sm:$0xff] }
  0x15   : > { %542 = vst [vmem:[%s763_s29 + $0xa] sm:$0x3f] %v712_v3  ;;  %543 = vst [vmem:[%s763_s29 + $0x1a] sm:$0x3f] %v712_v3  ;;  %v216_v11 = vld [vmem:[%s758_s26 + $0x48] sm:$0xff]  ;;  %v215_v12 = vld [vmem:[%s758_s26 + $0x40] sm:$0xff] }
  0x16   : > { %544 = vst [vmem:[%s763_s29 + $0x2a] sm:$0x3f] %v712_v3  ;;  %545 = vst [vmem:[%s763_s29 + $0x3a] sm:$0x3f] %v712_v3  ;;  %v218_v13 = vld [vmem:[%s758_s26 + $0x58] sm:$0xff]  ;;  %v217_v14 = vld [vmem:[%s758_s26 + $0x50] sm:$0xff] }
  0x17   : > { %546 = vst [vmem:[%s763_s29 + $0x4a] sm:$0x3f] %v712_v3  ;;  %547 = vst [vmem:[%s763_s29 + $0x5a] sm:$0x3f] %v712_v3  ;;  %665 = vmatmul.mubr.msk.f32.gmra.mrb[2].mxu1 %vm226_vm0, %v214_v9  ;;  %679 = vmatmul.mubr.msk.f32.gmra.mrb[2].mxu0 %vm226_vm0, %v213_v10  ;;  %v220_v15 = vld [vmem:[%s758_s26 + $0x68] sm:$0xff]  ;;  %v219_v16 = vld [vmem:[%s758_s26 + $0x60] sm:$0xff] }
  0x18   : > { %548 = vst [vmem:[%s763_s29 + $0x6a] sm:$0x3f] %v712_v3  ;;  %549 = vst [vmem:[%s763_s29 + $0x7a] sm:$0x3f] %v712_v3  ;;  %667 = vmatprep.mubr.msk.f32.mxu1 %vm226_vm0, %v216_v11  ;;  %681 = vmatprep.mubr.msk.f32.mxu0 %vm226_vm0, %v215_v12  ;;  %v222_v17 = vld [vmem:[%s758_s26 + $0x78] sm:$0xff]  ;;  %v221_v18 = vld [vmem:[%s758_s26 + $0x70] sm:$0xff] }
  0x1b   : > { %668 = vmatmul.mubr.msk.f32.gmra.mrb[4].mxu1 %vm226_vm0, %v218_v13  ;;  %682 = vmatmul.mubr.msk.f32.gmra.mrb[4].mxu0 %vm226_vm0, %v217_v14 }
  0x1c   : > { %670 = vmatprep.mubr.msk.f32.mxu1 %vm226_vm0, %v220_v15  ;;  %684 = vmatprep.mubr.msk.f32.mxu0 %vm226_vm0, %v219_v16 }
  0x1f   : > { %671 = vmatmul.mubr.msk.f32.gmra.mrb[6].mxu1 %vm226_vm0, %v222_v17  ;;  %685 = vmatmul.mubr.msk.f32.gmra.mrb[6].mxu0 %vm226_vm0, %v221_v18 }
  0xe6   : > { %v663_v19 = vpop.f32.mrb[0].mxu1  ;;  %v677_v20 = vpop.f32.mrb[0].mxu0 }
  0xe7   : > { %v452_v22 = vadd.f32 %v677_v20, %v663_v19  ;;  %v317_v23 = vpop.f32.mrb[1].mxu1  ;;  %v446_v24 = vpop.f32.mrb[1].mxu0 }
  0xe8   : > { %v447_v26 = vadd.f32 %v446_v24, %v317_v23 }
  0xe9   : > { %v493_v27 = vadd.f32 %v636_v21, %v452_v22 }
  0xea   : > { %v492_v28 = vadd.f32 %v636_v21, %v447_v26  ;;  %v666_v29 = vpop.f32.mrb[2].mxu1  ;;  %v680_v30 = vpop.f32.mrb[2].mxu0 }
  0xeb   : > { %vm502_vm1 = vcmp.gt.f32.partialorder %v493_v27, 0.0  ;;  %v511_v31 = vmul.f32 %v509_v25, %v493_v27  ;;  %v462_v32 = vadd.f32 %v680_v30, %v666_v29  ;;  %v327_v33 = vpop.f32.mrb[3].mxu1  ;;  %v456_v34 = vpop.f32.mrb[3].mxu0 }
  0xec   : > { %vm501_vm2 = vcmp.gt.f32.partialorder %v492_v28, 0.0  ;;  %v510_v35 = vmul.f32 %v509_v25, %v492_v28  ;;  %v457_v36 = vadd.f32 %v456_v34, %v327_v33 }
  0xed   : > { %v519_v37 = vsel %vm502_vm1, %v493_v27, %v511_v31  ;;  %v495_v38 = vadd.f32 %v636_v21, %v462_v32 }
  0xee   : > { %527 = vst [vmem:[%s763_s29 + $0x12] sm:$0xff] %v519_v37  ;;  %v518_v39 = vsel %vm501_vm2, %v492_v28, %v510_v35  ;;  %v494_v40 = vadd.f32 %v636_v21, %v457_v36  ;;  %v669_v41 = vpop.f32.mrb[4].mxu1  ;;  %v683_v42 = vpop.f32.mrb[4].mxu0 }
  0xef   : > { %526 = vst [vmem:[%s763_s29 + $0x2] sm:$0xff] %v518_v39  ;;  %vm504_vm3 = vcmp.gt.f32.partialorder %v495_v38, 0.0  ;;  %v513_v43 = vmul.f32 %v509_v25, %v495_v38  ;;  %v472_v44 = vadd.f32 %v683_v42, %v669_v41  ;;  %v337_v45 = vpop.f32.mrb[5].mxu1  ;;  %v466_v46 = vpop.f32.mrb[5].mxu0 }
  0xf0   : > { %vm503_vm4 = vcmp.gt.f32.partialorder %v494_v40, 0.0  ;;  %v512_v47 = vmul.f32 %v509_v25, %v494_v40  ;;  %v467_v48 = vadd.f32 %v466_v46, %v337_v45 }
  0xf1   : > { %v521_v49 = vsel %vm504_vm3, %v495_v38, %v513_v43  ;;  %v497_v50 = vadd.f32 %v636_v21, %v472_v44 }
  0xf2   : > { %529 = vst [vmem:[%s763_s29 + $0x32] sm:$0xff] %v521_v49  ;;  %v520_v51 = vsel %vm503_vm4, %v494_v40, %v512_v47  ;;  %v496_v52 = vadd.f32 %v636_v21, %v467_v48  ;;  %v672_v53 = vpop.f32.mrb[6].mxu1  ;;  %v686_v54 = vpop.f32.mrb[6].mxu0 }
  0xf3   : > { %528 = vst [vmem:[%s763_s29 + $0x22] sm:$0xff] %v520_v51  ;;  %vm506_vm5 = vcmp.gt.f32.partialorder %v497_v50, 0.0  ;;  %v515_v55 = vmul.f32 %v509_v25, %v497_v50  ;;  %v482_v56 = vadd.f32 %v686_v54, %v672_v53  ;;  %v347_v57 = vpop.f32.mrb[7].mxu1  ;;  %v476_v58 = vpop.f32.mrb[7].mxu0 }
  0xf4   : > { %vm505_vm6 = vcmp.gt.f32.partialorder %v496_v52, 0.0  ;;  %v514_v59 = vmul.f32 %v509_v25, %v496_v52  ;;  %v477_v60 = vadd.f32 %v476_v58, %v347_v57 }
  0xf5   : > { %v523_v61 = vsel %vm506_vm5, %v497_v50, %v515_v55  ;;  %v499_v62 = vadd.f32 %v636_v21, %v482_v56 }
  0xf6   : > { %531 = vst [vmem:[%s763_s29 + $0x52] sm:$0xff] %v523_v61  ;;  %v522_v63 = vsel %vm505_vm6, %v496_v52, %v514_v59  ;;  %v498_v0 = vadd.f32 %v636_v21, %v477_v60 }
  0xf7   : > { %530 = vst [vmem:[%s763_s29 + $0x42] sm:$0xff] %v522_v63  ;;  %vm508_vm7 = vcmp.gt.f32.partialorder %v499_v62, 0.0  ;;  %v517_v1 = vmul.f32 %v509_v25, %v499_v62 }
  0xf8   : > { %vm507_vm8 = vcmp.gt.f32.partialorder %v498_v0, 0.0  ;;  %v516_v2 = vmul.f32 %v509_v25, %v498_v0 }
  0xf9   : > { %v525_v3 = vsel %vm508_vm7, %v499_v62, %v517_v1 }
  0xfa   : > { %533 = vst [vmem:[%s763_s29 + $0x72] sm:$0xff] %v525_v3  ;;  %v524_v4 = vsel %vm507_vm8, %v498_v0, %v516_v2 }
  0xfb   : > { %532 = vst [vmem:[%s763_s29 + $0x62] sm:$0xff] %v524_v4 }
  0xfc PF: > { %s15_s17 = sadd.s32 1, %s710_s17  }
  0xfd   : > { %p12_p4 = scmp.ge.s32.totalorder %s15_s17, 4  }
  0xff   :  { %14 = sbr.rel (!%p12_p4) target bundleno = 2 (0x2), region = 67 }

// kernel: down_forward.4
= control target key start
LH: loop header
LB: loop body
LE: loop exit
PB: predicated region body
PF: predicated region fallthrough
CT: control target
= control target key end

     0   :  { %s4058_s17 = smov 0   ;;  %s4060_s18 = smov 0   ;;  %s5610_s0 = inlined_call_operand.vmem [shape: f32[2,8,16,128], index: 0, kind: input, shape index: {}]   ;;  %s5611_s1 = inlined_call_operand.vmem [shape: f32[5,640,128], index: 1, kind: input, shape index: {}]   ;;  %s5612_s2 = inlined_call_operand.vmem [shape: f32[1,128], index: 2, kind: input, shape index: {}]   ;;  %s5613_s3 = inlined_call_operand.<no memory space> [shape: f32[1,1], index: 3, kind: input, shape index: {}]   ;;  %s5614_s4 = inlined_call_operand.vmem [shape: f32[16,16,128], index: 4, kind: output, shape index: {}]  }
   0x1   :  { %9 = sst [smem:[#allocation4]] %s5613_s3  ;;  %s4062_s19 = smov 0  }
   0x2   :  { %s4064_s20 = smov 0   ;;  %s4066_s21 = smov 0  }
   0x3 LB: > { %s24_s3 = sadd.s32 1, %s4017_s19  ;;  %s27_s22 = sadd.s32 1, %s4021_s20  ;;  %s4025_s21 = sphi %s4066_s21, %s15_s21   ;;  %s4021_s20 = sphi %s4064_s20, %s5618_s20   ;;  %s4017_s19 = sphi %s4062_s19, %s5617_s19   ;;  %s4013_s18 = sphi %s4060_s18, %s5616_s18   ;;  %s4009_s17 = sphi %s4058_s17, %s5615_s17  }
   0x4   : > { %p25_p0 = scmp.ge.s32.totalorder %s24_s3, 2  ;;  %p2325_p1 = scmp.ge.s32.totalorder %s4025_s21, 1 }
   0x5   : > { %p145_p2 = scmp.lt.s32.totalorder %s4025_s21, 5 }
   0x6   : > { %s5620_s3 = smov (%p25_p0, %s24_s3), 0  ;;  %s5622_s22 = smov (!%p25_p0, %s27_s22), %s4021_s20 }
   0x7   : > { %p146_p3 = pnand %p2325_p1, %p145_p2  ;;  %p29_p4 = scmp.ge.s32.totalorder %s5622_s22, 2 }
   0x8   : > { %s2326_s23 = sshll.u32 (!%p146_p3), %s4013_s18, 1  ;;  %p2330_p6 = scmp.ne.s32.totalorder (!%p146_p3), %s4009_s17, 0 }
   0x9   : > { %s5624_s22 = smov (%p29_p4, %s5622_s22), 0  ;;  %149 = sbr.rel (%p146_p3) target bundleno = 524 (0x20c), region = 32 }
   0xa   : > { %s168_s24 = sadd.s32 (!%p146_p3), %s4009_s17, %s2326_s23 }
   0xb   : > { %s2327_s25 = sshll.u32 (!%p146_p3), %s168_s24, 2 }
   0xc   : > { %p170_p5 = scmp.lt.s32.totalorder (!%p146_p3), %s2327_s25, 15 }
  0x10   : > { %s5626_s25 = smov (!%p170_p5, %s2327_s25), 15  ;;  %181 = sbr.rel (%p2330_p6) target bundleno = 29 (0x1d), region = 36 }
  0x11   : > { %s2671_s26 = sshll.u32 %s5626_s25, 4  ;;  %s2331_s30 = sshll.u32 (!%p2330_p6), %s4013_s18, 7  ;;  %v4027_v0 = vmov (!%p2330_p6), 0.0  }
  0x12   : > { %s4097_s29 = scalar_lea.vmem %s5614_s4, %s2671_s26  ;;  %182 = vst [vmem:[#allocation2] sm:$0xff] (!%p2330_p6), %v4027_v0  ;;  %183 = vst [vmem:[#allocation2 + $0x8] sm:$0xff] (!%p2330_p6), %v4027_v0  ;;  %s187_s7 = scalar_lea.vmem (!%p2330_p6), %s5610_s0, %s2331_s30 }
  0x13   : > { %184 = vst [vmem:[#allocation2 + $0x10] sm:$0xff] (!%p2330_p6), %v4027_v0  ;;  %185 = vst [vmem:[#allocation2 + $0x18] sm:$0xff] (!%p2330_p6), %v4027_v0  ;;  %v221_v1 = vld [vmem:[%s187_s7] sm:$0xff] (!%p2330_p6)  ;;  %v223_v2 = vld [vmem:[%s187_s7 + $0x8] sm:$0xff] (!%p2330_p6) }
  0x14   : > { %v225_v3 = vld [vmem:[%s187_s7 + $0x10] sm:$0xff] (!%p2330_p6)  ;;  %222 = vst [vmem:[#allocation2 + $0x20] sm:$0xff] (!%p2330_p6), %v221_v1  ;;  %224 = vst [vmem:[#allocation2 + $0x28] sm:$0xff] (!%p2330_p6), %v223_v2  ;;  %v227_v4 = vld [vmem:[%s187_s7 + $0x18] sm:$0xff] (!%p2330_p6) }
  0x15   : > { %226 = vst [vmem:[#allocation2 + $0x30] sm:$0xff] (!%p2330_p6), %v225_v3  ;;  %v229_v5 = vld [vmem:[%s187_s7 + $0x20] sm:$0xff] (!%p2330_p6)  ;;  %v231_v6 = vld [vmem:[%s187_s7 + $0x28] sm:$0xff] (!%p2330_p6)  ;;  %228 = vst [vmem:[#allocation2 + $0x38] sm:$0xff] (!%p2330_p6), %v227_v4 }
  0x16   : > { %230 = vst [vmem:[#allocation2 + $0x40] sm:$0xff] (!%p2330_p6), %v229_v5  ;;  %232 = vst [vmem:[#allocation2 + $0x48] sm:$0xff] (!%p2330_p6), %v231_v6  ;;  %v233_v7 = vld [vmem:[%s187_s7 + $0x30] sm:$0xff] (!%p2330_p6)  ;;  %v235_v8 = vld [vmem:[%s187_s7 + $0x38] sm:$0xff] (!%p2330_p6) }
  0x17   : > { %v237_v9 = vld [vmem:[%s187_s7 + $0x40] sm:$0xff]  ;;  %234 = vst [vmem:[#allocation2 + $0x50] sm:$0xff] %v233_v7  ;;  %236 = vst [vmem:[#allocation2 + $0x58] sm:$0xff] %v235_v8  ;;  %v239_v10 = vld [vmem:[%s187_s7 + $0x48] sm:$0xff] }
  0x18   : > { %238 = vst [vmem:[#allocation2 + $0x60] sm:$0xff] %v237_v9  ;;  %v241_v11 = vld [vmem:[%s187_s7 + $0x50] sm:$0xff]  ;;  %v243_v12 = vld [vmem:[%s187_s7 + $0x58] sm:$0xff]  ;;  %240 = vst [vmem:[#allocation2 + $0x68] sm:$0xff] %v239_v10 }
  0x19   : > { %242 = vst [vmem:[#allocation2 + $0x70] sm:$0xff] %v241_v11  ;;  %244 = vst [vmem:[#allocation2 + $0x78] sm:$0xff] %v243_v12 }
  0x1a   : > { %252 = vsyncadd [#allocation3], 1536 }
  0x1b   : > { %4003 = dma.done.wait [#allocation3], 1536 }
  0x1c   : > { %4004 = vsyncadd [#allocation3], 4294965760 }
  0x1d PF: > { %p2332_p7 = scmp.ne.s32.totalorder %s4009_s17, 1 }
  0x1e   : > { %s2333_s8 = sshll.u32 (!%p2332_p7), %s4013_s18, 7  ;;  %v4028_v13 = vmov (!%p2332_p7), 0.0  }
  0x1f   : > { %260 = sbr.rel (%p2332_p7) target bundleno = 42 (0x2a), region = 74  ;;  %262 = vst [vmem:[#allocation2 + $0x60] sm:$0xff] (!%p2332_p7), %v4028_v13  ;;  %263 = vst [vmem:[#allocation2 + $0x68] sm:$0xff] (!%p2332_p7), %v4028_v13  ;;  %s2272_s11 = scalar_lea.vmem (!%p2332_p7), %s5610_s0, %s2333_s8 }
  0x20   : > { %264 = vst [vmem:[#allocation2 + $0x70] sm:$0xff] (!%p2332_p7), %v4028_v13  ;;  %265 = vst [vmem:[#allocation2 + $0x78] sm:$0xff] (!%p2332_p7), %v4028_v13  ;;  %v2334_v14 = vld [vmem:[%s2272_s11 + $0x20] sm:$0xff] (!%p2332_p7)  ;;  %v2335_v15 = vld [vmem:[%s2272_s11 + $0x28] sm:$0xff] (!%p2332_p7) }
  0x21   : > { %v2336_v16 = vld [vmem:[%s2272_s11 + $0x30] sm:$0xff] (!%p2332_p7)  ;;  %302 = vst [vmem:[#allocation2] sm:$0xff] (!%p2332_p7), %v2334_v14  ;;  %304 = vst [vmem:[#allocation2 + $0x8] sm:$0xff] (!%p2332_p7), %v2335_v15  ;;  %v2337_v17 = vld [vmem:[%s2272_s11 + $0x38] sm:$0xff] (!%p2332_p7) }
  0x22   : > { %306 = vst [vmem:[#allocation2 + $0x10] sm:$0xff] (!%p2332_p7), %v2336_v16  ;;  %v2338_v18 = vld [vmem:[%s2272_s11 + $0x40] sm:$0xff] (!%p2332_p7)  ;;  %v2339_v19 = vld [vmem:[%s2272_s11 + $0x48] sm:$0xff] (!%p2332_p7)  ;;  %308 = vst [vmem:[#allocation2 + $0x18] sm:$0xff] (!%p2332_p7), %v2337_v17 }
  0x23   : > { %310 = vst [vmem:[#allocation2 + $0x20] sm:$0xff] (!%p2332_p7), %v2338_v18  ;;  %312 = vst [vmem:[#allocation2 + $0x28] sm:$0xff] (!%p2332_p7), %v2339_v19  ;;  %v2340_v20 = vld [vmem:[%s2272_s11 + $0x50] sm:$0xff] (!%p2332_p7)  ;;  %v2341_v21 = vld [vmem:[%s2272_s11 + $0x58] sm:$0xff] (!%p2332_p7) }
  0x24   : > { %v2342_v22 = vld [vmem:[%s2272_s11 + $0x60] sm:$0xff] (!%p2332_p7)  ;;  %314 = vst [vmem:[#allocation2 + $0x30] sm:$0xff] (!%p2332_p7), %v2340_v20  ;;  %316 = vst [vmem:[#allocation2 + $0x38] sm:$0xff] (!%p2332_p7), %v2341_v21  ;;  %v2343_v23 = vld [vmem:[%s2272_s11 + $0x68] sm:$0xff] (!%p2332_p7) }
  0x25   : > { %318 = vst [vmem:[#allocation2 + $0x40] sm:$0xff] (!%p2332_p7), %v2342_v22  ;;  %v2344_v24 = vld [vmem:[%s2272_s11 + $0x70] sm:$0xff] (!%p2332_p7)  ;;  %v2345_v25 = vld [vmem:[%s2272_s11 + $0x78] sm:$0xff] (!%p2332_p7)  ;;  %320 = vst [vmem:[#allocation2 + $0x48] sm:$0xff] (!%p2332_p7), %v2343_v23 }
  0x26   : > { %322 = vst [vmem:[#allocation2 + $0x50] sm:$0xff] %v2344_v24  ;;  %324 = vst [vmem:[#allocation2 + $0x58] sm:$0xff] %v2345_v25 }
  0x27   : > { %332 = vsyncadd [#allocation3], 1536 }
  0x28   : > { %4005 = dma.done.wait [#allocation3], 1536 }
  0x29   : > { %4006 = vsyncadd [#allocation3], 4294965760 }
  0x2a PF: > { %v2363_v26 = vld [vmem:[%s5611_s1 + $0x300] sm:$0xff]  ;;  %v2364_v27 = vld [vmem:[%s5611_s1 + $0x308] sm:$0xff]  ;;  %v2365_v37 = vld [vmem:[%s5611_s1 + $0x310] sm:$0xff]  ;;  %vm369_vm0 = vcmask 1046528   ;;  %vm435_vm1 = vcmask 1044480   ;;  %vm402_vm2 = vcmask 1045504  }
  0x2b   : > { %v2395_v28 = vld [vmem:[%s5611_s1 + $0x400] sm:$0xff]  ;;  %v3402_v29 = vpack.c.bf16 %v2364_v27, %v2363_v26  ;;  %v2396_v30 = vld [vmem:[%s5611_s1 + $0x408] sm:$0xff]  ;;  %v2366_v39 = vld [vmem:[%s5611_s1 + $0x318] sm:$0xff]  ;;  %vm468_vm3 = vcmask 1043456   ;;  %s2203_s14 = sld [smem:[#allocation4]] }
  0x2c   : > { %v2347_v31 = vld [vmem:[%s5611_s1 + $0x280] sm:$0xff]  ;;  %v2348_v32 = vld [vmem:[%s5611_s1 + $0x288] sm:$0xff]  ;;  %v3434_v33 = vpack.c.bf16 %v2396_v30, %v2395_v28  ;;  %v2397_v40 = vld [vmem:[%s5611_s1 + $0x410] sm:$0xff]  ;;  %v3406_v42 = vpack.c.bf16 %v2366_v39, %v2365_v37 }
  0x2d   : > { %v3404_v34 = vpack.c.bf16 %v2348_v32, %v2347_v31  ;;  %v2379_v35 = vld [vmem:[%s5611_s1 + $0x380] sm:$0xff]  ;;  %v2380_v36 = vld [vmem:[%s5611_s1 + $0x388] sm:$0xff]  ;;  %3403 = vmatprep.subr.bf16.mxu0 %v3402_v29  ;;  %v2398_v41 = vld [vmem:[%s5611_s1 + $0x418] sm:$0xff] }
  0x2e   : > { %v3436_v38 = vpack.c.bf16 %v2380_v36, %v2379_v35  ;;  %3435 = vmatprep.subr.bf16.mxu1 %v3434_v33  ;;  %v3438_v43 = vpack.c.bf16 %v2398_v41, %v2397_v40  ;;  %v2349_v44 = vld [vmem:[%s5611_s1 + $0x290] sm:$0xff]  ;;  %v2350_v45 = vld [vmem:[%s5611_s1 + $0x298] sm:$0xff]  ;;  %v2367_v49 = vld [vmem:[%s5611_s1 + $0x320] sm:$0xff] }
  0x2f   : > { %3405 = vmatpush3.bf16.msra.mxu0 %v3404_v34  ;;  %v2381_v46 = vld [vmem:[%s5611_s1 + $0x390] sm:$0xff]  ;;  %v3408_v47 = vpack.c.bf16 %v2350_v45, %v2349_v44  ;;  %v2382_v48 = vld [vmem:[%s5611_s1 + $0x398] sm:$0xff]  ;;  %v2368_v50 = vld [vmem:[%s5611_s1 + $0x328] sm:$0xff] }
  0x30   : > { %3437 = vmatpush3.bf16.msra.mxu1 %v3436_v38  ;;  %3407 = vmatprep.subr.bf16.mxu0 %v3406_v42  ;;  %v3440_v51 = vpack.c.bf16 %v2382_v48, %v2381_v46  ;;  %v3410_v52 = vpack.c.bf16 %v2368_v50, %v2367_v49  ;;  %v2399_v53 = vld [vmem:[%s5611_s1 + $0x420] sm:$0xff]  ;;  %v2400_v54 = vld [vmem:[%s5611_s1 + $0x428] sm:$0xff]  ;;  %v2369_v61 = vld [vmem:[%s5611_s1 + $0x330] sm:$0xff] }
  0x31   : > { %3439 = vmatprep.subr.bf16.mxu1 %v3438_v43  ;;  %v2351_v55 = vld [vmem:[%s5611_s1 + $0x2a0] sm:$0xff]  ;;  %v3442_v56 = vpack.c.bf16 %v2400_v54, %v2399_v53  ;;  %v2352_v57 = vld [vmem:[%s5611_s1 + $0x2a8] sm:$0xff]  ;;  %v2370_v62 = vld [vmem:[%s5611_s1 + $0x338] sm:$0xff] }
  0x32   : > { %v2383_v58 = vld [vmem:[%s5611_s1 + $0x3a0] sm:$0xff]  ;;  %v2384_v59 = vld [vmem:[%s5611_s1 + $0x3a8] sm:$0xff]  ;;  %v3412_v60 = vpack.c.bf16 %v2352_v57, %v2351_v55  ;;  %v2401_v63 = vld [vmem:[%s5611_s1 + $0x430] sm:$0xff]  ;;  %v3414_v1 = vpack.c.bf16 %v2370_v62, %v2369_v61 }
  0x33   : > { %3409 = vmatpush3.bf16.msra.mxu0 %v3408_v47  ;;  %v3444_v0 = vpack.c.bf16 %v2384_v59, %v2383_v58  ;;  %v2402_v2 = vld [vmem:[%s5611_s1 + $0x438] sm:$0xff]  ;;  %v2353_v3 = vld [vmem:[%s5611_s1 + $0x2b0] sm:$0xff]  ;;  %v2371_v8 = vld [vmem:[%s5611_s1 + $0x340] sm:$0xff] }
  0x34   : > { %3441 = vmatpush3.bf16.msra.mxu1 %v3440_v51  ;;  %3411 = vmatprep.subr.bf16.mxu0 %v3410_v52  ;;  %v2354_v4 = vld [vmem:[%s5611_s1 + $0x2b8] sm:$0xff]  ;;  %v3446_v5 = vpack.c.bf16 %v2402_v2, %v2401_v63  ;;  %v2385_v6 = vld [vmem:[%s5611_s1 + $0x3b0] sm:$0xff]  ;;  %v2372_v9 = vld [vmem:[%s5611_s1 + $0x348] sm:$0xff] }
  0x35   : > { %3443 = vmatprep.subr.bf16.mxu1 %v3442_v56  ;;  %v2386_v7 = vld [vmem:[%s5611_s1 + $0x3b8] sm:$0xff]  ;;  %v2403_v10 = vld [vmem:[%s5611_s1 + $0x440] sm:$0xff]  ;;  %v2404_v11 = vld [vmem:[%s5611_s1 + $0x448] sm:$0xff]  ;;  %v3416_v12 = vpack.c.bf16 %v2354_v4, %v2353_v3  ;;  %v3418_v14 = vpack.c.bf16 %v2372_v9, %v2371_v8 }
  0x36   : > { %v3448_v13 = vpack.c.bf16 %v2386_v7, %v2385_v6  ;;  %v2355_v15 = vld [vmem:[%s5611_s1 + $0x2c0] sm:$0xff]  ;;  %v2356_v16 = vld [vmem:[%s5611_s1 + $0x2c8] sm:$0xff]  ;;  %v3450_v18 = vpack.c.bf16 %v2404_v11, %v2403_v10  ;;  %v2373_v20 = vld [vmem:[%s5611_s1 + $0x350] sm:$0xff] }
  0x37   : > { %3413 = vmatpush3.bf16.msra.mxu0 %v3412_v60  ;;  %v2387_v17 = vld [vmem:[%s5611_s1 + $0x3c0] sm:$0xff]  ;;  %v2388_v19 = vld [vmem:[%s5611_s1 + $0x3c8] sm:$0xff]  ;;  %v2374_v21 = vld [vmem:[%s5611_s1 + $0x358] sm:$0xff]  ;;  %v3420_v24 = vpack.c.bf16 %v2356_v16, %v2355_v15 }
  0x38   : > { %3445 = vmatpush3.bf16.msra.mxu1 %v3444_v0  ;;  %3415 = vmatprep.subr.bf16.mxu0 %v3414_v1  ;;  %v2405_v22 = vld [vmem:[%s5611_s1 + $0x450] sm:$0xff]  ;;  %v2406_v23 = vld [vmem:[%s5611_s1 + $0x458] sm:$0xff]  ;;  %v3452_v25 = vpack.c.bf16 %v2388_v19, %v2387_v17  ;;  %v3422_v26 = vpack.c.bf16 %v2374_v21, %v2373_v20  ;;  %v2375_v32 = vld [vmem:[%s5611_s1 + $0x360] sm:$0xff] }
  0x39   : > { %3447 = vmatprep.subr.bf16.mxu1 %v3446_v5  ;;  %v2357_v27 = vld [vmem:[%s5611_s1 + $0x2d0] sm:$0xff]  ;;  %v2358_v28 = vld [vmem:[%s5611_s1 + $0x2d8] sm:$0xff]  ;;  %v3454_v30 = vpack.c.bf16 %v2406_v23, %v2405_v22  ;;  %v2376_v33 = vld [vmem:[%s5611_s1 + $0x368] sm:$0xff] }
  0x3a   : > { %v2389_v29 = vld [vmem:[%s5611_s1 + $0x3d0] sm:$0xff]  ;;  %v2390_v31 = vld [vmem:[%s5611_s1 + $0x3d8] sm:$0xff]  ;;  %v2407_v34 = vld [vmem:[%s5611_s1 + $0x460] sm:$0xff]  ;;  %v3424_v36 = vpack.c.bf16 %v2358_v28, %v2357_v27  ;;  %v3426_v40 = vpack.c.bf16 %v2376_v33, %v2375_v32 }
  0x3b   : > { %3417 = vmatpush3.bf16.msra.mxu0 %v3416_v12  ;;  %v2408_v35 = vld [vmem:[%s5611_s1 + $0x468] sm:$0xff]  ;;  %v2359_v37 = vld [vmem:[%s5611_s1 + $0x2e0] sm:$0xff]  ;;  %v3456_v39 = vpack.c.bf16 %v2390_v31, %v2389_v29  ;;  %v4274_v42 = vld [vmem:[#allocation2 + $0x10] sm:$0xff] }
  0x3c   : > { %3449 = vmatpush3.bf16.msra.mxu1 %v3448_v13  ;;  %3419 = vmatprep.subr.bf16.mxu0 %v3418_v14  ;;  %v2360_v38 = vld [vmem:[%s5611_s1 + $0x2e8] sm:$0xff]  ;;  %v2391_v41 = vld [vmem:[%s5611_s1 + $0x3e0] sm:$0xff]  ;;  %v4276_v43 = vld [vmem:[#allocation2 + $0x18] sm:$0xff]  ;;  %v3458_v44 = vpack.c.bf16 %v2408_v35, %v2407_v34  ;;  %v373_v48 = vrot.slane %v4274_v42, 1  ;;  %v439_v50 = vrot.slane %v4274_v42, 3  ;;  %v406_v5 = vrot.slane %v4274_v42, 2 }
  0x3d   : > { %3451 = vmatprep.subr.bf16.mxu1 %v3450_v18  ;;  %v2392_v45 = vld [vmem:[%s5611_s1 + $0x3e8] sm:$0xff]  ;;  %v2377_v46 = vld [vmem:[%s5611_s1 + $0x370] sm:$0xff]  ;;  %v2378_v47 = vld [vmem:[%s5611_s1 + $0x378] sm:$0xff]  ;;  %v374_v49 = vrot.slane %v4276_v43, 1  ;;  %v440_v53 = vrot.slane %v4276_v43, 3  ;;  %v3428_v54 = vpack.c.bf16 %v2360_v38, %v2359_v37  ;;  %v407_v6 = vrot.slane %v4276_v43, 2 }
  0x3e   : > { %v2409_v51 = vld [vmem:[%s5611_s1 + $0x470] sm:$0xff]  ;;  %v2410_v52 = vld [vmem:[%s5611_s1 + $0x478] sm:$0xff]  ;;  %v3460_v56 = vpack.c.bf16 %v2392_v45, %v2391_v41  ;;  %v3430_v57 = vpack.c.bf16 %v2378_v47, %v2377_v46  ;;  %v2411_v0 = vld [vmem:[%s5611_s1 + $0x480] sm:$0xff] }
  0x3f   : > { %3421 = vmatpush3.bf16.msra.mxu0 %v3420_v24  ;;  %v4298_v55 = vsel %vm369_vm0, %v373_v48, %v374_v49  ;;  %v2361_v58 = vld [vmem:[%s5611_s1 + $0x2f0] sm:$0xff]  ;;  %v2362_v59 = vld [vmem:[%s5611_s1 + $0x2f8] sm:$0xff]  ;;  %v4310_v61 = vsel %vm435_vm1, %v439_v50, %v440_v53  ;;  %v3462_v62 = vpack.c.bf16 %v2410_v52, %v2409_v51  ;;  %v2412_v1 = vld [vmem:[%s5611_s1 + $0x488] sm:$0xff]  ;;  %v4363_v19 = vsel %vm402_vm2, %v406_v5, %v407_v6 }
  0x40   : > { %3453 = vmatpush3.bf16.msra.mxu1 %v3452_v25  ;;  %3423 = vmatprep.subr.bf16.mxu0 %v3422_v26  ;;  %v2393_v60 = vld [vmem:[%s5611_s1 + $0x3f0] sm:$0xff]  ;;  %v2394_v63 = vld [vmem:[%s5611_s1 + $0x3f8] sm:$0xff]  ;;  %v517_v2 = vld [vmem:[%s5611_s1 + $0x80] sm:$0xff]  ;;  %v3432_v4 = vpack.c.bf16 %v2362_v59, %v2361_v58  ;;  %v3466_v9 = vpack.c.bf16 %v2412_v1, %v2411_v0 }
  0x41   : > { %3455 = vmatprep.subr.bf16.mxu1 %v3454_v30  ;;  %726 = vmatprep.mubr.f32.mxu0 %v4298_v55  ;;  %v518_v3 = vld [vmem:[%s5611_s1 + $0x88] sm:$0xff]  ;;  %v501_v7 = vld [vmem:[%s5611_s1] sm:$0xff]  ;;  %v3464_v8 = vpack.c.bf16 %v2394_v63, %v2393_v60  ;;  %v2413_v11 = vld [vmem:[%s5611_s1 + $0x490] sm:$0xff] }
  0x42   : > { %811 = vmatprep.mubr.f32.mxu1 %v4310_v61  ;;  %v502_v10 = vld [vmem:[%s5611_s1 + $0x8] sm:$0xff]  ;;  %v2414_v12 = vld [vmem:[%s5611_s1 + $0x498] sm:$0xff]  ;;  %v3498_v13 = vpack.c.bf16 %v518_v3, %v517_v2  ;;  %v519_v14 = vld [vmem:[%s5611_s1 + $0x90] sm:$0xff] }
  0x43   : > { %3425 = vmatpush3.bf16.msra.mxu0 %v3424_v36  ;;  %v520_v15 = vld [vmem:[%s5611_s1 + $0x98] sm:$0xff]  ;;  %v4352_v16 = vld [vmem:[%s5611_s1 + $0x10] sm:$0xff]  ;;  %v2415_v18 = vld [vmem:[%s5611_s1 + $0x4a0] sm:$0xff]  ;;  %v3500_v20 = vpack.c.bf16 %v502_v10, %v501_v7  ;;  %v3470_v21 = vpack.c.bf16 %v2414_v12, %v2413_v11 }
  0x44   : > { %3457 = vmatpush3.bf16.msra.mxu1 %v3456_v39  ;;  %3427 = vmatprep.subr.bf16.mxu0 %v3426_v40  ;;  %v4357_v17 = vld [vmem:[%s5611_s1 + $0x18] sm:$0xff]  ;;  %v2416_v22 = vld [vmem:[%s5611_s1 + $0x4a8] sm:$0xff]  ;;  %v4368_v23 = vld [vmem:[#allocation2 + $0x20] sm:$0xff]  ;;  %v3502_v29 = vpack.c.bf16 %v520_v15, %v519_v14 }
  0x45   : > { %3459 = vmatprep.subr.bf16.mxu1 %v3458_v44  ;;  %v4370_v24 = vld [vmem:[#allocation2 + $0x28] sm:$0xff]  ;;  %v376_v25 = vrot.slane %v4368_v23, 1  ;;  %v442_v27 = vrot.slane %v4368_v23, 3  ;;  %v521_v30 = vld [vmem:[%s5611_s1 + $0xa0] sm:$0xff]  ;;  %v409_v31 = vrot.slane %v4368_v23, 2  ;;  %v3504_v33 = vpack.c.bf16 %v4357_v17, %v4352_v16  ;;  %v4390_v37 = vld [vmem:[#allocation2 + $0x30] sm:$0xff] }
  0x46   : > { %v377_v26 = vrot.slane %v4370_v24, 1  ;;  %v443_v28 = vrot.slane %v4370_v24, 3  ;;  %v410_v32 = vrot.slane %v4370_v24, 2  ;;  %v3474_v34 = vpack.c.bf16 %v2416_v22, %v2415_v18  ;;  %v522_v35 = vld [vmem:[%s5611_s1 + $0xa8] sm:$0xff]  ;;  %v4392_v38 = vld [vmem:[#allocation2 + $0x38] sm:$0xff]  ;;  %v505_v45 = vld [vmem:[%s5611_s1 + $0x20] sm:$0xff] }
  0x47   : > { %3429 = vmatpush3.bf16.msra.mxu0 %v3428_v54  ;;  %v379_v40 = vrot.slane %v4390_v37, 1  ;;  %v380_v41 = vrot.slane %v4392_v38, 1  ;;  %v445_v44 = vrot.slane %v4390_v37, 3  ;;  %v506_v46 = vld [vmem:[%s5611_s1 + $0x28] sm:$0xff]  ;;  %v446_v48 = vrot.slane %v4392_v38, 3  ;;  %v4413_v51 = vld [vmem:[#allocation2 + $0x40] sm:$0xff] }
  0x48   : > { %3461 = vmatpush3.bf16.msra.mxu1 %v3460_v56  ;;  %3431 = vmatprep.subr.bf16.mxu0 %v3430_v57  ;;  %v4388_v36 = vsel %vm369_vm0, %v376_v25, %v377_v26  ;;  %v4396_v39 = vsel %vm435_vm1, %v442_v27, %v443_v28  ;;  %v4408_v47 = vsel %vm402_vm2, %v409_v31, %v410_v32  ;;  %v412_v49 = vrot.slane %v4390_v37, 2  ;;  %v2417_v53 = vld [vmem:[%s5611_s1 + $0x4b0] sm:$0xff]  ;;  %v2418_v54 = vld [vmem:[%s5611_s1 + $0x4b8] sm:$0xff]  ;;  %v4422_v56 = vld [vmem:[#allocation2 + $0x48] sm:$0xff] }
  0x49   : > { %3463 = vmatprep.subr.bf16.mxu1 %v3462_v62  ;;  %v413_v50 = vrot.slane %v4392_v38, 2  ;;  %v3506_v52 = vpack.c.bf16 %v522_v35, %v521_v30  ;;  %v523_v57 = vld [vmem:[%s5611_s1 + $0xb0] sm:$0xff]  ;;  %v524_v58 = vld [vmem:[%s5611_s1 + $0xb8] sm:$0xff]  ;;  %v4433_v59 = vsel %vm369_vm0, %v379_v40, %v380_v41  ;;  %v382_v60 = vrot.slane %v4413_v51, 1  ;;  %v4443_v3 = vld [vmem:[#allocation2] sm:$0xff] }
  0x4a   : > { %v383_v62 = vrot.slane %v4422_v56, 1  ;;  %v3508_v63 = vpack.c.bf16 %v506_v46, %v505_v45  ;;  %v4439_v0 = vsel %vm435_vm1, %v445_v44, %v446_v48  ;;  %v448_v1 = vrot.slane %v4413_v51, 3  ;;  %v507_v6 = vld [vmem:[%s5611_s1 + $0x30] sm:$0xff]  ;;  %v508_v11 = vld [vmem:[%s5611_s1 + $0x38] sm:$0xff]  ;;  %v2419_v12 = vld [vmem:[%s5611_s1 + $0x4c0] sm:$0xff] }
  0x4b   : > { %3433 = vmatpush3.bf16.msra.mxu0 %v3432_v4  ;;  %v449_v2 = vrot.slane %v4422_v56, 3  ;;  %v4445_v4 = vld [vmem:[#allocation2 + $0x8] sm:$0xff]  ;;  %v3478_v5 = vpack.c.bf16 %v2418_v54, %v2417_v53  ;;  %v4451_v7 = vsel %vm402_vm2, %v412_v49, %v413_v50  ;;  %v3510_v10 = vpack.c.bf16 %v524_v58, %v523_v57  ;;  %v525_v14 = vld [vmem:[%s5611_s1 + $0xc0] sm:$0xff]  ;;  %v2422_v31 = vld [vmem:[%s5611_s1 + $0x4d8] sm:$0xff] }
  0x4c   : > { %3465 = vmatpush3.bf16.msra.mxu1 %v3464_v8  ;;  %3467 = vmatprep.subr.bf16.mxu0 %v3466_v9  ;;  %v415_v8 = vrot.slane %v4413_v51, 2  ;;  %v526_v15 = vld [vmem:[%s5611_s1 + $0xc8] sm:$0xff]  ;;  %v4474_v16 = vsel %vm369_vm0, %v382_v60, %v383_v62  ;;  %v370_v17 = vrot.slane %v4443_v3, 1  ;;  %v371_v18 = vrot.slane %v4445_v4, 1  ;;  %v509_v27 = vld [vmem:[%s5611_s1 + $0x40] sm:$0xff]  ;;  %v527_v32 = vld [vmem:[%s5611_s1 + $0xd0] sm:$0xff] }
  0x4d   : > { %3499 = vmatprep.subr.bf16.mxu1 %v3498_v13  ;;  %v2420_v13 = vld [vmem:[%s5611_s1 + $0x4c8] sm:$0xff]  ;;  %v473_v22 = vrot.slane %v4276_v43, 4  ;;  %v3512_v25 = vpack.c.bf16 %v508_v11, %v507_v6  ;;  %v2421_v43 = vld [vmem:[%s5611_s1 + $0x4d0] sm:$0xff]  ;;  %v512_v46 = vld [vmem:[%s5611_s1 + $0x58] sm:$0xff] }
  0x4e   : > { %727 = vmatmul.mubr.f32.vlgmr.msra.gmra.mrb[0].mxu0 %v4274_v42  ;;  %v3482_v26 = vpack.c.bf16 %v2420_v13, %v2419_v12  ;;  %v510_v30 = vld [vmem:[%s5611_s1 + $0x48] sm:$0xff]  ;;  %v3486_v41 = vpack.c.bf16 %v2422_v31, %v2421_v43  ;;  %v511_v44 = vld [vmem:[%s5611_s1 + $0x50] sm:$0xff]  ;;  %v2423_v48 = vld [vmem:[%s5611_s1 + $0x4e0] sm:$0xff] }
  0x4f   : > { %812 = vmatmul.mubr.f32.vlgmr.msra.gmra.mrb[0].mxu1 %v4363_v19  ;;  %3469 = vmatpush3.bf16.msra.mxu0 %v3466_v9  ;;  %v416_v9 = vrot.slane %v4422_v56, 2  ;;  %v3516_v40 = vpack.c.bf16 %v510_v30, %v509_v27  ;;  %v2424_v49 = vld [vmem:[%s5611_s1 + $0x4e8] sm:$0xff]  ;;  %v529_v50 = vld [vmem:[%s5611_s1 + $0xe0] sm:$0xff]  ;;  %v3520_v53 = vpack.c.bf16 %v512_v46, %v511_v44  ;;  %v2425_v62 = vld [vmem:[%s5611_s1 + $0x4f0] sm:$0xff] }
  0x50   : > { %3501 = vmatpush3.bf16.msra.mxu1 %v3500_v20  ;;  %3471 = vmatprep.subr.bf16.mxu0 %v3470_v21  ;;  %v4480_v20 = vsel %vm435_vm1, %v448_v1, %v449_v2  ;;  %v3490_v54 = vpack.c.bf16 %v2424_v49, %v2423_v48  ;;  %v513_v57 = vld [vmem:[%s5611_s1 + $0x60] sm:$0xff]  ;;  %v514_v60 = vld [vmem:[%s5611_s1 + $0x68] sm:$0xff]  ;;  %v531_v1 = vld [vmem:[%s5611_s1 + $0xf0] sm:$0xff] }
  0x51   : > { %3503 = vmatprep.subr.bf16.mxu1 %v3502_v29  ;;  %731 = vmatprep.mubr.f32.mxu0 %v4388_v36  ;;  %v4488_v28 = vsel %vm402_vm2, %v415_v8, %v416_v9  ;;  %v3514_v29 = vpack.c.bf16 %v526_v15, %v525_v14  ;;  %v532_v2 = vld [vmem:[%s5611_s1 + $0xf8] sm:$0xff]  ;;  %v515_v8 = vld [vmem:[%s5611_s1 + $0x70] sm:$0xff]  ;;  %v549_v11 = vld [vmem:[%s5611_s1 + $0x180] sm:$0xff]  ;;  %v475_v15 = vrot.slane %v4368_v23, 4 }
  0x52   : > { %816 = vmatprep.mubr.f32.mxu1 %v4396_v39  ;;  %732 = vmatmul.mubr.f32.gmra.mrb[2].mxu0 %v4368_v23  ;;  %v3526_v9 = vpack.c.bf16 %v532_v2, %v531_v1  ;;  %v550_v12 = vld [vmem:[%s5611_s1 + $0x188] sm:$0xff]  ;;  %v2443_v13 = vld [vmem:[%s5611_s1 + $0x580] sm:$0xff]  ;;  %v552_v30 = vld [vmem:[%s5611_s1 + $0x198] sm:$0xff] }
  0x53   : > { %3473 = vmatpush3.bf16.msra.mxu0 %v3470_v21  ;;  %817 = vmatmul.mubr.f32.gmra.mrb[2].mxu1 %v4408_v47  ;;  %v472_v21 = vrot.slane %v4274_v42, 4  ;;  %v2444_v14 = vld [vmem:[%s5611_s1 + $0x588] sm:$0xff]  ;;  %v2427_v27 = vld [vmem:[%s5611_s1 + $0x500] sm:$0xff]  ;;  %v2445_v43 = vld [vmem:[%s5611_s1 + $0x590] sm:$0xff] }
  0x54   : > { %3505 = vmatpush3.bf16.msra.mxu1 %v3504_v33  ;;  %3475 = vmatprep.subr.bf16.mxu0 %v3474_v34  ;;  %v528_v33 = vld [vmem:[%s5611_s1 + $0xd8] sm:$0xff]  ;;  %v535_v44 = vld [vmem:[%s5611_s1 + $0x110] sm:$0xff]  ;;  %v537_v1 = vld [vmem:[%s5611_s1 + $0x120] sm:$0xff] }
  0x55   : > { %3507 = vmatprep.subr.bf16.mxu1 %v3506_v52  ;;  %736 = vmatprep.mubr.f32.mxu0 %v4433_v59  ;;  %v4511_v35 = vsel %vm468_vm3, %v472_v21, %v473_v22  ;;  %v3518_v45 = vpack.c.bf16 %v528_v33, %v527_v32  ;;  %v530_v52 = vld [vmem:[%s5611_s1 + $0xe8] sm:$0xff]  ;;  %v3530_v21 = vpack.c.bf16 %v550_v12, %v549_v11  ;;  %v533_v22 = vld [vmem:[%s5611_s1 + $0x100] sm:$0xff]  ;;  %v2446_v31 = vld [vmem:[%s5611_s1 + $0x598] sm:$0xff] }
  0x56   : > { %821 = vmatprep.mubr.f32.mxu1 %v4439_v0  ;;  %737 = vmatmul.mubr.f32.gmra.mrb[4].mxu0 %v4390_v37  ;;  %v3522_v58 = vpack.c.bf16 %v530_v52, %v529_v50  ;;  %v3598_v48 = vpack.c.bf16 %v2446_v31, %v2445_v43  ;;  %v2429_v49 = vld [vmem:[%s5611_s1 + $0x510] sm:$0xff]  ;;  %v553_v50 = vld [vmem:[%s5611_s1 + $0x1a0] sm:$0xff]  ;;  %v554_v52 = vld [vmem:[%s5611_s1 + $0x1a8] sm:$0xff] }
  0x57   : > { %3477 = vmatpush3.bf16.msra.mxu0 %v3474_v34  ;;  %822 = vmatmul.mubr.f32.gmra.mrb[4].mxu1 %v4451_v7  ;;  %v372_v34 = vsel %vm369_vm0, %v370_v17, %v371_v18  ;;  %v476_v17 = vrot.slane %v4370_v24, 4  ;;  %v2428_v24 = vld [vmem:[%s5611_s1 + $0x508] sm:$0xff]  ;;  %v2450_v11 = vld [vmem:[%s5611_s1 + $0x5b8] sm:$0xff] }
  0x58   : > { %3509 = vmatpush3.bf16.msra.mxu1 %v3508_v63  ;;  %3479 = vmatprep.subr.bf16.mxu0 %v3478_v5  ;;  %v2426_v63 = vld [vmem:[%s5611_s1 + $0x4f8] sm:$0xff]  ;;  %v538_v2 = vld [vmem:[%s5611_s1 + $0x128] sm:$0xff] }
  0x59   : > { %3511 = vmatprep.subr.bf16.mxu1 %v3510_v10  ;;  %741 = vmatprep.mubr.f32.mxu0 %v4474_v16  ;;  %v3494_v6 = vpack.c.bf16 %v2426_v63, %v2425_v62  ;;  %v516_v10 = vld [vmem:[%s5611_s1 + $0x78] sm:$0xff]  ;;  %v4595_v32 = vsel %vm468_vm3, %v475_v15, %v476_v17  ;;  %v482_v62 = vrot.slane %v4422_v56, 4  ;;  %v2431_v56 = vld [vmem:[%s5611_s1 + $0x520] sm:$0xff]  ;;  %v3540_v12 = vpack.c.bf16 %v538_v2, %v537_v1 }
  0x5a   : > { %826 = vmatprep.mubr.f32.mxu1 %v4480_v20  ;;  %742 = vmatmul.mubr.f32.gmra.mrb[6].mxu0 %v4413_v51  ;;  %v3528_v18 = vpack.c.bf16 %v516_v10, %v515_v8  ;;  %v555_v8 = vld [vmem:[%s5611_s1 + $0x1b0] sm:$0xff]  ;;  %v437_v15 = vrot.slane %v4445_v4, 3  ;;  %v2438_v1 = vld [vmem:[%s5611_s1 + $0x558] sm:$0xff]  ;;  %v561_v2 = vld [vmem:[%s5611_s1 + $0x1e0] sm:$0xff] }
  0x5b   : > { %3481 = vmatpush3.bf16.msra.mxu0 %v3478_v5  ;;  %827 = vmatmul.mubr.f32.gmra.mrb[6].mxu1 %v4488_v28  ;;  %v3524_v5 = vpack.c.bf16 %v514_v60, %v513_v57  ;;  %v481_v60 = vrot.slane %v4413_v51, 4  ;;  %v2449_v10 = vld [vmem:[%s5611_s1 + $0x5b0] sm:$0xff] }
  0x5c   : > { %3513 = vmatpush3.bf16.msra.mxu1 %v3512_v25  ;;  %3483 = vmatprep.subr.bf16.mxu0 %v3482_v26  ;;  %v534_v25 = vld [vmem:[%s5611_s1 + $0x108] sm:$0xff] }
  0x5d   : > { %3515 = vmatprep.subr.bf16.mxu1 %v3514_v29  ;;  %981 = vmatprep.mubr.f32.mxu1 %v372_v34  ;;  %v551_v29 = vld [vmem:[%s5611_s1 + $0x190] sm:$0xff]  ;;  %v3532_v33 = vpack.c.bf16 %v534_v25, %v533_v22  ;;  %v478_v34 = vrot.slane %v4390_v37, 4  ;;  %v3606_v25 = vpack.c.bf16 %v2450_v11, %v2449_v10  ;;  %v545_v10 = vld [vmem:[%s5611_s1 + $0x160] sm:$0xff] }
  0x5e   : > { %3244 = vmatprep.mubr.f32.mxu0 %v4511_v35  ;;  %v3534_v46 = vpack.c.bf16 %v552_v30, %v551_v29  ;;  %v2451_v29 = vld [vmem:[%s5611_s1 + $0x5c0] sm:$0xff]  ;;  %v2452_v30 = vld [vmem:[%s5611_s1 + $0x5c8] sm:$0xff] }
  0x5f   : > { %3485 = vmatpush3.bf16.msra.mxu0 %v3482_v26  ;;  %v3594_v26 = vpack.c.bf16 %v2444_v14, %v2443_v13  ;;  %v4658_v13 = vsel %vm468_vm3, %v481_v60, %v482_v62  ;;  %v436_v14 = vrot.slane %v4443_v3, 3  ;;  %v544_v60 = vld [vmem:[%s5611_s1 + $0x158] sm:$0xff]  ;;  %v2437_v62 = vld [vmem:[%s5611_s1 + $0x550] sm:$0xff]  ;;  %v2439_v11 = vld [vmem:[%s5611_s1 + $0x560] sm:$0xff] }
  0x60   : > { %3517 = vmatpush3.bf16.msra.mxu1 %v3516_v40  ;;  %3487 = vmatprep.subr.bf16.mxu0 %v3486_v41  ;;  %v479_v40 = vrot.slane %v4392_v38, 4  ;;  %v2430_v38 = vld [vmem:[%s5611_s1 + $0x518] sm:$0xff] }
  0x61   : > { %3519 = vmatprep.subr.bf16.mxu1 %v3518_v45  ;;  %v536_v45 = vld [vmem:[%s5611_s1 + $0x118] sm:$0xff]  ;;  %v3600_v63 = vpack.c.bf16 %v2430_v38, %v2429_v49  ;;  %v438_v31 = vsel %vm435_vm1, %v436_v14, %v437_v15  ;;  %v2453_v38 = vld [vmem:[%s5611_s1 + $0x5d0] sm:$0xff]  ;;  %v2440_v14 = vld [vmem:[%s5611_s1 + $0x568] sm:$0xff] }
  0x62   : > { %v3536_v57 = vpack.c.bf16 %v536_v45, %v535_v44  ;;  %v2435_v44 = vld [vmem:[%s5611_s1 + $0x540] sm:$0xff]  ;;  %v3610_v45 = vpack.c.bf16 %v2452_v30, %v2451_v29  ;;  %v560_v49 = vld [vmem:[%s5611_s1 + $0x1d8] sm:$0xff]  ;;  %v563_v15 = vld [vmem:[%s5611_s1 + $0x1f0] sm:$0xff] }
  0x63   : > { %3489 = vmatpush3.bf16.msra.mxu0 %v3486_v41  ;;  %v3596_v41 = vpack.c.bf16 %v2428_v24, %v2427_v27  ;;  %v557_v27 = vld [vmem:[%s5611_s1 + $0x1c0] sm:$0xff]  ;;  %v558_v24 = vld [vmem:[%s5611_s1 + $0x1c8] sm:$0xff]  ;;  %v2442_v30 = vld [vmem:[%s5611_s1 + $0x578] sm:$0xff] }
  0x64   : > { %3521 = vmatpush3.bf16.msra.mxu1 %v3520_v53  ;;  %3491 = vmatprep.subr.bf16.mxu0 %v3490_v54  ;;  %v2447_v53 = vld [vmem:[%s5611_s1 + $0x5a0] sm:$0xff] }
  0x65   : > { %3523 = vmatprep.subr.bf16.mxu1 %v3522_v58  ;;  %v4626_v58 = vsel %vm468_vm3, %v478_v34, %v479_v40  ;;  %v3546_v34 = vpack.c.bf16 %v558_v24, %v557_v27  ;;  %v541_v40 = vld [vmem:[%s5611_s1 + $0x140] sm:$0xff]  ;;  %v548_v27 = vld [vmem:[%s5611_s1 + $0x178] sm:$0xff]  ;;  %v2441_v24 = vld [vmem:[%s5611_s1 + $0x570] sm:$0xff] }
  0x67   : > { %3493 = vmatpush3.bf16.msra.mxu0 %v3490_v54  ;;  %v2448_v54 = vld [vmem:[%s5611_s1 + $0x5a8] sm:$0xff] }
  0x68   : > { %3525 = vmatpush3.bf16.msra.mxu1 %v3524_v5  ;;  %3495 = vmatprep.subr.bf16.mxu0 %v3494_v6  ;;  %v3538_v5 = vpack.c.bf16 %v554_v52, %v553_v50  ;;  %v2454_v50 = vld [vmem:[%s5611_s1 + $0x5d8] sm:$0xff] }
  0x69   : > { %3527 = vmatprep.subr.bf16.mxu1 %v3526_v9  ;;  %v556_v9 = vld [vmem:[%s5611_s1 + $0x1b8] sm:$0xff] }
  0x6a   : > { %v3542_v22 = vpack.c.bf16 %v556_v9, %v555_v8  ;;  %v3616_v8 = vpack.c.bf16 %v2438_v1, %v2437_v62  ;;  %v2461_v62 = vld [vmem:[%s5611_s1 + $0x610] sm:$0xff] }
  0x6b   : > { %3497 = vmatpush3.bf16.msra.mxu0 %v3494_v6  ;;  %v3602_v6 = vpack.c.bf16 %v2448_v54, %v2447_v53 }
  0x6c   : > { %3529 = vmatpush3.bf16.msra.mxu1 %v3528_v18  ;;  %3531 = vmatprep.subr.bf16.mxu0 %v3530_v21  ;;  %v539_v18 = vld [vmem:[%s5611_s1 + $0x130] sm:$0xff] }
  0x6d   : > { %3595 = vmatprep.subr.bf16.mxu1 %v3594_v26  ;;  %v2433_v21 = vld [vmem:[%s5611_s1 + $0x530] sm:$0xff]  ;;  %v2434_v26 = vld [vmem:[%s5611_s1 + $0x538] sm:$0xff] }
  0x6e   : > { %3245 = vmatmul.mubr.f32.vlgmr.msra.gmra.mrb[8].mxu0 %v4595_v32 }
  0x6f   : > { %982 = vmatmul.mubr.f32.vlgmr.msra.gmra.mrb[8].mxu1 %v4443_v3  ;;  %3533 = vmatpush3.bf16.msra.mxu0 %v3532_v33  ;;  %v3608_v33 = vpack.c.bf16 %v2434_v26, %v2433_v21  ;;  %v547_v26 = vld [vmem:[%s5611_s1 + $0x170] sm:$0xff] }
  0x70   : > { %3597 = vmatpush3.bf16.msra.mxu1 %v3596_v41  ;;  %986 = vmatprep.mubr.f32.mxu1 %v4298_v55  ;;  %v2432_v55 = vld [vmem:[%s5611_s1 + $0x528] sm:$0xff] }
  0x71   : > { %3535 = vmatprep.subr.bf16.mxu0 %v3534_v46  ;;  %3599 = vmatprep.subr.bf16.mxu1 %v3598_v48  ;;  %v3604_v17 = vpack.c.bf16 %v2432_v55, %v2431_v56  ;;  %v542_v41 = vld [vmem:[%s5611_s1 + $0x148] sm:$0xff]  ;;  %v559_v48 = vld [vmem:[%s5611_s1 + $0x1d0] sm:$0xff] }
  0x72   : > { %3247 = vmatprep.mubr.f32.mxu0 %v4626_v58  ;;  %v2436_v46 = vld [vmem:[%s5611_s1 + $0x548] sm:$0xff]  ;;  %v3548_v52 = vpack.c.bf16 %v542_v41, %v541_v40  ;;  %v3550_v54 = vpack.c.bf16 %v560_v49, %v559_v48  ;;  %v3560_v40 = vpack.c.bf16 %v548_v27, %v547_v26  ;;  %v403_v41 = vrot.slane %v4443_v3, 2  ;;  %v2459_v49 = vld [vmem:[%s5611_s1 + $0x600] sm:$0xff] }
  0x73   : > { %987 = vmatmul.mubr.f32.gmra.mrb[10].mxu1 %v4274_v42  ;;  %3537 = vmatpush3.bf16.msra.mxu0 %v3536_v57  ;;  %v540_v42 = vld [vmem:[%s5611_s1 + $0x138] sm:$0xff]  ;;  %v3612_v53 = vpack.c.bf16 %v2436_v46, %v2435_v44  ;;  %v543_v57 = vld [vmem:[%s5611_s1 + $0x150] sm:$0xff]  ;;  %v2456_v56 = vld [vmem:[%s5611_s1 + $0x5e8] sm:$0xff]  ;;  %v404_v44 = vrot.slane %v4445_v4, 2  ;;  %v470_v26 = vrot.slane %v4445_v4, 4 }
  0x74   : > { %3601 = vmatpush3.bf16.msra.mxu1 %v3600_v63  ;;  %991 = vmatprep.mubr.f32.mxu1 %v4388_v36  ;;  %v3544_v43 = vpack.c.bf16 %v540_v42, %v539_v18  ;;  %v3614_v63 = vpack.c.bf16 %v2454_v50, %v2453_v38  ;;  %v3552_v55 = vpack.c.bf16 %v544_v60, %v543_v57  ;;  %v2457_v18 = vld [vmem:[%s5611_s1 + $0x5f0] sm:$0xff]  ;;  %v2458_v42 = vld [vmem:[%s5611_s1 + $0x5f8] sm:$0xff]  ;;  %v2460_v38 = vld [vmem:[%s5611_s1 + $0x608] sm:$0xff] }
  0x75   : > { %3539 = vmatprep.subr.bf16.mxu0 %v3538_v5  ;;  %3603 = vmatprep.subr.bf16.mxu1 %v3602_v6  ;;  %v562_v5 = vld [vmem:[%s5611_s1 + $0x1e8] sm:$0xff]  ;;  %v2455_v6 = vld [vmem:[%s5611_s1 + $0x5e0] sm:$0xff]  ;;  %v3622_v29 = vpack.c.bf16 %v2458_v42, %v2457_v18  ;;  %v567_v50 = vld [vmem:[%s5611_s1 + $0x210] sm:$0xff]  ;;  %v405_v57 = vsel %vm402_vm2, %v403_v41, %v404_v44  ;;  %v3628_v60 = vpack.c.bf16 %v2460_v38, %v2459_v49 }
  0x76   : > { %3248 = vmatmul.mubr.f32.gmra.mrb[10].mxu0 %v4658_v13  ;;  %v3554_v9 = vpack.c.bf16 %v562_v5, %v561_v2  ;;  %v2462_v2 = vld [vmem:[%s5611_s1 + $0x618] sm:$0xff]  ;;  %v569_v5 = vld [vmem:[%s5611_s1 + $0x220] sm:$0xff]  ;;  %v2484_v4 = vld [vmem:[%s5611_s1 + $0x6c8] sm:$0xff] }
  0x77   : > { %992 = vmatmul.mubr.f32.gmra.mrb[12].mxu1 %v4368_v23  ;;  %3541 = vmatpush3.bf16.msra.mxu0 %v3540_v12  ;;  %v3618_v12 = vpack.c.bf16 %v2456_v56, %v2455_v6  ;;  %v570_v6 = vld [vmem:[%s5611_s1 + $0x228] sm:$0xff]  ;;  %v2479_v56 = vld [vmem:[%s5611_s1 + $0x6a0] sm:$0xff]  ;;  %v575_v44 = vld [vmem:[%s5611_s1 + $0x250] sm:$0xff] }
  0x78   : > { %3605 = vmatpush3.bf16.msra.mxu1 %v3604_v17  ;;  %996 = vmatprep.mubr.f32.mxu1 %v4433_v59  ;;  %v564_v17 = vld [vmem:[%s5611_s1 + $0x1f8] sm:$0xff]  ;;  %v2468_v41 = vld [vmem:[%s5611_s1 + $0x648] sm:$0xff] }
  0x79   : > { %3543 = vmatprep.subr.bf16.mxu0 %v3542_v22  ;;  %3607 = vmatprep.subr.bf16.mxu1 %v3606_v25  ;;  %v3620_v22 = vpack.c.bf16 %v2440_v14, %v2439_v11  ;;  %v3558_v25 = vpack.c.bf16 %v564_v17, %v563_v15  ;;  %v4835_v11 = vld [vmem:[#allocation2 + $0x58] sm:$0xff]  ;;  %v2481_v15 = vld [vmem:[%s5611_s1 + $0x6b0] sm:$0xff] }
  0x7a   : > { %1066 = vmatprep.mubr.f32.mxu0 %v438_v31  ;;  %v566_v31 = vld [vmem:[%s5611_s1 + $0x208] sm:$0xff]  ;;  %v572_v14 = vld [vmem:[%s5611_s1 + $0x238] sm:$0xff]  ;;  %v386_v42 = vrot.slane %v4835_v11, 1 }
  0x7b   : > { %997 = vmatmul.mubr.f32.gmra.mrb[14].mxu1 %v4390_v37  ;;  %3545 = vmatpush3.bf16.msra.mxu0 %v3544_v43  ;;  %v565_v43 = vld [vmem:[%s5611_s1 + $0x200] sm:$0xff]  ;;  %v2482_v17 = vld [vmem:[%s5611_s1 + $0x6b8] sm:$0xff] }
  0x7c   : > { %3609 = vmatpush3.bf16.msra.mxu1 %v3608_v33  ;;  %3547 = vmatprep.subr.bf16.mxu0 %v3546_v34  ;;  %v2475_v33 = vld [vmem:[%s5611_s1 + $0x680] sm:$0xff]  ;;  %v2476_v34 = vld [vmem:[%s5611_s1 + $0x688] sm:$0xff]  ;;  %v3562_v46 = vpack.c.bf16 %v566_v31, %v565_v43  ;;  %v3638_v27 = vpack.c.bf16 %v2482_v17, %v2481_v15 }
  0x7d   : > { %3611 = vmatprep.subr.bf16.mxu1 %v3610_v45  ;;  %1317 = vmatprep.mubr.f32.mxu1 %v4388_v36  ;;  %v546_v36 = vld [vmem:[%s5611_s1 + $0x168] sm:$0xff]  ;;  %v3624_v45 = vpack.c.bf16 %v2442_v30, %v2441_v24  ;;  %v3626_v48 = vpack.c.bf16 %v2476_v34, %v2475_v33  ;;  %v2466_v24 = vld [vmem:[%s5611_s1 + $0x638] sm:$0xff]  ;;  %v2467_v33 = vld [vmem:[%s5611_s1 + $0x640] sm:$0xff] }
  0x7e   : > { %v3556_v21 = vpack.c.bf16 %v546_v36, %v545_v10  ;;  %v2463_v10 = vld [vmem:[%s5611_s1 + $0x620] sm:$0xff]  ;;  %v4833_v36 = vld [vmem:[#allocation2 + $0x50] sm:$0xff]  ;;  %v574_v30 = vld [vmem:[%s5611_s1 + $0x248] sm:$0xff]  ;;  %v3644_v49 = vpack.c.bf16 %v2468_v41, %v2467_v33 }
  0x7f   : > { %3549 = vmatpush3.bf16.msra.mxu0 %v3548_v52  ;;  %v568_v52 = vld [vmem:[%s5611_s1 + $0x218] sm:$0xff]  ;;  %v385_v18 = vrot.slane %v4833_v36, 1  ;;  %v2523_v15 = vld [vmem:[%s5611_s1 + $0x800] sm:$0xff]  ;;  %v2524_v17 = vld [vmem:[%s5611_s1 + $0x808] sm:$0xff] }
  0x80   : > { %3613 = vmatpush3.bf16.msra.mxu1 %v3612_v53  ;;  %3551 = vmatprep.subr.bf16.mxu0 %v3550_v54  ;;  %v2477_v53 = vld [vmem:[%s5611_s1 + $0x690] sm:$0xff]  ;;  %v2478_v54 = vld [vmem:[%s5611_s1 + $0x698] sm:$0xff]  ;;  %v2496_v33 = vld [vmem:[%s5611_s1 + $0x728] sm:$0xff] }
  0x81   : > { %3615 = vmatprep.subr.bf16.mxu1 %v3614_v63  ;;  %v3566_v63 = vpack.c.bf16 %v568_v52, %v567_v50  ;;  %v3630_v1 = vpack.c.bf16 %v2478_v54, %v2477_v53  ;;  %v4882_v43 = vsel %vm369_vm0, %v385_v18, %v386_v42  ;;  %v2470_v52 = vld [vmem:[%s5611_s1 + $0x658] sm:$0xff]  ;;  %v577_v53 = vld [vmem:[%s5611_s1 + $0x260] sm:$0xff]  ;;  %v578_v54 = vld [vmem:[%s5611_s1 + $0x268] sm:$0xff] }
  0x83   : > { %3553 = vmatpush3.bf16.msra.mxu0 %v3552_v55  ;;  %v2480_v55 = vld [vmem:[%s5611_s1 + $0x6a8] sm:$0xff] }
  0x84   : > { %3617 = vmatpush3.bf16.msra.mxu1 %v3616_v8  ;;  %3555 = vmatprep.subr.bf16.mxu0 %v3554_v9  ;;  %v3632_v8 = vpack.c.bf16 %v2462_v2, %v2461_v62  ;;  %v3570_v9 = vpack.c.bf16 %v570_v6, %v569_v5  ;;  %v2472_v5 = vld [vmem:[%s5611_s1 + $0x668] sm:$0xff]  ;;  %v579_v6 = vld [vmem:[%s5611_s1 + $0x270] sm:$0xff] }
  0x85   : > { %3619 = vmatprep.subr.bf16.mxu1 %v3618_v12  ;;  %v3634_v12 = vpack.c.bf16 %v2480_v55, %v2479_v56  ;;  %v2489_v56 = vld [vmem:[%s5611_s1 + $0x6f0] sm:$0xff]  ;;  %v2490_v55 = vld [vmem:[%s5611_s1 + $0x6f8] sm:$0xff] }
  0x87   : > { %3557 = vmatpush3.bf16.msra.mxu0 %v3556_v21 }
  0x88   : > { %3621 = vmatpush3.bf16.msra.mxu1 %v3620_v22  ;;  %3559 = vmatprep.subr.bf16.mxu0 %v3558_v25  ;;  %v2465_v22 = vld [vmem:[%s5611_s1 + $0x630] sm:$0xff]  ;;  %v469_v25 = vrot.slane %v4443_v3, 4  ;;  %v2483_v3 = vld [vmem:[%s5611_s1 + $0x6c0] sm:$0xff] }
  0x89   : > { %3623 = vmatprep.subr.bf16.mxu1 %v3622_v29  ;;  %v573_v29 = vld [vmem:[%s5611_s1 + $0x240] sm:$0xff] }
  0x8a   : > { %v3578_v31 = vpack.c.bf16 %v574_v30, %v573_v29  ;;  %v471_v34 = vsel %vm468_vm3, %v469_v25, %v470_v26  ;;  %v2493_v25 = vld [vmem:[%s5611_s1 + $0x710] sm:$0xff]  ;;  %v2494_v26 = vld [vmem:[%s5611_s1 + $0x718] sm:$0xff] }
  0x8b   : > { %3561 = vmatpush3.bf16.msra.mxu0 %v3560_v40  ;;  %v3642_v40 = vpack.c.bf16 %v2484_v4, %v2483_v3  ;;  %v3662_v30 = vpack.c.bf16 %v2494_v26, %v2493_v25  ;;  %v2509_v4 = vld [vmem:[%s5611_s1 + $0x790] sm:$0xff]  ;;  %v2535_v25 = vld [vmem:[%s5611_s1 + $0x860] sm:$0xff]  ;;  %v2536_v26 = vld [vmem:[%s5611_s1 + $0x868] sm:$0xff] }
  0x8c   : > { %3625 = vmatpush3.bf16.msra.mxu1 %v3624_v45  ;;  %3563 = vmatprep.subr.bf16.mxu0 %v3562_v46  ;;  %v576_v45 = vld [vmem:[%s5611_s1 + $0x258] sm:$0xff] }
  0x8d   : > { %3627 = vmatprep.subr.bf16.mxu1 %v3626_v48  ;;  %v2486_v48 = vld [vmem:[%s5611_s1 + $0x6d8] sm:$0xff]  ;;  %v3582_v38 = vpack.c.bf16 %v576_v45, %v575_v44  ;;  %v2511_v45 = vld [vmem:[%s5611_s1 + $0x7a0] sm:$0xff] }
  0x8e   : > { %1067 = vmatmul.mubr.f32.vlgmr.msra.gmra.mrb[12].mxu0 %v405_v57  ;;  %v2487_v57 = vld [vmem:[%s5611_s1 + $0x6e0] sm:$0xff] }
  0x8f   : > { %1318 = vmatmul.mubr.f32.vlgmr.msra.gmra.mrb[16].mxu1 %v4368_v23  ;;  %3565 = vmatpush3.bf16.msra.mxu0 %v3562_v46  ;;  %v2464_v23 = vld [vmem:[%s5611_s1 + $0x628] sm:$0xff]  ;;  %v2485_v46 = vld [vmem:[%s5611_s1 + $0x6d0] sm:$0xff] }
  0x90   : > { %3629 = vmatpush3.bf16.msra.mxu1 %v3628_v60  ;;  %1071 = vmatprep.mubr.f32.mxu0 %v4310_v61  ;;  %v571_v61 = vld [vmem:[%s5611_s1 + $0x230] sm:$0xff]  ;;  %v3646_v50 = vpack.c.bf16 %v2486_v48, %v2485_v46  ;;  %v2488_v60 = vld [vmem:[%s5611_s1 + $0x6e8] sm:$0xff]  ;;  %v451_v48 = vrot.slane %v4833_v36, 3 }
  0x91   : > { %3567 = vmatprep.subr.bf16.mxu0 %v3566_v63  ;;  %3631 = vmatprep.subr.bf16.mxu1 %v3630_v1  ;;  %v3574_v21 = vpack.c.bf16 %v572_v14, %v571_v61  ;;  %v2471_v1 = vld [vmem:[%s5611_s1 + $0x660] sm:$0xff]  ;;  %v3650_v2 = vpack.c.bf16 %v2488_v60, %v2487_v57  ;;  %v2492_v14 = vld [vmem:[%s5611_s1 + $0x708] sm:$0xff]  ;;  %v2513_v57 = vld [vmem:[%s5611_s1 + $0x7b0] sm:$0xff] }
  0x92   : > { %1072 = vmatmul.mubr.f32.gmra.mrb[14].mxu0 %v4363_v19  ;;  %1322 = vmatprep.mubr.f32.mxu1 %v4433_v59  ;;  %v3636_v19 = vpack.c.bf16 %v2464_v23, %v2463_v10  ;;  %v2473_v10 = vld [vmem:[%s5611_s1 + $0x670] sm:$0xff]  ;;  %v2474_v23 = vld [vmem:[%s5611_s1 + $0x678] sm:$0xff]  ;;  %v2491_v61 = vld [vmem:[%s5611_s1 + $0x700] sm:$0xff] }
  0x93   : > { %3569 = vmatpush3.bf16.msra.mxu0 %v3566_v63  ;;  %1076 = vmatprep.mubr.f32.mxu0 %v4396_v39  ;;  %v3586_v63 = vpack.c.bf16 %v578_v54, %v577_v53  ;;  %v3656_v18 = vpack.c.bf16 %v2474_v23, %v2473_v10  ;;  %v3658_v42 = vpack.c.bf16 %v2492_v14, %v2491_v61  ;;  %v2512_v46 = vld [vmem:[%s5611_s1 + $0x7a8] sm:$0xff]  ;;  %v418_v53 = vrot.slane %v4833_v36, 2  ;;  %v2501_v23 = vld [vmem:[%s5611_s1 + $0x750] sm:$0xff]  ;;  %v2502_v61 = vld [vmem:[%s5611_s1 + $0x758] sm:$0xff] }
  0x94   : > { %3633 = vmatpush3.bf16.msra.mxu1 %v3632_v8  ;;  %3571 = vmatprep.subr.bf16.mxu0 %v3570_v9  ;;  %v3652_v8 = vpack.c.bf16 %v2472_v5, %v2471_v1  ;;  %v419_v54 = vrot.slane %v4835_v11, 2  ;;  %v2514_v1 = vld [vmem:[%s5611_s1 + $0x7b8] sm:$0xff]  ;;  %v2500_v5 = vld [vmem:[%s5611_s1 + $0x748] sm:$0xff]  ;;  %v2533_v14 = vld [vmem:[%s5611_s1 + $0x850] sm:$0xff] }
  0x95   : > { %3635 = vmatprep.subr.bf16.mxu1 %v3634_v12  ;;  %1323 = vmatmul.mubr.f32.gmra.mrb[18].mxu1 %v4390_v37  ;;  %v3640_v37 = vpack.c.bf16 %v2466_v24, %v2465_v22  ;;  %v3654_v12 = vpack.c.bf16 %v2490_v55, %v2489_v56  ;;  %v2508_v22 = vld [vmem:[%s5611_s1 + $0x788] sm:$0xff]  ;;  %v2526_v24 = vld [vmem:[%s5611_s1 + $0x818] sm:$0xff]  ;;  %v3704_v55 = vpack.c.bf16 %v2514_v1, %v2513_v57 }
  0x96   : > { %1077 = vmatmul.mubr.f32.gmra.mrb[16].mxu0 %v4408_v47  ;;  %1327 = vmatprep.mubr.f32.mxu1 %v4474_v16  ;;  %v5051_v56 = vsel %vm402_vm2, %v418_v53, %v419_v54  ;;  %v2588_v53 = vld [vmem:[%s5611_s1 + $0xa08] sm:$0xff]  ;;  %v2557_v54 = vld [vmem:[%s5611_s1 + $0x910] sm:$0xff]  ;;  %v2558_v57 = vld [vmem:[%s5611_s1 + $0x918] sm:$0xff] }
  0x97   : > { %3573 = vmatpush3.bf16.msra.mxu0 %v3570_v9  ;;  %1081 = vmatprep.mubr.f32.mxu0 %v4439_v0 }
  0x98   : > { %3637 = vmatpush3.bf16.msra.mxu1 %v3636_v19  ;;  %3575 = vmatprep.subr.bf16.mxu0 %v3574_v21  ;;  %v3690_v19 = vpack.c.bf16 %v2524_v17, %v2523_v15  ;;  %v2534_v15 = vld [vmem:[%s5611_s1 + $0x858] sm:$0xff] }
  0x99   : > { %3639 = vmatprep.subr.bf16.mxu1 %v3638_v27  ;;  %1328 = vmatmul.mubr.f32.gmra.mrb[20].mxu1 %v4413_v51  ;;  %v2469_v51 = vld [vmem:[%s5611_s1 + $0x650] sm:$0xff] }
  0x9a   : > { %1082 = vmatmul.mubr.f32.gmra.mrb[18].mxu0 %v4451_v7  ;;  %1332 = vmatprep.mubr.f32.mxu1 %v4882_v43  ;;  %v3648_v62 = vpack.c.bf16 %v2470_v52, %v2469_v51  ;;  %v2525_v27 = vld [vmem:[%s5611_s1 + $0x810] sm:$0xff]  ;;  %v3700_v52 = vpack.c.bf16 %v2512_v46, %v2511_v45  ;;  %v2556_v45 = vld [vmem:[%s5611_s1 + $0x908] sm:$0xff]  ;;  %v2603_v46 = vld [vmem:[%s5611_s1 + $0xa80] sm:$0xff] }
  0x9b   : > { %3577 = vmatpush3.bf16.msra.mxu0 %v3574_v21  ;;  %3282 = vmatprep.mubr.f32.mxu0 %v471_v34  ;;  %v2507_v21 = vld [vmem:[%s5611_s1 + $0x780] sm:$0xff]  ;;  %v3694_v3 = vpack.c.bf16 %v2526_v24, %v2525_v27  ;;  %v2529_v51 = vld [vmem:[%s5611_s1 + $0x830] sm:$0xff] }
  0x9c   : > { %3641 = vmatpush3.bf16.msra.mxu1 %v3640_v37  ;;  %3579 = vmatprep.subr.bf16.mxu0 %v3578_v31  ;;  %v3692_v29 = vpack.c.bf16 %v2508_v22, %v2507_v21  ;;  %v2510_v37 = vld [vmem:[%s5611_s1 + $0x798] sm:$0xff]  ;;  %v2527_v34 = vld [vmem:[%s5611_s1 + $0x820] sm:$0xff]  ;;  %v2504_v22 = vld [vmem:[%s5611_s1 + $0x768] sm:$0xff] }
  0x9d   : > { %3643 = vmatprep.subr.bf16.mxu1 %v3642_v40  ;;  %1333 = vmatmul.mubr.f32.gmra.mrb[22].mxu1 %v4833_v36  ;;  %v2528_v40 = vld [vmem:[%s5611_s1 + $0x828] sm:$0xff]  ;;  %v3696_v41 = vpack.c.bf16 %v2510_v37, %v2509_v4  ;;  %v2518_v21 = vld [vmem:[%s5611_s1 + $0x7d8] sm:$0xff]  ;;  %v2537_v37 = vld [vmem:[%s5611_s1 + $0x870] sm:$0xff] }
  0x9e   : > { %1402 = vmatprep.mubr.f32.mxu1 %v4396_v39  ;;  %v580_v39 = vld [vmem:[%s5611_s1 + $0x278] sm:$0xff]  ;;  %v3698_v44 = vpack.c.bf16 %v2528_v40, %v2527_v34  ;;  %v2521_v40 = vld [vmem:[%s5611_s1 + $0x7f0] sm:$0xff] }
  0x9f   : > { %3581 = vmatpush3.bf16.msra.mxu0 %v3578_v31  ;;  %v3590_v9 = vpack.c.bf16 %v580_v39, %v579_v6  ;;  %v2495_v31 = vld [vmem:[%s5611_s1 + $0x720] sm:$0xff]  ;;  %v2532_v39 = vld [vmem:[%s5611_s1 + $0x848] sm:$0xff]  ;;  %v2506_v4 = vld [vmem:[%s5611_s1 + $0x778] sm:$0xff] }
  0xa0   : > { %3645 = vmatpush3.bf16.msra.mxu1 %v3644_v49  ;;  %3583 = vmatprep.subr.bf16.mxu0 %v3582_v38  ;;  %v2497_v49 = vld [vmem:[%s5611_s1 + $0x730] sm:$0xff]  ;;  %v2531_v6 = vld [vmem:[%s5611_s1 + $0x840] sm:$0xff] }
  0xa1   : > { %3647 = vmatprep.subr.bf16.mxu1 %v3646_v50  ;;  %v2530_v50 = vld [vmem:[%s5611_s1 + $0x838] sm:$0xff]  ;;  %v3706_v10 = vpack.c.bf16 %v2532_v39, %v2531_v6  ;;  %v2541_v6 = vld [vmem:[%s5611_s1 + $0x890] sm:$0xff] }
  0xa2   : > { %v2542_v39 = vld [vmem:[%s5611_s1 + $0x898] sm:$0xff] }
  0xa3   : > { %3585 = vmatpush3.bf16.msra.mxu0 %v3582_v38  ;;  %v2498_v38 = vld [vmem:[%s5611_s1 + $0x738] sm:$0xff] }
  0xa4   : > { %3649 = vmatpush3.bf16.msra.mxu1 %v3648_v62  ;;  %3587 = vmatprep.subr.bf16.mxu0 %v3586_v63  ;;  %v3670_v62 = vpack.c.bf16 %v2498_v38, %v2497_v49  ;;  %v2539_v38 = vld [vmem:[%s5611_s1 + $0x880] sm:$0xff] }
  0xa5   : > { %3651 = vmatprep.subr.bf16.mxu1 %v3650_v2  ;;  %v2499_v2 = vld [vmem:[%s5611_s1 + $0x740] sm:$0xff] }
  0xa7   : > { %3589 = vmatpush3.bf16.msra.mxu0 %v3586_v63  ;;  %v3702_v63 = vpack.c.bf16 %v2530_v50, %v2529_v51  ;;  %v2540_v51 = vld [vmem:[%s5611_s1 + $0x888] sm:$0xff]  ;;  %v2587_v50 = vld [vmem:[%s5611_s1 + $0xa00] sm:$0xff] }
  0xa8   : > { %3653 = vmatpush3.bf16.msra.mxu1 %v3652_v8  ;;  %3591 = vmatprep.subr.bf16.mxu0 %v3590_v9  ;;  %v3674_v8 = vpack.c.bf16 %v2500_v5, %v2499_v2  ;;  %v3724_v1 = vpack.c.bf16 %v2540_v51, %v2539_v38  ;;  %v3788_v2 = vpack.c.bf16 %v2588_v53, %v2587_v50  ;;  %v2612_v38 = vld [vmem:[%s5611_s1 + $0xac8] sm:$0xff] }
  0xa9   : > { %3655 = vmatprep.subr.bf16.mxu1 %v3654_v12  ;;  %v2516_v12 = vld [vmem:[%s5611_s1 + $0x7c8] sm:$0xff]  ;;  %v3726_v5 = vpack.c.bf16 %v2558_v57, %v2557_v54  ;;  %v2547_v54 = vld [vmem:[%s5611_s1 + $0x8c0] sm:$0xff] }
  0xaa   : > { %v2548_v57 = vld [vmem:[%s5611_s1 + $0x8c8] sm:$0xff] }
  0xab   : > { %3593 = vmatpush3.bf16.msra.mxu0 %v3590_v9  ;;  %v2515_v9 = vld [vmem:[%s5611_s1 + $0x7c0] sm:$0xff] }
  0xac   : > { %3657 = vmatpush3.bf16.msra.mxu1 %v3656_v18  ;;  %3659 = vmatprep.subr.bf16.mxu0 %v3658_v42  ;;  %v3708_v17 = vpack.c.bf16 %v2516_v12, %v2515_v9  ;;  %v3678_v18 = vpack.c.bf16 %v2502_v61, %v2501_v23  ;;  %v2590_v9 = vld [vmem:[%s5611_s1 + $0xa18] sm:$0xff]  ;;  %v2560_v12 = vld [vmem:[%s5611_s1 + $0x928] sm:$0xff]  ;;  %v2607_v23 = vld [vmem:[%s5611_s1 + $0xaa0] sm:$0xff] }
  0xad   : > { %3691 = vmatprep.subr.bf16.mxu1 %v3690_v19  ;;  %v3710_v19 = vpack.c.bf16 %v2534_v15, %v2533_v14  ;;  %v2608_v61 = vld [vmem:[%s5611_s1 + $0xaa8] sm:$0xff]  ;;  %v3981_v14 = vld [vmem:[#allocation2 + $0x30] sm:$0xff]  ;;  %v3728_v15 = vpack.c.bf16 %v2542_v39, %v2541_v6  ;;  %v2614_v39 = vld [vmem:[%s5611_s1 + $0xad8] sm:$0xff] }
  0xae   : > { %3283 = vmatmul.mubr.f32.vlgmr.msra.gmra.mrb[8].mxu0 %v4511_v35  ;;  %v3666_v35 = vpack.c.bf16 %v2496_v33, %v2495_v31  ;;  %v2538_v31 = vld [vmem:[%s5611_s1 + $0x878] sm:$0xff]  ;;  %v2613_v6 = vld [vmem:[%s5611_s1 + $0xad0] sm:$0xff] }
  0xaf   : > { %1403 = vmatmul.mubr.f32.vlgmr.msra.gmra.mrb[24].mxu1 %v4408_v47  ;;  %3661 = vmatpush3.bf16.msra.mxu0 %v3658_v42  ;;  %v452_v47 = vrot.slane %v4835_v11, 3  ;;  %v2517_v42 = vld [vmem:[%s5611_s1 + $0x7d0] sm:$0xff] }
  0xb0   : > { %3693 = vmatpush3.bf16.msra.mxu1 %v3692_v29  ;;  %1407 = vmatprep.mubr.f32.mxu1 %v4439_v0  ;;  %v3712_v27 = vpack.c.bf16 %v2518_v21, %v2517_v42  ;;  %v2519_v29 = vld [vmem:[%s5611_s1 + $0x7e0] sm:$0xff]  ;;  %v484_v42 = vrot.slane %v4833_v36, 4 }
  0xb1   : > { %3663 = vmatprep.subr.bf16.mxu0 %v3662_v30  ;;  %3695 = vmatprep.subr.bf16.mxu1 %v3694_v3  ;;  %v5030_v60 = vsel %vm435_vm1, %v451_v48, %v452_v47  ;;  %v2505_v3 = vld [vmem:[%s5611_s1 + $0x770] sm:$0xff]  ;;  %v2604_v48 = vld [vmem:[%s5611_s1 + $0xa88] sm:$0xff] }
  0xb2   : > { %3285 = vmatprep.mubr.f32.mxu0 %v4595_v32  ;;  %v3686_v34 = vpack.c.bf16 %v2506_v4, %v2505_v3 }
  0xb3   : > { %1408 = vmatmul.mubr.f32.gmra.mrb[26].mxu1 %v4451_v7  ;;  %3665 = vmatpush3.bf16.msra.mxu0 %v3662_v30  ;;  %v3714_v30 = vpack.c.bf16 %v2536_v26, %v2535_v25  ;;  %v2544_v25 = vld [vmem:[%s5611_s1 + $0x8a8] sm:$0xff]  ;;  %v2591_v26 = vld [vmem:[%s5611_s1 + $0xa20] sm:$0xff] }
  0xb4   : > { %3697 = vmatpush3.bf16.msra.mxu1 %v3696_v41  ;;  %1412 = vmatprep.mubr.f32.mxu1 %v4480_v20  ;;  %v3718_v41 = vpack.c.bf16 %v2538_v31, %v2537_v37  ;;  %v5211_v31 = vld [vmem:[#allocation2 + $0x40] sm:$0xff] }
  0xb5   : > { %3667 = vmatprep.subr.bf16.mxu0 %v3666_v35  ;;  %3699 = vmatprep.subr.bf16.mxu1 %v3698_v44  ;;  %v2555_v44 = vld [vmem:[%s5611_s1 + $0x900] sm:$0xff] }
  0xb6   : > { %3286 = vmatmul.mubr.f32.gmra.mrb[10].mxu0 %v4626_v58  ;;  %v3722_v49 = vpack.c.bf16 %v2556_v45, %v2555_v44  ;;  %v2593_v44 = vld [vmem:[%s5611_s1 + $0xa30] sm:$0xff] }
  0xb7   : > { %1413 = vmatmul.mubr.f32.gmra.mrb[28].mxu1 %v4488_v28  ;;  %3669 = vmatpush3.bf16.msra.mxu0 %v3666_v35  ;;  %v2522_v35 = vld [vmem:[%s5611_s1 + $0x7f8] sm:$0xff] }
  0xb8   : > { %3701 = vmatpush3.bf16.msra.mxu1 %v3700_v52  ;;  %1417 = vmatprep.mubr.f32.mxu1 %v5030_v60  ;;  %v3720_v47 = vpack.c.bf16 %v2522_v35, %v2521_v40  ;;  %v3786_v52 = vpack.c.bf16 %v2604_v48, %v2603_v46  ;;  %v2546_v35 = vld [vmem:[%s5611_s1 + $0x8b8] sm:$0xff]  ;;  %v2563_v48 = vld [vmem:[%s5611_s1 + $0x940] sm:$0xff] }
  0xb9   : > { %3671 = vmatprep.subr.bf16.mxu0 %v3670_v62  ;;  %3703 = vmatprep.subr.bf16.mxu1 %v3702_v63  ;;  %v2606_v63 = vld [vmem:[%s5611_s1 + $0xa98] sm:$0xff] }
  0xba   : > { %3320 = vmatprep.mubr.f32.mxu0 %v4595_v32  ;;  %v2503_v32 = vld [vmem:[%s5611_s1 + $0x760] sm:$0xff]  ;;  %v2594_v46 = vld [vmem:[%s5611_s1 + $0xa38] sm:$0xff] }
  0xbb   : > { %1418 = vmatmul.mubr.f32.gmra.mrb[30].mxu1 %v5051_v56  ;;  %3673 = vmatpush3.bf16.msra.mxu0 %v3670_v62  ;;  %v3682_v24 = vpack.c.bf16 %v2504_v22, %v2503_v32  ;;  %v2605_v62 = vld [vmem:[%s5611_s1 + $0xa90] sm:$0xff]  ;;  %v2543_v22 = vld [vmem:[%s5611_s1 + $0x8a0] sm:$0xff] }
  0xbc   : > { %3705 = vmatpush3.bf16.msra.mxu1 %v3704_v55  ;;  %3675 = vmatprep.subr.bf16.mxu0 %v3674_v8  ;;  %v2589_v55 = vld [vmem:[%s5611_s1 + $0xa10] sm:$0xff]  ;;  %v3732_v37 = vpack.c.bf16 %v2544_v25, %v2543_v22  ;;  %v2551_v25 = vld [vmem:[%s5611_s1 + $0x8e0] sm:$0xff] }
  0xbd   : > { %3707 = vmatprep.subr.bf16.mxu1 %v3706_v10  ;;  %1657 = vmatprep.mubr.f32.mxu1 %v4433_v59  ;;  %v2520_v59 = vld [vmem:[%s5611_s1 + $0x7e8] sm:$0xff]  ;;  %v2559_v10 = vld [vmem:[%s5611_s1 + $0x920] sm:$0xff]  ;;  %v3792_v21 = vpack.c.bf16 %v2590_v9, %v2589_v55  ;;  %v3740_v55 = vpack.c.bf16 %v2548_v57, %v2547_v54  ;;  %v2573_v57 = vld [vmem:[%s5611_s1 + $0x990] sm:$0xff] }
  0xbe   : > { %v3716_v33 = vpack.c.bf16 %v2520_v59, %v2519_v29  ;;  %v3730_v32 = vpack.c.bf16 %v2560_v12, %v2559_v10  ;;  %v2562_v29 = vld [vmem:[%s5611_s1 + $0x938] sm:$0xff]  ;;  %v2549_v10 = vld [vmem:[%s5611_s1 + $0x8d0] sm:$0xff]  ;;  %v2620_v54 = vld [vmem:[%s5611_s1 + $0xb08] sm:$0xff] }
  0xbf   : > { %3677 = vmatpush3.bf16.msra.mxu0 %v3674_v8  ;;  %v3790_v8 = vpack.c.bf16 %v2606_v63, %v2605_v62  ;;  %v2610_v59 = vld [vmem:[%s5611_s1 + $0xab8] sm:$0xff]  ;;  %v2595_v62 = vld [vmem:[%s5611_s1 + $0xa40] sm:$0xff] }
  0xc0   : > { %3709 = vmatpush3.bf16.msra.mxu1 %v3708_v17  ;;  %3679 = vmatprep.subr.bf16.mxu0 %v3678_v18  ;;  %v5177_v17 = vld [vmem:[#allocation2 + $0x60] sm:$0xff]  ;;  %v2550_v12 = vld [vmem:[%s5611_s1 + $0x8d8] sm:$0xff] }
  0xc1   : > { %3711 = vmatprep.subr.bf16.mxu1 %v3710_v19  ;;  %v485_v19 = vrot.slane %v4835_v11, 4  ;;  %v2592_v11 = vld [vmem:[%s5611_s1 + $0xa28] sm:$0xff]  ;;  %v388_v3 = vrot.slane %v5177_v17, 1 }
  0xc3   : > { %3681 = vmatpush3.bf16.msra.mxu0 %v3678_v18  ;;  %v5179_v18 = vld [vmem:[#allocation2 + $0x68] sm:$0xff] }
  0xc4   : > { %3713 = vmatpush3.bf16.msra.mxu1 %v3712_v27  ;;  %3683 = vmatprep.subr.bf16.mxu0 %v3682_v24  ;;  %v3794_v27 = vpack.c.bf16 %v2608_v61, %v2607_v23  ;;  %v389_v4 = vrot.slane %v5179_v18, 1  ;;  %v3806_v23 = vpack.c.bf16 %v2614_v39, %v2613_v6  ;;  %v2598_v61 = vld [vmem:[%s5611_s1 + $0xa58] sm:$0xff] }
  0xc5   : > { %3715 = vmatprep.subr.bf16.mxu1 %v3714_v30  ;;  %v2609_v30 = vld [vmem:[%s5611_s1 + $0xab0] sm:$0xff] }
  0xc6   : > { %v3798_v45 = vpack.c.bf16 %v2610_v59, %v2609_v30  ;;  %v5243_v51 = vsel %vm369_vm0, %v388_v3, %v389_v4  ;;  %v2617_v30 = vld [vmem:[%s5611_s1 + $0xaf0] sm:$0xff]  ;;  %v2618_v59 = vld [vmem:[%s5611_s1 + $0xaf8] sm:$0xff] }
  0xc7   : > { %3685 = vmatpush3.bf16.msra.mxu0 %v3682_v24  ;;  %v2561_v24 = vld [vmem:[%s5611_s1 + $0x930] sm:$0xff] }
  0xc8   : > { %3717 = vmatpush3.bf16.msra.mxu1 %v3716_v33  ;;  %3687 = vmatprep.subr.bf16.mxu0 %v3686_v34  ;;  %v5215_v33 = vsel %vm468_vm3, %v484_v42, %v485_v19  ;;  %v3734_v40 = vpack.c.bf16 %v2562_v29, %v2561_v24  ;;  %v2615_v42 = vld [vmem:[%s5611_s1 + $0xae0] sm:$0xff]  ;;  %v2616_v19 = vld [vmem:[%s5611_s1 + $0xae8] sm:$0xff]  ;;  %v2569_v24 = vld [vmem:[%s5611_s1 + $0x970] sm:$0xff] }
  0xc9   : > { %3719 = vmatprep.subr.bf16.mxu1 %v3718_v41  ;;  %v2545_v41 = vld [vmem:[%s5611_s1 + $0x8b0] sm:$0xff]  ;;  %v2570_v29 = vld [vmem:[%s5611_s1 + $0x978] sm:$0xff] }
  0xca   : > { %v3736_v50 = vpack.c.bf16 %v2546_v35, %v2545_v41  ;;  %v2601_v41 = vld [vmem:[%s5611_s1 + $0xa70] sm:$0xff]  ;;  %v3814_v35 = vpack.c.bf16 %v2618_v59, %v2617_v30 }
  0xcb   : > { %3689 = vmatpush3.bf16.msra.mxu0 %v3686_v34  ;;  %v3796_v34 = vpack.c.bf16 %v2592_v11, %v2591_v26  ;;  %v2599_v26 = vld [vmem:[%s5611_s1 + $0xa60] sm:$0xff]  ;;  %v2600_v11 = vld [vmem:[%s5611_s1 + $0xa68] sm:$0xff] }
  0xcc   : > { %3721 = vmatpush3.bf16.msra.mxu1 %v3720_v47  ;;  %3723 = vmatprep.subr.bf16.mxu0 %v3722_v49  ;;  %v2564_v47 = vld [vmem:[%s5611_s1 + $0x948] sm:$0xff]  ;;  %v2611_v49 = vld [vmem:[%s5611_s1 + $0xac0] sm:$0xff]  ;;  %v3812_v4 = vpack.c.bf16 %v2600_v11, %v2599_v26  ;;  %v422_v26 = vrot.slane %v5179_v18, 2 }
  0xcd   : > { %3787 = vmatprep.subr.bf16.mxu1 %v3786_v52  ;;  %v3800_v52 = vpack.c.bf16 %v2594_v46, %v2593_v44  ;;  %v3738_v53 = vpack.c.bf16 %v2564_v47, %v2563_v48  ;;  %v3802_v63 = vpack.c.bf16 %v2612_v38, %v2611_v49  ;;  %v2602_v44 = vld [vmem:[%s5611_s1 + $0xa78] sm:$0xff]  ;;  %v2572_v46 = vld [vmem:[%s5611_s1 + $0x988] sm:$0xff]  ;;  %v2635_v48 = vld [vmem:[%s5611_s1 + $0xb80] sm:$0xff] }
  0xce   : > { %3321 = vmatmul.mubr.f32.vlgmr.msra.gmra.mrb[8].mxu0 %v4626_v58  ;;  %v2636_v47 = vld [vmem:[%s5611_s1 + $0xb88] sm:$0xff]  ;;  %v3816_v38 = vpack.c.bf16 %v2602_v44, %v2601_v41 }
  0xcf   : > { %1658 = vmatmul.mubr.f32.vlgmr.msra.gmra.mrb[32].mxu1 %v3981_v14  ;;  %3725 = vmatpush3.bf16.msra.mxu0 %v3724_v1  ;;  %v2596_v1 = vld [vmem:[%s5611_s1 + $0xa48] sm:$0xff]  ;;  %v2567_v14 = vld [vmem:[%s5611_s1 + $0x960] sm:$0xff] }
  0xd0   : > { %3789 = vmatpush3.bf16.msra.mxu1 %v3788_v2  ;;  %3727 = vmatprep.subr.bf16.mxu0 %v3726_v5  ;;  %v2565_v2 = vld [vmem:[%s5611_s1 + $0x950] sm:$0xff]  ;;  %v2566_v5 = vld [vmem:[%s5611_s1 + $0x958] sm:$0xff] }
  0xd1   : > { %3791 = vmatprep.subr.bf16.mxu1 %v3790_v8  ;;  %1662 = vmatprep.mubr.f32.mxu1 %v4474_v16  ;;  %v3804_v8 = vpack.c.bf16 %v2596_v1, %v2595_v62  ;;  %v3742_v9 = vpack.c.bf16 %v2566_v5, %v2565_v2  ;;  %v2574_v62 = vld [vmem:[%s5611_s1 + $0x998] sm:$0xff]  ;;  %v2621_v5 = vld [vmem:[%s5611_s1 + $0xb10] sm:$0xff] }
  0xd2   : > { %3323 = vmatprep.mubr.f32.mxu0 %v4658_v13  ;;  %v2638_v1 = vld [vmem:[%s5611_s1 + $0xb98] sm:$0xff]  ;;  %v3758_v6 = vpack.c.bf16 %v2574_v62, %v2573_v57  ;;  %v2583_v62 = vld [vmem:[%s5611_s1 + $0x9e0] sm:$0xff] }
  0xd3   : > { %3729 = vmatpush3.bf16.msra.mxu0 %v3728_v15  ;;  %1663 = vmatmul.mubr.f32.gmra.mrb[34].mxu1 %v5211_v31  ;;  %v2568_v15 = vld [vmem:[%s5611_s1 + $0x968] sm:$0xff]  ;;  %v2630_v57 = vld [vmem:[%s5611_s1 + $0xb58] sm:$0xff] }
  0xd4   : > { %3793 = vmatpush3.bf16.msra.mxu1 %v3792_v21  ;;  %3731 = vmatprep.subr.bf16.mxu0 %v3730_v32  ;;  %v3744_v21 = vpack.c.bf16 %v2550_v12, %v2549_v10  ;;  %v3746_v22 = vpack.c.bf16 %v2568_v15, %v2567_v14  ;;  %v2639_v10 = vld [vmem:[%s5611_s1 + $0xba0] sm:$0xff]  ;;  %v2640_v12 = vld [vmem:[%s5611_s1 + $0xba8] sm:$0xff]  ;;  %v455_v14 = vrot.slane %v5179_v18, 3  ;;  %v5391_v15 = vld [vmem:[#allocation2 + $0x70] sm:$0xff] }
  0xd5   : > { %3795 = vmatprep.subr.bf16.mxu1 %v3794_v27  ;;  %1667 = vmatprep.mubr.f32.mxu1 %v4882_v43  ;;  %v3810_v27 = vpack.c.bf16 %v2616_v19, %v2615_v42  ;;  %v5393_v42 = vld [vmem:[#allocation2 + $0x78] sm:$0xff]  ;;  %v2624_v19 = vld [vmem:[%s5611_s1 + $0xb28] sm:$0xff] }
  0xd6   : > { %3324 = vmatmul.mubr.f32.gmra.mrb[10].mxu0 %v5215_v33  ;;  %v392_v11 = vrot.slane %v5393_v42, 1 }
  0xd7   : > { %3733 = vmatpush3.bf16.msra.mxu0 %v3732_v37  ;;  %1668 = vmatmul.mubr.f32.gmra.mrb[36].mxu1 %v4833_v36  ;;  %v3750_v37 = vpack.c.bf16 %v2570_v29, %v2569_v24 }
  0xd8   : > { %3797 = vmatpush3.bf16.msra.mxu1 %v3796_v34  ;;  %3735 = vmatprep.subr.bf16.mxu0 %v3734_v40  ;;  %v2553_v34 = vld [vmem:[%s5611_s1 + $0x8f0] sm:$0xff]  ;;  %v2554_v40 = vld [vmem:[%s5611_s1 + $0x8f8] sm:$0xff] }
  0xd9   : > { %3799 = vmatprep.subr.bf16.mxu1 %v3798_v45  ;;  %1672 = vmatprep.mubr.f32.mxu1 %v5243_v51  ;;  %v2571_v45 = vld [vmem:[%s5611_s1 + $0x980] sm:$0xff]  ;;  %v3752_v49 = vpack.c.bf16 %v2554_v40, %v2553_v34  ;;  %v2644_v40 = vld [vmem:[%s5611_s1 + $0xbc8] sm:$0xff] }
  0xda   : > { %1742 = vmatprep.mubr.f32.mxu0 %v4439_v0  ;;  %v2597_v0 = vld [vmem:[%s5611_s1 + $0xa50] sm:$0xff]  ;;  %v2643_v34 = vld [vmem:[%s5611_s1 + $0xbc0] sm:$0xff] }
  0xdb   : > { %3737 = vmatpush3.bf16.msra.mxu0 %v3736_v50  ;;  %1673 = vmatmul.mubr.f32.gmra.mrb[38].mxu1 %v5177_v17  ;;  %v3808_v32 = vpack.c.bf16 %v2598_v61, %v2597_v0  ;;  %v3754_v50 = vpack.c.bf16 %v2572_v46, %v2571_v45  ;;  %v454_v61 = vrot.slane %v5177_v17, 3  ;;  %v2627_v45 = vld [vmem:[%s5611_s1 + $0xb40] sm:$0xff]  ;;  %v3834_v46 = vpack.c.bf16 %v2644_v40, %v2643_v34  ;;  %v2661_v40 = vld [vmem:[%s5611_s1 + $0xc50] sm:$0xff] }
  0xdc   : > { %3801 = vmatpush3.bf16.msra.mxu1 %v3800_v52  ;;  %3739 = vmatprep.subr.bf16.mxu0 %v3738_v53  ;;  %v3818_v52 = vpack.c.bf16 %v2636_v47, %v2635_v48  ;;  %v2619_v53 = vld [vmem:[%s5611_s1 + $0xb00] sm:$0xff]  ;;  %v2581_v48 = vld [vmem:[%s5611_s1 + $0x9d0] sm:$0xff]  ;;  %v2582_v47 = vld [vmem:[%s5611_s1 + $0x9d8] sm:$0xff] }
  0xdd   : > { %3803 = vmatprep.subr.bf16.mxu1 %v3802_v63  ;;  %1997 = vmatprep.mubr.f32.mxu1 %v4474_v16  ;;  %v2552_v16 = vld [vmem:[%s5611_s1 + $0x8e8] sm:$0xff]  ;;  %v2637_v63 = vld [vmem:[%s5611_s1 + $0xb90] sm:$0xff]  ;;  %v3820_v2 = vpack.c.bf16 %v2620_v54, %v2619_v53  ;;  %v5418_v29 = vsel %vm435_vm1, %v454_v61, %v455_v14  ;;  %v2634_v61 = vld [vmem:[%s5611_s1 + $0xb78] sm:$0xff] }
  0xde   : > { %v3748_v3 = vpack.c.bf16 %v2552_v16, %v2551_v25  ;;  %v3822_v39 = vpack.c.bf16 %v2638_v1, %v2637_v63  ;;  %v2642_v25 = vld [vmem:[%s5611_s1 + $0xbb8] sm:$0xff]  ;;  %v421_v16 = vrot.slane %v5177_v17, 2  ;;  %v2629_v53 = vld [vmem:[%s5611_s1 + $0xb50] sm:$0xff]  ;;  %v2647_v63 = vld [vmem:[%s5611_s1 + $0xbe0] sm:$0xff] }
  0xdf   : > { %3741 = vmatpush3.bf16.msra.mxu0 %v3740_v55  ;;  %v2622_v55 = vld [vmem:[%s5611_s1 + $0xb18] sm:$0xff]  ;;  %v2648_v1 = vld [vmem:[%s5611_s1 + $0xbe8] sm:$0xff]  ;;  %v2651_v14 = vld [vmem:[%s5611_s1 + $0xc00] sm:$0xff] }
  0xe0   : > { %3805 = vmatpush3.bf16.msra.mxu1 %v3804_v8  ;;  %3743 = vmatprep.subr.bf16.mxu0 %v3742_v9  ;;  %v2575_v8 = vld [vmem:[%s5611_s1 + $0x9a0] sm:$0xff]  ;;  %v2576_v9 = vld [vmem:[%s5611_s1 + $0x9a8] sm:$0xff]  ;;  %v3824_v0 = vpack.c.bf16 %v2622_v55, %v2621_v5  ;;  %v5443_v41 = vsel %vm402_vm2, %v421_v16, %v422_v26  ;;  %v488_v16 = vrot.slane %v5179_v18, 4 }
  0xe1   : > { %3807 = vmatprep.subr.bf16.mxu1 %v3806_v23  ;;  %v3762_v23 = vpack.c.bf16 %v2576_v9, %v2575_v8  ;;  %v2632_v55 = vld [vmem:[%s5611_s1 + $0xb68] sm:$0xff]  ;;  %v2585_v8 = vld [vmem:[%s5611_s1 + $0x9f0] sm:$0xff] }
  0xe2   : > { %v2649_v9 = vld [vmem:[%s5611_s1 + $0xbf0] sm:$0xff] }
  0xe3   : > { %3745 = vmatpush3.bf16.msra.mxu0 %v3744_v21  ;;  %v2577_v21 = vld [vmem:[%s5611_s1 + $0x9b0] sm:$0xff] }
  0xe4   : > { %3809 = vmatpush3.bf16.msra.mxu1 %v3808_v32  ;;  %3747 = vmatprep.subr.bf16.mxu0 %v3746_v22  ;;  %v2578_v32 = vld [vmem:[%s5611_s1 + $0x9b8] sm:$0xff]  ;;  %v2641_v22 = vld [vmem:[%s5611_s1 + $0xbb0] sm:$0xff] }
  0xe5   : > { %3811 = vmatprep.subr.bf16.mxu1 %v3810_v27  ;;  %v391_v27 = vrot.slane %v5391_v15, 1  ;;  %v3766_v30 = vpack.c.bf16 %v2578_v32, %v2577_v21  ;;  %v3830_v59 = vpack.c.bf16 %v2642_v25, %v2641_v22  ;;  %v2653_v32 = vld [vmem:[%s5611_s1 + $0xc10] sm:$0xff]  ;;  %v2654_v22 = vld [vmem:[%s5611_s1 + $0xc18] sm:$0xff]  ;;  %v487_v25 = vrot.slane %v5177_v17, 4 }
  0xe6   : > { %v3854_v26 = vpack.c.bf16 %v2654_v22, %v2653_v32 }
  0xe7   : > { %3749 = vmatpush3.bf16.msra.mxu0 %v3748_v3  ;;  %v2626_v3 = vld [vmem:[%s5611_s1 + $0xb38] sm:$0xff] }
  0xe8   : > { %3813 = vmatpush3.bf16.msra.mxu1 %v3812_v4  ;;  %3751 = vmatprep.subr.bf16.mxu0 %v3750_v37  ;;  %v2579_v4 = vld [vmem:[%s5611_s1 + $0x9c0] sm:$0xff]  ;;  %v2580_v37 = vld [vmem:[%s5611_s1 + $0x9c8] sm:$0xff] }
  0xe9   : > { %3815 = vmatprep.subr.bf16.mxu1 %v3814_v35  ;;  %v3770_v44 = vpack.c.bf16 %v2580_v37, %v2579_v4  ;;  %v2659_v37 = vld [vmem:[%s5611_s1 + $0xc40] sm:$0xff] }
  0xeb   : > { %3753 = vmatpush3.bf16.msra.mxu0 %v3752_v49  ;;  %v2645_v49 = vld [vmem:[%s5611_s1 + $0xbd0] sm:$0xff] }
  0xec   : > { %3817 = vmatpush3.bf16.msra.mxu1 %v3816_v38  ;;  %3755 = vmatprep.subr.bf16.mxu0 %v3754_v50  ;;  %v2646_v38 = vld [vmem:[%s5611_s1 + $0xbd8] sm:$0xff] }
  0xed   : > { %3819 = vmatprep.subr.bf16.mxu1 %v3818_v52  ;;  %v3774_v52 = vpack.c.bf16 %v2582_v47, %v2581_v48  ;;  %v3838_v54 = vpack.c.bf16 %v2646_v38, %v2645_v49 }
  0xee   : > { %1743 = vmatmul.mubr.f32.vlgmr.msra.gmra.mrb[20].mxu0 %v4451_v7  ;;  %v2623_v7 = vld [vmem:[%s5611_s1 + $0xb20] sm:$0xff] }
  0xef   : > { %1998 = vmatmul.mubr.f32.vlgmr.msra.gmra.mrb[40].mxu1 %v5211_v31  ;;  %3757 = vmatpush3.bf16.msra.mxu0 %v3754_v50  ;;  %v3826_v31 = vpack.c.bf16 %v2640_v12, %v2639_v10  ;;  %v3828_v24 = vpack.c.bf16 %v2624_v19, %v2623_v7  ;;  %v2650_v10 = vld [vmem:[%s5611_s1 + $0xbf8] sm:$0xff] }
  0xf0   : > { %3821 = vmatpush3.bf16.msra.mxu1 %v3820_v2  ;;  %1747 = vmatprep.mubr.f32.mxu0 %v4480_v20  ;;  %v3840_v2 = vpack.c.bf16 %v2630_v57, %v2629_v53  ;;  %v3846_v7 = vpack.c.bf16 %v2650_v10, %v2649_v9 }
  0xf1   : > { %3759 = vmatprep.subr.bf16.mxu0 %v3758_v6  ;;  %3823 = vmatprep.subr.bf16.mxu1 %v3822_v39  ;;  %v3842_v39 = vpack.c.bf16 %v2648_v1, %v2647_v63  ;;  %v490_v1 = vrot.slane %v5391_v15, 4 }
  0xf2   : > { %1748 = vmatmul.mubr.f32.gmra.mrb[22].mxu0 %v4488_v28  ;;  %2002 = vmatprep.mubr.f32.mxu1 %v4882_v43  ;;  %v2625_v43 = vld [vmem:[%s5611_s1 + $0xb30] sm:$0xff] }
  0xf3   : > { %3761 = vmatpush3.bf16.msra.mxu0 %v3758_v6  ;;  %1752 = vmatprep.mubr.f32.mxu0 %v5030_v60  ;;  %v3832_v35 = vpack.c.bf16 %v2626_v3, %v2625_v43  ;;  %v2631_v6 = vld [vmem:[%s5611_s1 + $0xb60] sm:$0xff]  ;;  %v2658_v43 = vld [vmem:[%s5611_s1 + $0xc38] sm:$0xff] }
  0xf4   : > { %3825 = vmatpush3.bf16.msra.mxu1 %v3824_v0  ;;  %3763 = vmatprep.subr.bf16.mxu0 %v3762_v23  ;;  %v3844_v12 = vpack.c.bf16 %v2632_v55, %v2631_v6 }
  0xf5   : > { %3827 = vmatprep.subr.bf16.mxu1 %v3826_v31  ;;  %2003 = vmatmul.mubr.f32.gmra.mrb[42].mxu1 %v4833_v36  ;;  %v393_v36 = vsel %vm369_vm0, %v391_v27, %v392_v11  ;;  %v2652_v31 = vld [vmem:[%s5611_s1 + $0xc08] sm:$0xff]  ;;  %v2655_v27 = vld [vmem:[%s5611_s1 + $0xc20] sm:$0xff] }
  0xf6   : > { %1753 = vmatmul.mubr.f32.gmra.mrb[24].mxu0 %v5051_v56  ;;  %2007 = vmatprep.mubr.f32.mxu1 %v5243_v51  ;;  %v2628_v51 = vld [vmem:[%s5611_s1 + $0xb48] sm:$0xff]  ;;  %v3850_v21 = vpack.c.bf16 %v2652_v31, %v2651_v14 }
  0xf7   : > { %3765 = vmatpush3.bf16.msra.mxu0 %v3762_v23  ;;  %1757 = vmatprep.mubr.f32.mxu0 %v5418_v29  ;;  %v3836_v50 = vpack.c.bf16 %v2628_v51, %v2627_v45  ;;  %v2633_v23 = vld [vmem:[%s5611_s1 + $0xb70] sm:$0xff]  ;;  %v2656_v11 = vld [vmem:[%s5611_s1 + $0xc28] sm:$0xff]  ;;  %v2666_v51 = vld [vmem:[%s5611_s1 + $0xc78] sm:$0xff] }
  0xf8   : > { %3829 = vmatpush3.bf16.msra.mxu1 %v3828_v24  ;;  %3767 = vmatprep.subr.bf16.mxu0 %v3766_v30  ;;  %v3848_v19 = vpack.c.bf16 %v2634_v61, %v2633_v23  ;;  %v3858_v18 = vpack.c.bf16 %v2656_v11, %v2655_v27  ;;  %v457_v24 = vrot.slane %v5391_v15, 3 }
  0xf9   : > { %3831 = vmatprep.subr.bf16.mxu1 %v3830_v59  ;;  %2008 = vmatmul.mubr.f32.gmra.mrb[44].mxu1 %v5177_v17  ;;  %v489_v17 = vsel %vm468_vm3, %v487_v25, %v488_v16  ;;  %v425_v59 = vrot.slane %v5393_v42, 2 }
  0xfa   : > { %1758 = vmatmul.mubr.f32.gmra.mrb[26].mxu0 %v5443_v41  ;;  %2012 = vmatprep.mubr.f32.mxu1 %v393_v36  ;;  %v2662_v36 = vld [vmem:[%s5611_s1 + $0xc58] sm:$0xff] }
  0xfb   : > { %3769 = vmatpush3.bf16.msra.mxu0 %v3766_v30  ;;  %3358 = vmatprep.mubr.f32.mxu0 %v4626_v58  ;;  %v2584_v58 = vld [vmem:[%s5611_s1 + $0x9e8] sm:$0xff]  ;;  %v458_v30 = vrot.slane %v5393_v42, 3 }
  0xfc   : > { %3833 = vmatpush3.bf16.msra.mxu1 %v3832_v35  ;;  %3771 = vmatprep.subr.bf16.mxu0 %v3770_v44  ;;  %v3778_v5 = vpack.c.bf16 %v2584_v58, %v2583_v62  ;;  %v2664_v35 = vld [vmem:[%s5611_s1 + $0xc68] sm:$0xff] }
  0xfd   : > { %3835 = vmatprep.subr.bf16.mxu1 %v3834_v46  ;;  %2013 = vmatmul.mubr.f32.gmra.mrb[46].mxu1 %v5391_v15  ;;  %v459_v3 = vsel %vm435_vm1, %v457_v24, %v458_v30  ;;  %v2665_v46 = vld [vmem:[%s5611_s1 + $0xc70] sm:$0xff] }
  0xfe   : > { %2082 = vmatprep.mubr.f32.mxu1 %v4480_v20  ;;  %v2586_v20 = vld [vmem:[%s5611_s1 + $0x9f8] sm:$0xff] }
  0xff   : > { %3773 = vmatpush3.bf16.msra.mxu0 %v3770_v44  ;;  %v3782_v0 = vpack.c.bf16 %v2586_v20, %v2585_v8 }
 0x100   : > { %3837 = vmatpush3.bf16.msra.mxu1 %v3836_v50  ;;  %3775 = vmatprep.subr.bf16.mxu0 %v3774_v52 }
 0x101   : > { %3839 = vmatprep.subr.bf16.mxu1 %v3838_v54 }
 0x103   : > { %3777 = vmatpush3.bf16.msra.mxu0 %v3774_v52  ;;  %v3878_v52 = vpack.c.bf16 %v2666_v51, %v2665_v46 }
 0x104   : > { %3841 = vmatpush3.bf16.msra.mxu1 %v3840_v2  ;;  %3779 = vmatprep.subr.bf16.mxu0 %v3778_v5  ;;  %v491_v2 = vrot.slane %v5393_v42, 4 }
 0x105   : > { %3843 = vmatprep.subr.bf16.mxu1 %v3842_v39 }
 0x106   : > { %v492_v10 = vsel %vm468_vm3, %v490_v1, %v491_v2 }
 0x107   : > { %3781 = vmatpush3.bf16.msra.mxu0 %v3778_v5 }
 0x108   : > { %3845 = vmatpush3.bf16.msra.mxu1 %v3844_v12  ;;  %3783 = vmatprep.subr.bf16.mxu0 %v3782_v0 }
 0x109   : > { %3847 = vmatprep.subr.bf16.mxu1 %v3846_v7 }
 0x10b   : > { %3785 = vmatpush3.bf16.msra.mxu0 %v3782_v0 }
 0x10c   : > { %3849 = vmatpush3.bf16.msra.mxu1 %v3848_v19  ;;  %3851 = vmatprep.subr.bf16.mxu0 %v3850_v21 }
 0x10d   : > { %3882 = vmatprep.subr.bf16.mxu1 %v3850_v21 }
 0x10e   : > { %3359 = vmatmul.mubr.f32.vlgmr.msra.gmra.mrb[8].mxu0 %v4658_v13 }
 0x10f   : > { %2083 = vmatmul.mubr.f32.vlgmr.msra.gmra.mrb[48].mxu1 %v4488_v28  ;;  %3853 = vmatpush3.bf16.msra.mxu0 %v3850_v21  ;;  %v2657_v28 = vld [vmem:[%s5611_s1 + $0xc30] sm:$0xff] }
 0x110   : > { %3890 = vmatpush3.bf16.msra.mxu1 %v3850_v21  ;;  %3361 = vmatprep.mubr.f32.mxu0 %v5215_v33  ;;  %v3862_v4 = vpack.c.bf16 %v2658_v43, %v2657_v28 }
 0x111   : > { %2087 = vmatprep.mubr.f32.mxu1 %v5030_v60  ;;  %3855 = vmatprep.subr.bf16.mxu0 %v3854_v26  ;;  %v424_v60 = vrot.slane %v5391_v15, 2 }
 0x112   : > { %3362 = vmatmul.mubr.f32.gmra.mrb[10].mxu0 %v489_v17  ;;  %3883 = vmatprep.subr.bf16.mxu1 %v3854_v26 }
 0x113   : > { %2088 = vmatmul.mubr.f32.gmra.mrb[50].mxu1 %v5051_v56  ;;  %3857 = vmatpush3.bf16.msra.mxu0 %v3854_v26  ;;  %v2660_v56 = vld [vmem:[%s5611_s1 + $0xc48] sm:$0xff] }
 0x114   : > { %3891 = vmatpush3.bf16.msra.mxu1 %v3854_v26  ;;  %2092 = vmatprep.mubr.f32.mxu1 %v5418_v29  ;;  %v426_v29 = vsel %vm402_vm2, %v424_v60, %v425_v59  ;;  %v3866_v34 = vpack.c.bf16 %v2660_v56, %v2659_v37 }
 0x115   : > { %3859 = vmatprep.subr.bf16.mxu0 %v3858_v18  ;;  %3884 = vmatprep.subr.bf16.mxu1 %v3858_v18 }
 0x116   : > { %3396 = vmatprep.mubr.f32.mxu0 %v4658_v13  ;;  %v3870_v13 = vpack.c.bf16 %v2662_v36, %v2661_v40 }
 0x117   : > { %2093 = vmatmul.mubr.f32.gmra.mrb[52].mxu1 %v5443_v41  ;;  %3861 = vmatpush3.bf16.msra.mxu0 %v3858_v18  ;;  %v2663_v41 = vld [vmem:[%s5611_s1 + $0xc60] sm:$0xff] }
 0x118   : > { %3892 = vmatpush3.bf16.msra.mxu1 %v3858_v18  ;;  %2097 = vmatprep.mubr.f32.mxu1 %v459_v3  ;;  %v3874_v44 = vpack.c.bf16 %v2664_v35, %v2663_v41 }
 0x119   : > { %3863 = vmatprep.subr.bf16.mxu0 %v3862_v4  ;;  %3885 = vmatprep.subr.bf16.mxu1 %v3862_v4 }
 0x11b   : > { %2098 = vmatmul.mubr.f32.gmra.mrb[54].mxu1 %v426_v29  ;;  %3865 = vmatpush3.bf16.msra.mxu0 %v3862_v4 }
 0x11c   : > { %3893 = vmatpush3.bf16.msra.mxu1 %v3862_v4  ;;  %3867 = vmatprep.subr.bf16.mxu0 %v3866_v34 }
 0x11d   : > { %3886 = vmatprep.subr.bf16.mxu1 %v3866_v34  ;;  %3399 = vmatprep.mubr.f32.mxu1 %v489_v17 }
 0x11f   : > { %3869 = vmatpush3.bf16.msra.mxu0 %v3866_v34 }
 0x120   : > { %3894 = vmatpush3.bf16.msra.mxu1 %v3866_v34  ;;  %3871 = vmatprep.subr.bf16.mxu0 %v3870_v13 }
 0x121   : > { %v2704_v45 = vpop.f32.mrb[0].mxu0  ;;  %3887 = vmatprep.subr.bf16.mxu1 %v3870_v13 }
 0x122   : > { %v2748_v48 = vpop.f32.mrb[0].mxu1  ;;  %v2705_v47 = vpop.f32.mrb[1].mxu0 }
 0x123   : > { %v2706_v49 = vadd.f32 %v2705_v47, %v2704_v45  ;;  %v2749_v38 = vpop.f32.mrb[1].mxu1  ;;  %3873 = vmatpush3.bf16.msra.mxu0 %v3870_v13 }
 0x124   : > { %v2750_v50 = vadd.f32 %v2749_v38, %v2748_v48  ;;  %3895 = vmatpush3.bf16.msra.mxu1 %v3870_v13  ;;  %3875 = vmatprep.subr.bf16.mxu0 %v3874_v44 }
 0x125   : > { %3888 = vmatprep.subr.bf16.mxu1 %v3874_v44  ;;  %v2707_v53 = vpop.f32.mrb[2].mxu0 }
 0x126   : > { %v814_v54 = vadd.f32 %v2750_v50, %v2706_v49  ;;  %v2751_v57 = vpop.f32.mrb[2].mxu1  ;;  %v2708_v62 = vpop.f32.mrb[3].mxu0 }
 0x127   : > { %3877 = vmatpush3.bf16.msra.mxu0 %v3874_v44  ;;  %v2709_v58 = vadd.f32 %v2708_v62, %v2707_v53  ;;  %v2752_v63 = vpop.f32.mrb[3].mxu1 }
 0x128   : > { %3896 = vmatpush3.bf16.msra.mxu1 %v3874_v44  ;;  %3879 = vmatprep.subr.bf16.mxu0 %v3878_v52  ;;  %v2753_v5 = vadd.f32 %v2752_v63, %v2751_v57 }
 0x129   : > { %3889 = vmatprep.subr.bf16.mxu1 %v3878_v52  ;;  %v2710_v6 = vpop.f32.mrb[4].mxu0 }
 0x12a   : > { %v819_v39 = vadd.f32 %v2753_v5, %v2709_v58  ;;  %v2754_v55 = vpop.f32.mrb[4].mxu1  ;;  %v2711_v8 = vpop.f32.mrb[5].mxu0 }
 0x12b   : > { %3881 = vmatpush3.bf16.msra.mxu0 %v3878_v52  ;;  %v2712_v20 = vadd.f32 %v2711_v8, %v2710_v6  ;;  %v2755_v9 = vpop.f32.mrb[5].mxu1 }
 0x12c   : > { %3897 = vmatpush3.bf16.msra.mxu1 %v3878_v52  ;;  %v2756_v12 = vadd.f32 %v2755_v9, %v2754_v55 }
 0x12d   : > { %v2713_v0 = vpop.f32.mrb[6].mxu0 }
 0x12e   : > { %3397 = vmatmul.mubr.f32.vlgmr.msra.gmra.mrb[8].mxu0 %v5215_v33  ;;  %v824_v23 = vadd.f32 %v2756_v12, %v2712_v20  ;;  %v2757_v15 = vpop.f32.mrb[6].mxu1  ;;  %v2714_v7 = vpop.f32.mrb[7].mxu0  ;;  %v4029_v12 = vmov 0.0  }
 0x12f   : > { %3400 = vmatmul.mubr.f32.vlgmr.msra.gmra.mrb[56].mxu1 %v492_v10  ;;  %v2715_v42 = vadd.f32 %v2714_v7, %v2713_v0  ;;  %v2758_v61 = vpop.f32.mrb[7].mxu1  ;;  %2221 = vst [vmem:[%s4097_s29] sm:$0x3] %v4029_v12  ;;  %2222 = vst [vmem:[%s4097_s29 + $0x10] sm:$0x3] %v4029_v12 }
 0x130   : > { %v2759_v14 = vadd.f32 %v2758_v61, %v2757_v15  ;;  %2223 = vst [vmem:[%s4097_s29 + $0x20] sm:$0x3] %v4029_v12  ;;  %2224 = vst [vmem:[%s4097_s29 + $0x30] sm:$0x3] %v4029_v12 }
 0x131   : > { %2225 = vst [vmem:[%s4097_s29 + $0xa] sm:$0x3f] %v4029_v12  ;;  %2226 = vst [vmem:[%s4097_s29 + $0x1a] sm:$0x3f] %v4029_v12 }
 0x132   : > { %v829_v31 = vadd.f32 %v2759_v14, %v2715_v42  ;;  %2227 = vst [vmem:[%s4097_s29 + $0x2a] sm:$0x3f] %v4029_v12  ;;  %2228 = vst [vmem:[%s4097_s29 + $0x3a] sm:$0x3f] %v4029_v12 }
 0x142   : > { %v2812_v19 = vpop.f32.mrb[8].mxu1 }
 0x143   : > { %v2813_v21 = vpop.f32.mrb[9].mxu1 }
 0x144   : > { %v2814_v32 = vadd.f32 %v2813_v21, %v2812_v19 }
 0x146   : > { %v3904_v22 = vadd.f32 %v2814_v32, %v814_v54  ;;  %v2815_v25 = vpop.f32.mrb[10].mxu1 }
 0x147   : > { %v2816_v16 = vpop.f32.mrb[11].mxu1 }
 0x148   : > { %v2817_v26 = vadd.f32 %v2816_v16, %v2815_v25 }
 0x14a   : > { %v3898_v27 = vadd.f32 %v2817_v26, %v819_v39  ;;  %v2818_v11 = vpop.f32.mrb[12].mxu1 }
 0x14b   : > { %v2819_v17 = vpop.f32.mrb[13].mxu1 }
 0x14c   : > { %v2820_v18 = vadd.f32 %v2819_v17, %v2818_v11 }
 0x14e   : > { %v3917_v33 = vadd.f32 %v2820_v18, %v824_v23  ;;  %v2821_v24 = vpop.f32.mrb[14].mxu1 }
 0x14f   : > { %v2822_v30 = vpop.f32.mrb[15].mxu1 }
 0x150   : > { %v2823_v28 = vadd.f32 %v2822_v30, %v2821_v24 }
 0x152   : > { %v3910_v43 = vadd.f32 %v2823_v28, %v829_v31 }
 0x161   : > { %v2856_v60 = vpop.f32.mrb[12].mxu0 }
 0x162   : > { %v2920_v59 = vpop.f32.mrb[16].mxu1  ;;  %v2857_v3 = vpop.f32.mrb[13].mxu0 }
 0x163   : > { %v2858_v4 = vadd.f32 %v2857_v3, %v2856_v60  ;;  %v2921_v37 = vpop.f32.mrb[17].mxu1 }
 0x164   : > { %v2922_v56 = vadd.f32 %v2921_v37, %v2920_v59 }
 0x165   : > { %v3905_v29 = vadd.f32 %v3904_v22, %v2858_v4  ;;  %v2859_v34 = vpop.f32.mrb[14].mxu0 }
 0x166   : > { %v2860_v40 = vpop.f32.mrb[15].mxu0 }
 0x167   : > { %v2861_v36 = vadd.f32 %v2860_v40, %v2859_v34 }
 0x168   : > { %v2923_v13 = vpop.f32.mrb[18].mxu1 }
 0x169   : > { %v3899_v41 = vadd.f32 %v3898_v27, %v2861_v36  ;;  %v2862_v35 = vpop.f32.mrb[16].mxu0  ;;  %v2924_v44 = vpop.f32.mrb[19].mxu1 }
 0x16a   : > { %v2863_v45 = vpop.f32.mrb[17].mxu0  ;;  %v2925_v46 = vadd.f32 %v2924_v44, %v2923_v13 }
 0x16b   : > { %v2864_v51 = vadd.f32 %v2863_v45, %v2862_v35 }
 0x16c   : > { %v2926_v48 = vpop.f32.mrb[20].mxu1 }
 0x16d   : > { %v3918_v47 = vadd.f32 %v3917_v33, %v2864_v51  ;;  %v2865_v49 = vpop.f32.mrb[18].mxu0  ;;  %v2927_v38 = vpop.f32.mrb[21].mxu1 }
 0x16e   : > { %v2866_v50 = vpop.f32.mrb[19].mxu0  ;;  %v2928_v52 = vadd.f32 %v2927_v38, %v2926_v48 }
 0x16f   : > { %v2867_v53 = vadd.f32 %v2866_v50, %v2865_v49 }
 0x170   : > { %v2929_v54 = vpop.f32.mrb[22].mxu1 }
 0x171   : > { %v3911_v57 = vadd.f32 %v3910_v43, %v2867_v53  ;;  %v2930_v62 = vpop.f32.mrb[23].mxu1 }
 0x172   : > { %v2931_v58 = vadd.f32 %v2930_v62, %v2929_v54 }
 0x182   : > { %v2964_v63 = vpop.f32.mrb[24].mxu1 }
 0x183   : > { %v2965_v1 = vpop.f32.mrb[25].mxu1 }
 0x184   : > { %v2966_v2 = vadd.f32 %v2965_v1, %v2964_v63 }
 0x186   : > { %v1405_v5 = vadd.f32 %v2966_v2, %v2922_v56  ;;  %v2967_v6 = vpop.f32.mrb[26].mxu1 }
 0x187   : > { %v2968_v39 = vpop.f32.mrb[27].mxu1 }
 0x188   : > { %v3906_v55 = vadd.f32 %v3905_v29, %v1405_v5  ;;  %v2969_v8 = vadd.f32 %v2968_v39, %v2967_v6 }
 0x18a   : > { %v1410_v20 = vadd.f32 %v2969_v8, %v2925_v46  ;;  %v2970_v9 = vpop.f32.mrb[28].mxu1 }
 0x18b   : > { %v2971_v10 = vpop.f32.mrb[29].mxu1 }
 0x18c   : > { %v3900_v0 = vadd.f32 %v3899_v41, %v1410_v20  ;;  %v2972_v23 = vadd.f32 %v2971_v10, %v2970_v9 }
 0x18e   : > { %v1415_v15 = vadd.f32 %v2972_v23, %v2928_v52  ;;  %v2973_v7 = vpop.f32.mrb[30].mxu1 }
 0x18f   : > { %v2974_v42 = vpop.f32.mrb[31].mxu1 }
 0x190   : > { %v2975_v61 = vadd.f32 %v2974_v42, %v2973_v7  ;;  %v3919_v14 = vadd.f32 %v3918_v47, %v1415_v15 }
 0x192   : > { %v1420_v31 = vadd.f32 %v2975_v61, %v2931_v58 }
 0x194   : > { %v3912_v19 = vadd.f32 %v3911_v57, %v1420_v31 }
 0x1a2   : > { %v3028_v21 = vpop.f32.mrb[32].mxu1 }
 0x1a3   : > { %v3029_v32 = vpop.f32.mrb[33].mxu1 }
 0x1a4   : > { %v3030_v22 = vadd.f32 %v3029_v32, %v3028_v21 }
 0x1a6   : > { %v3031_v25 = vpop.f32.mrb[34].mxu1 }
 0x1a7   : > { %v3032_v16 = vpop.f32.mrb[35].mxu1 }
 0x1a8   : > { %v3033_v26 = vadd.f32 %v3032_v16, %v3031_v25 }
 0x1aa   : > { %v3034_v27 = vpop.f32.mrb[36].mxu1 }
 0x1ab   : > { %v3035_v11 = vpop.f32.mrb[37].mxu1 }
 0x1ac   : > { %v3036_v17 = vadd.f32 %v3035_v11, %v3034_v27 }
 0x1ae   : > { %v3037_v18 = vpop.f32.mrb[38].mxu1 }
 0x1af   : > { %v3038_v33 = vpop.f32.mrb[39].mxu1 }
 0x1b0   : > { %v3039_v24 = vadd.f32 %v3038_v33, %v3037_v18  ;;  %v2208_v18 = vstv %s2203_s14 }
 0x1c1   : > { %v3072_v30 = vpop.f32.mrb[20].mxu0 }
 0x1c2   : > { %v3136_v28 = vpop.f32.mrb[40].mxu1  ;;  %v3073_v43 = vpop.f32.mrb[21].mxu0 }
 0x1c3   : > { %v3074_v60 = vadd.f32 %v3073_v43, %v3072_v30  ;;  %v3137_v59 = vpop.f32.mrb[41].mxu1 }
 0x1c4   : > { %v3138_v3 = vadd.f32 %v3137_v59, %v3136_v28 }
 0x1c5   : > { %v1745_v4 = vadd.f32 %v3074_v60, %v3030_v22  ;;  %v3075_v37 = vpop.f32.mrb[22].mxu0 }
 0x1c6   : > { %v3076_v56 = vpop.f32.mrb[23].mxu0 }
 0x1c7   : > { %v3077_v29 = vadd.f32 %v3076_v56, %v3075_v37  ;;  %v3907_v34 = vadd.f32 %v3906_v55, %v1745_v4 }
 0x1c8   : > { %v3139_v40 = vpop.f32.mrb[42].mxu1 }
 0x1c9   : > { %v1750_v36 = vadd.f32 %v3077_v29, %v3033_v26  ;;  %v3078_v13 = vpop.f32.mrb[24].mxu0  ;;  %v3140_v41 = vpop.f32.mrb[43].mxu1  ;;  %v2667_v26 = vld [vmem:[%s5612_s2] ss:$0 sm:$0xff] }
 0x1ca   : > { %v3079_v35 = vpop.f32.mrb[25].mxu0  ;;  %v3141_v44 = vadd.f32 %v3140_v41, %v3139_v40 }
 0x1cb   : > { %v3080_v45 = vadd.f32 %v3079_v35, %v3078_v13  ;;  %v3901_v46 = vadd.f32 %v3900_v0, %v1750_v36 }
 0x1cc   : > { %v3142_v51 = vpop.f32.mrb[44].mxu1 }
 0x1cd   : > { %v1755_v48 = vadd.f32 %v3080_v45, %v3036_v17  ;;  %v3081_v47 = vpop.f32.mrb[26].mxu0  ;;  %v3143_v49 = vpop.f32.mrb[45].mxu1 }
 0x1ce   : > { %v3082_v38 = vpop.f32.mrb[27].mxu0  ;;  %v3144_v50 = vadd.f32 %v3143_v49, %v3142_v51 }
 0x1cf   : > { %v3083_v52 = vadd.f32 %v3082_v38, %v3081_v47  ;;  %v3920_v53 = vadd.f32 %v3919_v14, %v1755_v48 }
 0x1d0   : > { %v3145_v54 = vpop.f32.mrb[46].mxu1 }
 0x1d1   : > { %v1760_v57 = vadd.f32 %v3083_v52, %v3039_v24  ;;  %v3146_v62 = vpop.f32.mrb[47].mxu1 }
 0x1d2   : > { %v3147_v58 = vadd.f32 %v3146_v62, %v3145_v54 }
 0x1d3   : > { %v3913_v63 = vadd.f32 %v3912_v19, %v1760_v57 }
 0x1e2   : > { %v3180_v1 = vpop.f32.mrb[48].mxu1 }
 0x1e3   : > { %v3181_v2 = vpop.f32.mrb[49].mxu1 }
 0x1e4   : > { %v3182_v5 = vadd.f32 %v3181_v2, %v3180_v1 }
 0x1e5   : > { %v3363_v6 = vpop.f32.mrb[10].mxu0 }
 0x1e6   : > { %v2085_v39 = vadd.f32 %v3182_v5, %v3138_v3  ;;  %v3914_v55 = vadd.f32 %v3913_v63, %v3363_v6  ;;  %v3183_v8 = vpop.f32.mrb[50].mxu1  ;;  %v1839_v20 = vpop.f32.mrb[11].mxu0 }
 0x1e7   : > { %v3921_v9 = vadd.f32 %v3920_v53, %v1839_v20  ;;  %v3184_v10 = vpop.f32.mrb[51].mxu1 }
 0x1e8   : > { %v3185_v12 = vadd.f32 %v3184_v10, %v3183_v8  ;;  %v3908_v0 = vadd.f32 %v3907_v34, %v2085_v39 }
 0x1ea   : > { %v2090_v23 = vadd.f32 %v3185_v12, %v3141_v44  ;;  %v3186_v15 = vpop.f32.mrb[52].mxu1 }
 0x1eb   : > { %v3187_v7 = vpop.f32.mrb[53].mxu1 }
 0x1ec   : > { %v3188_v42 = vadd.f32 %v3187_v7, %v3186_v15  ;;  %v3902_v61 = vadd.f32 %v3901_v46, %v2090_v23 }
 0x1ee   : > { %v2095_v14 = vadd.f32 %v3188_v42, %v3144_v50  ;;  %v3189_v31 = vpop.f32.mrb[54].mxu1 }
 0x1ef   : > { %v3190_v19 = vpop.f32.mrb[55].mxu1 }
 0x1f0   : > { %v3191_v21 = vadd.f32 %v3190_v19, %v3189_v31  ;;  %v3922_v32 = vadd.f32 %v3921_v9, %v2095_v14 }
 0x1f2   : > { %v2100_v22 = vadd.f32 %v3191_v21, %v3147_v58 }
 0x1f4   : > { %v3915_v25 = vadd.f32 %v3914_v55, %v2100_v22 }
 0x201   : > { %v3398_v16 = vpop.f32.mrb[8].mxu0 }
 0x202   : > { %v3903_v27 = vadd.f32 %v3902_v61, %v3398_v16  ;;  %v3401_v11 = vpop.f32.mrb[56].mxu1  ;;  %v2169_v17 = vpop.f32.mrb[9].mxu0 }
 0x203   : > { %v3916_v33 = vadd.f32 %v3915_v25, %v3401_v11  ;;  %v3909_v24 = vadd.f32 %v3908_v0, %v2169_v17  ;;  %v2179_v30 = vpop.f32.mrb[57].mxu1 }
 0x204   : > { %v2200_v28 = vadd.f32 %v3903_v27, %v2667_v26  ;;  %v3923_v43 = vadd.f32 %v3922_v32, %v2179_v30 }
 0x205   : > { %v2202_v60 = vadd.f32 %v3916_v33, %v2667_v26  ;;  %v2199_v59 = vadd.f32 %v3909_v24, %v2667_v26 }
 0x206   : > { %vm2205_vm4 = vcmp.gt.f32.partialorder %v2200_v28, 0.0  ;;  %v2210_v3 = vmul.f32 %v2208_v18, %v2200_v28  ;;  %v2201_v4 = vadd.f32 %v3923_v43, %v2667_v26 }
 0x207   : > { %vm2207_vm5 = vcmp.gt.f32.partialorder %v2202_v60, 0.0  ;;  %v2212_v37 = vmul.f32 %v2208_v18, %v2202_v60  ;;  %vm2204_vm6 = vcmp.gt.f32.partialorder %v2199_v59, 0.0  ;;  %v2209_v56 = vmul.f32 %v2208_v18, %v2199_v59 }
 0x208   : > { %v2214_v29 = vsel %vm2205_vm4, %v2200_v28, %v2210_v3  ;;  %vm2206_vm7 = vcmp.gt.f32.partialorder %v2201_v4, 0.0  ;;  %v2211_v34 = vmul.f32 %v2208_v18, %v2201_v4 }
 0x209   : > { %2218 = vst [vmem:[%s4097_s29 + $0x12] sm:$0xff] %v2214_v29  ;;  %v2216_v40 = vsel %vm2207_vm5, %v2202_v60, %v2212_v37  ;;  %v2213_v36 = vsel %vm2204_vm6, %v2199_v59, %v2209_v56 }
 0x20a   : > { %2220 = vst [vmem:[%s4097_s29 + $0x32] sm:$0xff] %v2216_v40  ;;  %2217 = vst [vmem:[%s4097_s29 + $0x2] sm:$0xff] %v2213_v36  ;;  %v2215_v13 = vsel %vm2206_vm7, %v2201_v4, %v2211_v34 }
 0x20b   : > { %2219 = vst [vmem:[%s4097_s29 + $0x22] sm:$0xff] %v2215_v13 }
 0x20c PF: > { %s15_s21 = sadd.s32 1, %s4025_s21   ;;  %s5615_s17 = smov %s4017_s19 }
 0x20d   : > { %p12_p8 = scmp.ge.s32.totalorder %s15_s21, 6   ;;  %s5616_s18 = smov %s4021_s20 }
 0x20e   : > { %s5617_s19 = smov %s5620_s3  ;;  %s5618_s20 = smov %s5624_s22 }
 0x20f   :  { %14 = sbr.rel (!%p12_p8) target bundleno = 3 (0x3), region = 159 }
 0x216   :  { %2259 = vsyncmov [#allocation3] }
 0x219   :  { %s2260_s29 = vpop.sfrf %2259 }
 0x21a   :  { %p2670_p9 = scmp.ne.s32.totalorder %s2260_s29, 0 }
 0x21c   :  { %2264 = shalt.err (%p2670_p9)  }

// kernel: down_forward.5
= control target key start
LH: loop header
LB: loop body
LE: loop exit
PB: predicated region body
PF: predicated region fallthrough
CT: control target
= control target key end

     0   :  { %s4185_s20 = smov 0   ;;  %s4187_s21 = smov 0   ;;  %s5754_s0 = inlined_call_operand.vmem [shape: f32[2,8,16,128], index: 0, kind: input, shape index: {}]   ;;  %s5755_s1 = inlined_call_operand.vmem [shape: f32[5,640,128], index: 1, kind: input, shape index: {}]   ;;  %s5756_s2 = inlined_call_operand.vmem [shape: f32[1,128], index: 2, kind: input, shape index: {}]   ;;  %s5757_s3 = inlined_call_operand.<no memory space> [shape: f32[1,1], index: 3, kind: input, shape index: {}]   ;;  %s5758_s4 = inlined_call_operand.vmem [shape: f32[16,16,128], index: 4, kind: input, shape index: {}]   ;;  %s5759_s5 = inlined_call_operand.vmem [shape: f32[16,16,128], index: 5, kind: output, shape index: {}]  }
   0x1   :  { %10 = sst [smem:[#allocation4]] %s5757_s3  ;;  %s4189_s22 = smov 0  }
   0x2   :  { %s4191_s23 = smov 0   ;;  %s4193_s24 = smov 0  }
   0x3 LB: > { %s25_s3 = sadd.s32 1, %s4139_s22  ;;  %s28_s25 = sadd.s32 1, %s4143_s23  ;;  %s4147_s24 = sphi %s4193_s24, %s16_s24   ;;  %s4143_s23 = sphi %s4191_s23, %s5763_s23   ;;  %s4139_s22 = sphi %s4189_s22, %s5762_s22   ;;  %s4135_s21 = sphi %s4187_s21, %s5761_s21   ;;  %s4131_s20 = sphi %s4185_s20, %s5760_s20  }
   0x4   : > { %p26_p0 = scmp.ge.s32.totalorder %s25_s3, 2  ;;  %p2442_p1 = scmp.ge.s32.totalorder %s4147_s24, 1 }
   0x5   : > { %p190_p2 = scmp.lt.s32.totalorder %s4147_s24, 5 }
   0x6   : > { %s5765_s3 = smov (%p26_p0, %s25_s3), 0  ;;  %s5767_s25 = smov (!%p26_p0, %s28_s25), %s4143_s23 }
   0x7   : > { %p191_p3 = pnand %p2442_p1, %p190_p2  ;;  %p30_p4 = scmp.ge.s32.totalorder %s5767_s25, 2 }
   0x8   : > { %s2443_s26 = sshll.u32 (!%p191_p3), %s4135_s21, 1  ;;  %p2451_p6 = scmp.ne.s32.totalorder (!%p191_p3), %s4131_s20, 0 }
   0x9   : > { %s5769_s25 = smov (%p30_p4, %s5767_s25), 0  ;;  %194 = sbr.rel (%p191_p3) target bundleno = 527 (0x20f), region = 36 }
   0xa   : > { %s223_s27 = sadd.s32 (!%p191_p3), %s4131_s20, %s2443_s26 }
   0xb   : > { %s2444_s28 = sshll.u32 (!%p191_p3), %s223_s27, 2 }
   0xc   : > { %p225_p5 = scmp.lt.s32.totalorder (!%p191_p3), %s2444_s28, 15 }
  0x10   : > { %s5771_s28 = smov (!%p225_p5, %s2444_s28), 15  ;;  %247 = sbr.rel (%p2451_p6) target bundleno = 30 (0x1e), region = 40 }
  0x11   : > { %s2792_s29 = sshll.u32 %s5771_s28, 4  ;;  %s2452_s11 = sshll.u32 (!%p2451_p6), %s4135_s21, 7  ;;  %v4149_v0 = vmov (!%p2451_p6), 0.0  }
  0x12   : > { %s4224_s7 = scalar_lea.vmem %s5758_s4, %s2792_s29  ;;  %s4229_s10 = scalar_lea.vmem %s5759_s5, %s2792_s29  ;;  %248 = vst [vmem:[#allocation2] sm:$0xff] (!%p2451_p6), %v4149_v0  ;;  %249 = vst [vmem:[#allocation2 + $0x8] sm:$0xff] (!%p2451_p6), %v4149_v0 }
  0x13   : > { %250 = vst [vmem:[#allocation2 + $0x10] sm:$0xff] (!%p2451_p6), %v4149_v0  ;;  %251 = vst [vmem:[#allocation2 + $0x18] sm:$0xff] (!%p2451_p6), %v4149_v0  ;;  %s253_s14 = scalar_lea.vmem (!%p2451_p6), %s5754_s0, %s2452_s11 }
  0x14   : > { %v287_v1 = vld [vmem:[%s253_s14] sm:$0xff] (!%p2451_p6)  ;;  %v289_v2 = vld [vmem:[%s253_s14 + $0x8] sm:$0xff] (!%p2451_p6)  ;;  %v291_v3 = vld [vmem:[%s253_s14 + $0x10] sm:$0xff] (!%p2451_p6) }
  0x15   : > { %288 = vst [vmem:[#allocation2 + $0x20] sm:$0xff] (!%p2451_p6), %v287_v1  ;;  %290 = vst [vmem:[#allocation2 + $0x28] sm:$0xff] (!%p2451_p6), %v289_v2  ;;  %v293_v4 = vld [vmem:[%s253_s14 + $0x18] sm:$0xff] (!%p2451_p6)  ;;  %v295_v5 = vld [vmem:[%s253_s14 + $0x20] sm:$0xff] (!%p2451_p6) }
  0x16   : > { %292 = vst [vmem:[#allocation2 + $0x30] sm:$0xff] (!%p2451_p6), %v291_v3  ;;  %v297_v6 = vld [vmem:[%s253_s14 + $0x28] sm:$0xff] (!%p2451_p6)  ;;  %294 = vst [vmem:[#allocation2 + $0x38] sm:$0xff] (!%p2451_p6), %v293_v4  ;;  %v299_v7 = vld [vmem:[%s253_s14 + $0x30] sm:$0xff] (!%p2451_p6) }
  0x17   : > { %296 = vst [vmem:[#allocation2 + $0x40] sm:$0xff] %v295_v5  ;;  %298 = vst [vmem:[#allocation2 + $0x48] sm:$0xff] %v297_v6  ;;  %v301_v8 = vld [vmem:[%s253_s14 + $0x38] sm:$0xff]  ;;  %v303_v9 = vld [vmem:[%s253_s14 + $0x40] sm:$0xff] }
  0x18   : > { %300 = vst [vmem:[#allocation2 + $0x50] sm:$0xff] %v299_v7  ;;  %302 = vst [vmem:[#allocation2 + $0x58] sm:$0xff] %v301_v8  ;;  %v305_v10 = vld [vmem:[%s253_s14 + $0x48] sm:$0xff]  ;;  %v307_v11 = vld [vmem:[%s253_s14 + $0x50] sm:$0xff] }
  0x19   : > { %304 = vst [vmem:[#allocation2 + $0x60] sm:$0xff] %v303_v9  ;;  %v309_v12 = vld [vmem:[%s253_s14 + $0x58] sm:$0xff]  ;;  %306 = vst [vmem:[#allocation2 + $0x68] sm:$0xff] %v305_v10 }
  0x1a   : > { %308 = vst [vmem:[#allocation2 + $0x70] sm:$0xff] %v307_v11  ;;  %310 = vst [vmem:[#allocation2 + $0x78] sm:$0xff] %v309_v12 }
  0x1b   : > { %318 = vsyncadd [#allocation3], 1536 }
  0x1c   : > { %4125 = dma.done.wait [#allocation3], 1536 }
  0x1d   : > { %4126 = vsyncadd [#allocation3], 4294965760 }
  0x1e PF: > { %p2453_p7 = scmp.ne.s32.totalorder %s4131_s20, 1 }
  0x1f   : > { %s2454_s15 = sshll.u32 (!%p2453_p7), %s4135_s21, 7  ;;  %v4150_v13 = vmov (!%p2453_p7), 0.0  }
  0x20   : > { %326 = sbr.rel (%p2453_p7) target bundleno = 43 (0x2b), region = 78  ;;  %328 = vst [vmem:[#allocation2 + $0x60] sm:$0xff] (!%p2453_p7), %v4150_v13  ;;  %329 = vst [vmem:[#allocation2 + $0x68] sm:$0xff] (!%p2453_p7), %v4150_v13  ;;  %s2380_s18 = scalar_lea.vmem (!%p2453_p7), %s5754_s0, %s2454_s15 }
  0x21   : > { %330 = vst [vmem:[#allocation2 + $0x70] sm:$0xff] (!%p2453_p7), %v4150_v13  ;;  %331 = vst [vmem:[#allocation2 + $0x78] sm:$0xff] (!%p2453_p7), %v4150_v13  ;;  %v2455_v14 = vld [vmem:[%s2380_s18 + $0x20] sm:$0xff] (!%p2453_p7)  ;;  %v2456_v15 = vld [vmem:[%s2380_s18 + $0x28] sm:$0xff] (!%p2453_p7) }
  0x22   : > { %v2457_v16 = vld [vmem:[%s2380_s18 + $0x30] sm:$0xff] (!%p2453_p7)  ;;  %368 = vst [vmem:[#allocation2] sm:$0xff] (!%p2453_p7), %v2455_v14  ;;  %370 = vst [vmem:[#allocation2 + $0x8] sm:$0xff] (!%p2453_p7), %v2456_v15  ;;  %v2458_v17 = vld [vmem:[%s2380_s18 + $0x38] sm:$0xff] (!%p2453_p7) }
  0x23   : > { %372 = vst [vmem:[#allocation2 + $0x10] sm:$0xff] (!%p2453_p7), %v2457_v16  ;;  %v2459_v18 = vld [vmem:[%s2380_s18 + $0x40] sm:$0xff] (!%p2453_p7)  ;;  %v2460_v19 = vld [vmem:[%s2380_s18 + $0x48] sm:$0xff] (!%p2453_p7)  ;;  %374 = vst [vmem:[#allocation2 + $0x18] sm:$0xff] (!%p2453_p7), %v2458_v17 }
  0x24   : > { %376 = vst [vmem:[#allocation2 + $0x20] sm:$0xff] (!%p2453_p7), %v2459_v18  ;;  %378 = vst [vmem:[#allocation2 + $0x28] sm:$0xff] (!%p2453_p7), %v2460_v19  ;;  %v2461_v20 = vld [vmem:[%s2380_s18 + $0x50] sm:$0xff] (!%p2453_p7)  ;;  %v2462_v21 = vld [vmem:[%s2380_s18 + $0x58] sm:$0xff] (!%p2453_p7) }
  0x25   : > { %v2463_v22 = vld [vmem:[%s2380_s18 + $0x60] sm:$0xff] (!%p2453_p7)  ;;  %380 = vst [vmem:[#allocation2 + $0x30] sm:$0xff] (!%p2453_p7), %v2461_v20  ;;  %382 = vst [vmem:[#allocation2 + $0x38] sm:$0xff] (!%p2453_p7), %v2462_v21  ;;  %v2464_v23 = vld [vmem:[%s2380_s18 + $0x68] sm:$0xff] (!%p2453_p7) }
  0x26   : > { %384 = vst [vmem:[#allocation2 + $0x40] sm:$0xff] (!%p2453_p7), %v2463_v22  ;;  %v2465_v24 = vld [vmem:[%s2380_s18 + $0x70] sm:$0xff] (!%p2453_p7)  ;;  %v2466_v25 = vld [vmem:[%s2380_s18 + $0x78] sm:$0xff] (!%p2453_p7)  ;;  %386 = vst [vmem:[#allocation2 + $0x48] sm:$0xff] (!%p2453_p7), %v2464_v23 }
  0x27   : > { %388 = vst [vmem:[#allocation2 + $0x50] sm:$0xff] %v2465_v24  ;;  %390 = vst [vmem:[#allocation2 + $0x58] sm:$0xff] %v2466_v25 }
  0x28   : > { %398 = vsyncadd [#allocation3], 1536 }
  0x29   : > { %4127 = dma.done.wait [#allocation3], 1536 }
  0x2a   : > { %4128 = vsyncadd [#allocation3], 4294965760 }
  0x2b PF: > { %v2484_v26 = vld [vmem:[%s5755_s1 + $0x300] sm:$0xff]  ;;  %v2485_v27 = vld [vmem:[%s5755_s1 + $0x308] sm:$0xff]  ;;  %v2486_v37 = vld [vmem:[%s5755_s1 + $0x310] sm:$0xff]  ;;  %vm435_vm0 = vcmask 1046528   ;;  %vm501_vm1 = vcmask 1044480   ;;  %vm468_vm2 = vcmask 1045504  }
  0x2c   : > { %v2516_v28 = vld [vmem:[%s5755_s1 + $0x400] sm:$0xff]  ;;  %v3524_v29 = vpack.c.bf16 %v2485_v27, %v2484_v26  ;;  %v2517_v30 = vld [vmem:[%s5755_s1 + $0x408] sm:$0xff]  ;;  %v2487_v39 = vld [vmem:[%s5755_s1 + $0x318] sm:$0xff]  ;;  %vm534_vm3 = vcmask 1043456   ;;  %s2269_s21 = sld [smem:[#allocation4]] }
  0x2d   : > { %v2468_v31 = vld [vmem:[%s5755_s1 + $0x280] sm:$0xff]  ;;  %v2469_v32 = vld [vmem:[%s5755_s1 + $0x288] sm:$0xff]  ;;  %v3556_v33 = vpack.c.bf16 %v2517_v30, %v2516_v28  ;;  %v2518_v40 = vld [vmem:[%s5755_s1 + $0x410] sm:$0xff]  ;;  %v3528_v42 = vpack.c.bf16 %v2487_v39, %v2486_v37 }
  0x2e   : > { %v3526_v34 = vpack.c.bf16 %v2469_v32, %v2468_v31  ;;  %v2500_v35 = vld [vmem:[%s5755_s1 + $0x380] sm:$0xff]  ;;  %v2501_v36 = vld [vmem:[%s5755_s1 + $0x388] sm:$0xff]  ;;  %3525 = vmatprep.subr.bf16.mxu0 %v3524_v29  ;;  %v2519_v41 = vld [vmem:[%s5755_s1 + $0x418] sm:$0xff] }
  0x2f   : > { %v3558_v38 = vpack.c.bf16 %v2501_v36, %v2500_v35  ;;  %3557 = vmatprep.subr.bf16.mxu1 %v3556_v33  ;;  %v3560_v43 = vpack.c.bf16 %v2519_v41, %v2518_v40  ;;  %v2470_v44 = vld [vmem:[%s5755_s1 + $0x290] sm:$0xff]  ;;  %v2471_v45 = vld [vmem:[%s5755_s1 + $0x298] sm:$0xff]  ;;  %v2488_v49 = vld [vmem:[%s5755_s1 + $0x320] sm:$0xff] }
  0x30   : > { %3527 = vmatpush3.bf16.msra.mxu0 %v3526_v34  ;;  %v2502_v46 = vld [vmem:[%s5755_s1 + $0x390] sm:$0xff]  ;;  %v3530_v47 = vpack.c.bf16 %v2471_v45, %v2470_v44  ;;  %v2503_v48 = vld [vmem:[%s5755_s1 + $0x398] sm:$0xff]  ;;  %v2489_v50 = vld [vmem:[%s5755_s1 + $0x328] sm:$0xff] }
  0x31   : > { %3559 = vmatpush3.bf16.msra.mxu1 %v3558_v38  ;;  %3529 = vmatprep.subr.bf16.mxu0 %v3528_v42  ;;  %v3562_v51 = vpack.c.bf16 %v2503_v48, %v2502_v46  ;;  %v3532_v52 = vpack.c.bf16 %v2489_v50, %v2488_v49  ;;  %v2520_v53 = vld [vmem:[%s5755_s1 + $0x420] sm:$0xff]  ;;  %v2521_v54 = vld [vmem:[%s5755_s1 + $0x428] sm:$0xff]  ;;  %v2490_v61 = vld [vmem:[%s5755_s1 + $0x330] sm:$0xff] }
  0x32   : > { %3561 = vmatprep.subr.bf16.mxu1 %v3560_v43  ;;  %v2472_v55 = vld [vmem:[%s5755_s1 + $0x2a0] sm:$0xff]  ;;  %v3564_v56 = vpack.c.bf16 %v2521_v54, %v2520_v53  ;;  %v2473_v57 = vld [vmem:[%s5755_s1 + $0x2a8] sm:$0xff]  ;;  %v2491_v62 = vld [vmem:[%s5755_s1 + $0x338] sm:$0xff] }
  0x33   : > { %v2504_v58 = vld [vmem:[%s5755_s1 + $0x3a0] sm:$0xff]  ;;  %v2505_v59 = vld [vmem:[%s5755_s1 + $0x3a8] sm:$0xff]  ;;  %v3534_v60 = vpack.c.bf16 %v2473_v57, %v2472_v55  ;;  %v2522_v63 = vld [vmem:[%s5755_s1 + $0x430] sm:$0xff]  ;;  %v3536_v1 = vpack.c.bf16 %v2491_v62, %v2490_v61 }
  0x34   : > { %3531 = vmatpush3.bf16.msra.mxu0 %v3530_v47  ;;  %v3566_v0 = vpack.c.bf16 %v2505_v59, %v2504_v58  ;;  %v2523_v2 = vld [vmem:[%s5755_s1 + $0x438] sm:$0xff]  ;;  %v2474_v3 = vld [vmem:[%s5755_s1 + $0x2b0] sm:$0xff]  ;;  %v2492_v8 = vld [vmem:[%s5755_s1 + $0x340] sm:$0xff] }
  0x35   : > { %3563 = vmatpush3.bf16.msra.mxu1 %v3562_v51  ;;  %3533 = vmatprep.subr.bf16.mxu0 %v3532_v52  ;;  %v2475_v4 = vld [vmem:[%s5755_s1 + $0x2b8] sm:$0xff]  ;;  %v3568_v5 = vpack.c.bf16 %v2523_v2, %v2522_v63  ;;  %v2506_v6 = vld [vmem:[%s5755_s1 + $0x3b0] sm:$0xff]  ;;  %v2493_v9 = vld [vmem:[%s5755_s1 + $0x348] sm:$0xff] }
  0x36   : > { %3565 = vmatprep.subr.bf16.mxu1 %v3564_v56  ;;  %v2507_v7 = vld [vmem:[%s5755_s1 + $0x3b8] sm:$0xff]  ;;  %v2524_v10 = vld [vmem:[%s5755_s1 + $0x440] sm:$0xff]  ;;  %v2525_v11 = vld [vmem:[%s5755_s1 + $0x448] sm:$0xff]  ;;  %v3538_v12 = vpack.c.bf16 %v2475_v4, %v2474_v3  ;;  %v3540_v14 = vpack.c.bf16 %v2493_v9, %v2492_v8 }
  0x37   : > { %v3570_v13 = vpack.c.bf16 %v2507_v7, %v2506_v6  ;;  %v2476_v15 = vld [vmem:[%s5755_s1 + $0x2c0] sm:$0xff]  ;;  %v2477_v16 = vld [vmem:[%s5755_s1 + $0x2c8] sm:$0xff]  ;;  %v3572_v18 = vpack.c.bf16 %v2525_v11, %v2524_v10  ;;  %v2494_v20 = vld [vmem:[%s5755_s1 + $0x350] sm:$0xff] }
  0x38   : > { %3535 = vmatpush3.bf16.msra.mxu0 %v3534_v60  ;;  %v2508_v17 = vld [vmem:[%s5755_s1 + $0x3c0] sm:$0xff]  ;;  %v2509_v19 = vld [vmem:[%s5755_s1 + $0x3c8] sm:$0xff]  ;;  %v2495_v21 = vld [vmem:[%s5755_s1 + $0x358] sm:$0xff]  ;;  %v3542_v24 = vpack.c.bf16 %v2477_v16, %v2476_v15 }
  0x39   : > { %3567 = vmatpush3.bf16.msra.mxu1 %v3566_v0  ;;  %3537 = vmatprep.subr.bf16.mxu0 %v3536_v1  ;;  %v2526_v22 = vld [vmem:[%s5755_s1 + $0x450] sm:$0xff]  ;;  %v2527_v23 = vld [vmem:[%s5755_s1 + $0x458] sm:$0xff]  ;;  %v3574_v25 = vpack.c.bf16 %v2509_v19, %v2508_v17  ;;  %v3544_v26 = vpack.c.bf16 %v2495_v21, %v2494_v20  ;;  %v2496_v32 = vld [vmem:[%s5755_s1 + $0x360] sm:$0xff] }
  0x3a   : > { %3569 = vmatprep.subr.bf16.mxu1 %v3568_v5  ;;  %v2478_v27 = vld [vmem:[%s5755_s1 + $0x2d0] sm:$0xff]  ;;  %v2479_v28 = vld [vmem:[%s5755_s1 + $0x2d8] sm:$0xff]  ;;  %v3576_v30 = vpack.c.bf16 %v2527_v23, %v2526_v22  ;;  %v2497_v33 = vld [vmem:[%s5755_s1 + $0x368] sm:$0xff] }
  0x3b   : > { %v2510_v29 = vld [vmem:[%s5755_s1 + $0x3d0] sm:$0xff]  ;;  %v2511_v31 = vld [vmem:[%s5755_s1 + $0x3d8] sm:$0xff]  ;;  %v2528_v34 = vld [vmem:[%s5755_s1 + $0x460] sm:$0xff]  ;;  %v3546_v36 = vpack.c.bf16 %v2479_v28, %v2478_v27  ;;  %v3548_v40 = vpack.c.bf16 %v2497_v33, %v2496_v32 }
  0x3c   : > { %3539 = vmatpush3.bf16.msra.mxu0 %v3538_v12  ;;  %v2529_v35 = vld [vmem:[%s5755_s1 + $0x468] sm:$0xff]  ;;  %v2480_v37 = vld [vmem:[%s5755_s1 + $0x2e0] sm:$0xff]  ;;  %v3578_v39 = vpack.c.bf16 %v2511_v31, %v2510_v29  ;;  %v4406_v42 = vld [vmem:[#allocation2 + $0x10] sm:$0xff] }
  0x3d   : > { %3571 = vmatpush3.bf16.msra.mxu1 %v3570_v13  ;;  %3541 = vmatprep.subr.bf16.mxu0 %v3540_v14  ;;  %v2481_v38 = vld [vmem:[%s5755_s1 + $0x2e8] sm:$0xff]  ;;  %v2512_v41 = vld [vmem:[%s5755_s1 + $0x3e0] sm:$0xff]  ;;  %v4408_v43 = vld [vmem:[#allocation2 + $0x18] sm:$0xff]  ;;  %v3580_v44 = vpack.c.bf16 %v2529_v35, %v2528_v34  ;;  %v439_v48 = vrot.slane %v4406_v42, 1  ;;  %v505_v50 = vrot.slane %v4406_v42, 3  ;;  %v472_v5 = vrot.slane %v4406_v42, 2 }
  0x3e   : > { %3573 = vmatprep.subr.bf16.mxu1 %v3572_v18  ;;  %v2513_v45 = vld [vmem:[%s5755_s1 + $0x3e8] sm:$0xff]  ;;  %v2498_v46 = vld [vmem:[%s5755_s1 + $0x370] sm:$0xff]  ;;  %v2499_v47 = vld [vmem:[%s5755_s1 + $0x378] sm:$0xff]  ;;  %v440_v49 = vrot.slane %v4408_v43, 1  ;;  %v506_v53 = vrot.slane %v4408_v43, 3  ;;  %v3550_v54 = vpack.c.bf16 %v2481_v38, %v2480_v37  ;;  %v473_v6 = vrot.slane %v4408_v43, 2 }
  0x3f   : > { %v2530_v51 = vld [vmem:[%s5755_s1 + $0x470] sm:$0xff]  ;;  %v2531_v52 = vld [vmem:[%s5755_s1 + $0x478] sm:$0xff]  ;;  %v3582_v56 = vpack.c.bf16 %v2513_v45, %v2512_v41  ;;  %v3552_v57 = vpack.c.bf16 %v2499_v47, %v2498_v46  ;;  %v2532_v0 = vld [vmem:[%s5755_s1 + $0x480] sm:$0xff] }
  0x40   : > { %3543 = vmatpush3.bf16.msra.mxu0 %v3542_v24  ;;  %v4430_v55 = vsel %vm435_vm0, %v439_v48, %v440_v49  ;;  %v2482_v58 = vld [vmem:[%s5755_s1 + $0x2f0] sm:$0xff]  ;;  %v2483_v59 = vld [vmem:[%s5755_s1 + $0x2f8] sm:$0xff]  ;;  %v4442_v61 = vsel %vm501_vm1, %v505_v50, %v506_v53  ;;  %v3584_v62 = vpack.c.bf16 %v2531_v52, %v2530_v51  ;;  %v2533_v1 = vld [vmem:[%s5755_s1 + $0x488] sm:$0xff]  ;;  %v4495_v19 = vsel %vm468_vm2, %v472_v5, %v473_v6 }
  0x41   : > { %3575 = vmatpush3.bf16.msra.mxu1 %v3574_v25  ;;  %3545 = vmatprep.subr.bf16.mxu0 %v3544_v26  ;;  %v2514_v60 = vld [vmem:[%s5755_s1 + $0x3f0] sm:$0xff]  ;;  %v2515_v63 = vld [vmem:[%s5755_s1 + $0x3f8] sm:$0xff]  ;;  %v583_v2 = vld [vmem:[%s5755_s1 + $0x80] sm:$0xff]  ;;  %v3554_v4 = vpack.c.bf16 %v2483_v59, %v2482_v58  ;;  %v3588_v9 = vpack.c.bf16 %v2533_v1, %v2532_v0 }
  0x42   : > { %3577 = vmatprep.subr.bf16.mxu1 %v3576_v30  ;;  %792 = vmatprep.mubr.f32.mxu0 %v4430_v55  ;;  %v584_v3 = vld [vmem:[%s5755_s1 + $0x88] sm:$0xff]  ;;  %v567_v7 = vld [vmem:[%s5755_s1] sm:$0xff]  ;;  %v3586_v8 = vpack.c.bf16 %v2515_v63, %v2514_v60  ;;  %v2534_v11 = vld [vmem:[%s5755_s1 + $0x490] sm:$0xff] }
  0x43   : > { %877 = vmatprep.mubr.f32.mxu1 %v4442_v61  ;;  %v568_v10 = vld [vmem:[%s5755_s1 + $0x8] sm:$0xff]  ;;  %v2535_v12 = vld [vmem:[%s5755_s1 + $0x498] sm:$0xff]  ;;  %v3620_v13 = vpack.c.bf16 %v584_v3, %v583_v2  ;;  %v585_v14 = vld [vmem:[%s5755_s1 + $0x90] sm:$0xff] }
  0x44   : > { %3547 = vmatpush3.bf16.msra.mxu0 %v3546_v36  ;;  %v586_v15 = vld [vmem:[%s5755_s1 + $0x98] sm:$0xff]  ;;  %v4484_v16 = vld [vmem:[%s5755_s1 + $0x10] sm:$0xff]  ;;  %v2536_v18 = vld [vmem:[%s5755_s1 + $0x4a0] sm:$0xff]  ;;  %v3622_v20 = vpack.c.bf16 %v568_v10, %v567_v7  ;;  %v3592_v21 = vpack.c.bf16 %v2535_v12, %v2534_v11 }
  0x45   : > { %3579 = vmatpush3.bf16.msra.mxu1 %v3578_v39  ;;  %3549 = vmatprep.subr.bf16.mxu0 %v3548_v40  ;;  %v4489_v17 = vld [vmem:[%s5755_s1 + $0x18] sm:$0xff]  ;;  %v2537_v22 = vld [vmem:[%s5755_s1 + $0x4a8] sm:$0xff]  ;;  %v4500_v23 = vld [vmem:[#allocation2 + $0x20] sm:$0xff]  ;;  %v3624_v29 = vpack.c.bf16 %v586_v15, %v585_v14 }
  0x46   : > { %3581 = vmatprep.subr.bf16.mxu1 %v3580_v44  ;;  %v4502_v24 = vld [vmem:[#allocation2 + $0x28] sm:$0xff]  ;;  %v442_v25 = vrot.slane %v4500_v23, 1  ;;  %v508_v27 = vrot.slane %v4500_v23, 3  ;;  %v587_v30 = vld [vmem:[%s5755_s1 + $0xa0] sm:$0xff]  ;;  %v475_v31 = vrot.slane %v4500_v23, 2  ;;  %v3626_v33 = vpack.c.bf16 %v4489_v17, %v4484_v16  ;;  %v4522_v37 = vld [vmem:[#allocation2 + $0x30] sm:$0xff] }
  0x47   : > { %v443_v26 = vrot.slane %v4502_v24, 1  ;;  %v509_v28 = vrot.slane %v4502_v24, 3  ;;  %v476_v32 = vrot.slane %v4502_v24, 2  ;;  %v3596_v34 = vpack.c.bf16 %v2537_v22, %v2536_v18  ;;  %v588_v35 = vld [vmem:[%s5755_s1 + $0xa8] sm:$0xff]  ;;  %v4524_v38 = vld [vmem:[#allocation2 + $0x38] sm:$0xff]  ;;  %v571_v45 = vld [vmem:[%s5755_s1 + $0x20] sm:$0xff] }
  0x48   : > { %3551 = vmatpush3.bf16.msra.mxu0 %v3550_v54  ;;  %v445_v40 = vrot.slane %v4522_v37, 1  ;;  %v446_v41 = vrot.slane %v4524_v38, 1  ;;  %v511_v44 = vrot.slane %v4522_v37, 3  ;;  %v572_v46 = vld [vmem:[%s5755_s1 + $0x28] sm:$0xff]  ;;  %v512_v48 = vrot.slane %v4524_v38, 3  ;;  %v4545_v51 = vld [vmem:[#allocation2 + $0x40] sm:$0xff] }
  0x49   : > { %3583 = vmatpush3.bf16.msra.mxu1 %v3582_v56  ;;  %3553 = vmatprep.subr.bf16.mxu0 %v3552_v57  ;;  %v4520_v36 = vsel %vm435_vm0, %v442_v25, %v443_v26  ;;  %v4528_v39 = vsel %vm501_vm1, %v508_v27, %v509_v28  ;;  %v4540_v47 = vsel %vm468_vm2, %v475_v31, %v476_v32  ;;  %v478_v49 = vrot.slane %v4522_v37, 2  ;;  %v2538_v53 = vld [vmem:[%s5755_s1 + $0x4b0] sm:$0xff]  ;;  %v2539_v54 = vld [vmem:[%s5755_s1 + $0x4b8] sm:$0xff]  ;;  %v4554_v56 = vld [vmem:[#allocation2 + $0x48] sm:$0xff] }
  0x4a   : > { %3585 = vmatprep.subr.bf16.mxu1 %v3584_v62  ;;  %v479_v50 = vrot.slane %v4524_v38, 2  ;;  %v3628_v52 = vpack.c.bf16 %v588_v35, %v587_v30  ;;  %v589_v57 = vld [vmem:[%s5755_s1 + $0xb0] sm:$0xff]  ;;  %v590_v58 = vld [vmem:[%s5755_s1 + $0xb8] sm:$0xff]  ;;  %v4565_v59 = vsel %vm435_vm0, %v445_v40, %v446_v41  ;;  %v448_v60 = vrot.slane %v4545_v51, 1  ;;  %v4575_v3 = vld [vmem:[#allocation2] sm:$0xff] }
  0x4b   : > { %v449_v62 = vrot.slane %v4554_v56, 1  ;;  %v3630_v63 = vpack.c.bf16 %v572_v46, %v571_v45  ;;  %v4571_v0 = vsel %vm501_vm1, %v511_v44, %v512_v48  ;;  %v514_v1 = vrot.slane %v4545_v51, 3  ;;  %v573_v6 = vld [vmem:[%s5755_s1 + $0x30] sm:$0xff]  ;;  %v574_v11 = vld [vmem:[%s5755_s1 + $0x38] sm:$0xff]  ;;  %v2540_v12 = vld [vmem:[%s5755_s1 + $0x4c0] sm:$0xff] }
  0x4c   : > { %3555 = vmatpush3.bf16.msra.mxu0 %v3554_v4  ;;  %v515_v2 = vrot.slane %v4554_v56, 3  ;;  %v4577_v4 = vld [vmem:[#allocation2 + $0x8] sm:$0xff]  ;;  %v3600_v5 = vpack.c.bf16 %v2539_v54, %v2538_v53  ;;  %v4583_v7 = vsel %vm468_vm2, %v478_v49, %v479_v50  ;;  %v3632_v10 = vpack.c.bf16 %v590_v58, %v589_v57  ;;  %v591_v14 = vld [vmem:[%s5755_s1 + $0xc0] sm:$0xff]  ;;  %v2543_v31 = vld [vmem:[%s5755_s1 + $0x4d8] sm:$0xff] }
  0x4d   : > { %3587 = vmatpush3.bf16.msra.mxu1 %v3586_v8  ;;  %3589 = vmatprep.subr.bf16.mxu0 %v3588_v9  ;;  %v481_v8 = vrot.slane %v4545_v51, 2  ;;  %v592_v15 = vld [vmem:[%s5755_s1 + $0xc8] sm:$0xff]  ;;  %v4606_v16 = vsel %vm435_vm0, %v448_v60, %v449_v62  ;;  %v436_v17 = vrot.slane %v4575_v3, 1  ;;  %v437_v18 = vrot.slane %v4577_v4, 1  ;;  %v575_v27 = vld [vmem:[%s5755_s1 + $0x40] sm:$0xff]  ;;  %v593_v32 = vld [vmem:[%s5755_s1 + $0xd0] sm:$0xff] }
  0x4e   : > { %3621 = vmatprep.subr.bf16.mxu1 %v3620_v13  ;;  %v2541_v13 = vld [vmem:[%s5755_s1 + $0x4c8] sm:$0xff]  ;;  %v539_v22 = vrot.slane %v4408_v43, 4  ;;  %v3634_v25 = vpack.c.bf16 %v574_v11, %v573_v6  ;;  %v2542_v43 = vld [vmem:[%s5755_s1 + $0x4d0] sm:$0xff]  ;;  %v578_v46 = vld [vmem:[%s5755_s1 + $0x58] sm:$0xff] }
  0x4f   : > { %793 = vmatmul.mubr.f32.vlgmr.msra.gmra.mrb[0].mxu0 %v4406_v42  ;;  %v3604_v26 = vpack.c.bf16 %v2541_v13, %v2540_v12  ;;  %v576_v30 = vld [vmem:[%s5755_s1 + $0x48] sm:$0xff]  ;;  %v3608_v41 = vpack.c.bf16 %v2543_v31, %v2542_v43  ;;  %v577_v44 = vld [vmem:[%s5755_s1 + $0x50] sm:$0xff]  ;;  %v2544_v48 = vld [vmem:[%s5755_s1 + $0x4e0] sm:$0xff] }
  0x50   : > { %878 = vmatmul.mubr.f32.vlgmr.msra.gmra.mrb[0].mxu1 %v4495_v19  ;;  %3591 = vmatpush3.bf16.msra.mxu0 %v3588_v9  ;;  %v482_v9 = vrot.slane %v4554_v56, 2  ;;  %v3638_v40 = vpack.c.bf16 %v576_v30, %v575_v27  ;;  %v2545_v49 = vld [vmem:[%s5755_s1 + $0x4e8] sm:$0xff]  ;;  %v595_v50 = vld [vmem:[%s5755_s1 + $0xe0] sm:$0xff]  ;;  %v3642_v53 = vpack.c.bf16 %v578_v46, %v577_v44  ;;  %v2546_v62 = vld [vmem:[%s5755_s1 + $0x4f0] sm:$0xff] }
  0x51   : > { %3623 = vmatpush3.bf16.msra.mxu1 %v3622_v20  ;;  %3593 = vmatprep.subr.bf16.mxu0 %v3592_v21  ;;  %v4612_v20 = vsel %vm501_vm1, %v514_v1, %v515_v2  ;;  %v3612_v54 = vpack.c.bf16 %v2545_v49, %v2544_v48  ;;  %v579_v57 = vld [vmem:[%s5755_s1 + $0x60] sm:$0xff]  ;;  %v580_v60 = vld [vmem:[%s5755_s1 + $0x68] sm:$0xff]  ;;  %v597_v1 = vld [vmem:[%s5755_s1 + $0xf0] sm:$0xff] }
  0x52   : > { %3625 = vmatprep.subr.bf16.mxu1 %v3624_v29  ;;  %797 = vmatprep.mubr.f32.mxu0 %v4520_v36  ;;  %v4620_v28 = vsel %vm468_vm2, %v481_v8, %v482_v9  ;;  %v3636_v29 = vpack.c.bf16 %v592_v15, %v591_v14  ;;  %v598_v2 = vld [vmem:[%s5755_s1 + $0xf8] sm:$0xff]  ;;  %v581_v8 = vld [vmem:[%s5755_s1 + $0x70] sm:$0xff]  ;;  %v615_v11 = vld [vmem:[%s5755_s1 + $0x180] sm:$0xff]  ;;  %v541_v15 = vrot.slane %v4500_v23, 4 }
  0x53   : > { %882 = vmatprep.mubr.f32.mxu1 %v4528_v39  ;;  %798 = vmatmul.mubr.f32.gmra.mrb[2].mxu0 %v4500_v23  ;;  %v3648_v9 = vpack.c.bf16 %v598_v2, %v597_v1  ;;  %v616_v12 = vld [vmem:[%s5755_s1 + $0x188] sm:$0xff]  ;;  %v2564_v13 = vld [vmem:[%s5755_s1 + $0x580] sm:$0xff]  ;;  %v618_v30 = vld [vmem:[%s5755_s1 + $0x198] sm:$0xff] }
  0x54   : > { %3595 = vmatpush3.bf16.msra.mxu0 %v3592_v21  ;;  %883 = vmatmul.mubr.f32.gmra.mrb[2].mxu1 %v4540_v47  ;;  %v538_v21 = vrot.slane %v4406_v42, 4  ;;  %v2565_v14 = vld [vmem:[%s5755_s1 + $0x588] sm:$0xff]  ;;  %v2548_v27 = vld [vmem:[%s5755_s1 + $0x500] sm:$0xff]  ;;  %v2566_v43 = vld [vmem:[%s5755_s1 + $0x590] sm:$0xff] }
  0x55   : > { %3627 = vmatpush3.bf16.msra.mxu1 %v3626_v33  ;;  %3597 = vmatprep.subr.bf16.mxu0 %v3596_v34  ;;  %v594_v33 = vld [vmem:[%s5755_s1 + $0xd8] sm:$0xff]  ;;  %v601_v44 = vld [vmem:[%s5755_s1 + $0x110] sm:$0xff]  ;;  %v603_v1 = vld [vmem:[%s5755_s1 + $0x120] sm:$0xff] }
  0x56   : > { %3629 = vmatprep.subr.bf16.mxu1 %v3628_v52  ;;  %802 = vmatprep.mubr.f32.mxu0 %v4565_v59  ;;  %v4643_v35 = vsel %vm534_vm3, %v538_v21, %v539_v22  ;;  %v3640_v45 = vpack.c.bf16 %v594_v33, %v593_v32  ;;  %v596_v52 = vld [vmem:[%s5755_s1 + $0xe8] sm:$0xff]  ;;  %v3652_v21 = vpack.c.bf16 %v616_v12, %v615_v11  ;;  %v599_v22 = vld [vmem:[%s5755_s1 + $0x100] sm:$0xff]  ;;  %v2567_v31 = vld [vmem:[%s5755_s1 + $0x598] sm:$0xff] }
  0x57   : > { %887 = vmatprep.mubr.f32.mxu1 %v4571_v0  ;;  %803 = vmatmul.mubr.f32.gmra.mrb[4].mxu0 %v4522_v37  ;;  %v3644_v58 = vpack.c.bf16 %v596_v52, %v595_v50  ;;  %v3720_v48 = vpack.c.bf16 %v2567_v31, %v2566_v43  ;;  %v2550_v49 = vld [vmem:[%s5755_s1 + $0x510] sm:$0xff]  ;;  %v619_v50 = vld [vmem:[%s5755_s1 + $0x1a0] sm:$0xff]  ;;  %v620_v52 = vld [vmem:[%s5755_s1 + $0x1a8] sm:$0xff] }
  0x58   : > { %3599 = vmatpush3.bf16.msra.mxu0 %v3596_v34  ;;  %888 = vmatmul.mubr.f32.gmra.mrb[4].mxu1 %v4583_v7  ;;  %v438_v34 = vsel %vm435_vm0, %v436_v17, %v437_v18  ;;  %v542_v17 = vrot.slane %v4502_v24, 4  ;;  %v2549_v24 = vld [vmem:[%s5755_s1 + $0x508] sm:$0xff]  ;;  %v2571_v11 = vld [vmem:[%s5755_s1 + $0x5b8] sm:$0xff] }
  0x59   : > { %3631 = vmatpush3.bf16.msra.mxu1 %v3630_v63  ;;  %3601 = vmatprep.subr.bf16.mxu0 %v3600_v5  ;;  %v2547_v63 = vld [vmem:[%s5755_s1 + $0x4f8] sm:$0xff]  ;;  %v604_v2 = vld [vmem:[%s5755_s1 + $0x128] sm:$0xff] }
  0x5a   : > { %3633 = vmatprep.subr.bf16.mxu1 %v3632_v10  ;;  %807 = vmatprep.mubr.f32.mxu0 %v4606_v16  ;;  %v3616_v6 = vpack.c.bf16 %v2547_v63, %v2546_v62  ;;  %v582_v10 = vld [vmem:[%s5755_s1 + $0x78] sm:$0xff]  ;;  %v4727_v32 = vsel %vm534_vm3, %v541_v15, %v542_v17  ;;  %v548_v62 = vrot.slane %v4554_v56, 4  ;;  %v2552_v56 = vld [vmem:[%s5755_s1 + $0x520] sm:$0xff]  ;;  %v3662_v12 = vpack.c.bf16 %v604_v2, %v603_v1 }
  0x5b   : > { %892 = vmatprep.mubr.f32.mxu1 %v4612_v20  ;;  %808 = vmatmul.mubr.f32.gmra.mrb[6].mxu0 %v4545_v51  ;;  %v3650_v18 = vpack.c.bf16 %v582_v10, %v581_v8  ;;  %v621_v8 = vld [vmem:[%s5755_s1 + $0x1b0] sm:$0xff]  ;;  %v503_v15 = vrot.slane %v4577_v4, 3  ;;  %v2559_v1 = vld [vmem:[%s5755_s1 + $0x558] sm:$0xff]  ;;  %v627_v2 = vld [vmem:[%s5755_s1 + $0x1e0] sm:$0xff] }
  0x5c   : > { %3603 = vmatpush3.bf16.msra.mxu0 %v3600_v5  ;;  %893 = vmatmul.mubr.f32.gmra.mrb[6].mxu1 %v4620_v28  ;;  %v3646_v5 = vpack.c.bf16 %v580_v60, %v579_v57  ;;  %v547_v60 = vrot.slane %v4545_v51, 4  ;;  %v2570_v10 = vld [vmem:[%s5755_s1 + $0x5b0] sm:$0xff] }
  0x5d   : > { %3635 = vmatpush3.bf16.msra.mxu1 %v3634_v25  ;;  %3605 = vmatprep.subr.bf16.mxu0 %v3604_v26  ;;  %v600_v25 = vld [vmem:[%s5755_s1 + $0x108] sm:$0xff] }
  0x5e   : > { %3637 = vmatprep.subr.bf16.mxu1 %v3636_v29  ;;  %1047 = vmatprep.mubr.f32.mxu1 %v438_v34  ;;  %v617_v29 = vld [vmem:[%s5755_s1 + $0x190] sm:$0xff]  ;;  %v3654_v33 = vpack.c.bf16 %v600_v25, %v599_v22  ;;  %v544_v34 = vrot.slane %v4522_v37, 4  ;;  %v3728_v25 = vpack.c.bf16 %v2571_v11, %v2570_v10  ;;  %v611_v10 = vld [vmem:[%s5755_s1 + $0x160] sm:$0xff] }
  0x5f   : > { %3366 = vmatprep.mubr.f32.mxu0 %v4643_v35  ;;  %v3656_v46 = vpack.c.bf16 %v618_v30, %v617_v29  ;;  %v2572_v29 = vld [vmem:[%s5755_s1 + $0x5c0] sm:$0xff]  ;;  %v2573_v30 = vld [vmem:[%s5755_s1 + $0x5c8] sm:$0xff] }
  0x60   : > { %3607 = vmatpush3.bf16.msra.mxu0 %v3604_v26  ;;  %v3716_v26 = vpack.c.bf16 %v2565_v14, %v2564_v13  ;;  %v4790_v13 = vsel %vm534_vm3, %v547_v60, %v548_v62  ;;  %v502_v14 = vrot.slane %v4575_v3, 3  ;;  %v610_v60 = vld [vmem:[%s5755_s1 + $0x158] sm:$0xff]  ;;  %v2558_v62 = vld [vmem:[%s5755_s1 + $0x550] sm:$0xff]  ;;  %v2560_v11 = vld [vmem:[%s5755_s1 + $0x560] sm:$0xff] }
  0x61   : > { %3639 = vmatpush3.bf16.msra.mxu1 %v3638_v40  ;;  %3609 = vmatprep.subr.bf16.mxu0 %v3608_v41  ;;  %v545_v40 = vrot.slane %v4524_v38, 4  ;;  %v2551_v38 = vld [vmem:[%s5755_s1 + $0x518] sm:$0xff] }
  0x62   : > { %3641 = vmatprep.subr.bf16.mxu1 %v3640_v45  ;;  %v602_v45 = vld [vmem:[%s5755_s1 + $0x118] sm:$0xff]  ;;  %v3722_v63 = vpack.c.bf16 %v2551_v38, %v2550_v49  ;;  %v504_v31 = vsel %vm501_vm1, %v502_v14, %v503_v15  ;;  %v2574_v38 = vld [vmem:[%s5755_s1 + $0x5d0] sm:$0xff]  ;;  %v2561_v14 = vld [vmem:[%s5755_s1 + $0x568] sm:$0xff] }
  0x63   : > { %v3658_v57 = vpack.c.bf16 %v602_v45, %v601_v44  ;;  %v2556_v44 = vld [vmem:[%s5755_s1 + $0x540] sm:$0xff]  ;;  %v3732_v45 = vpack.c.bf16 %v2573_v30, %v2572_v29  ;;  %v626_v49 = vld [vmem:[%s5755_s1 + $0x1d8] sm:$0xff]  ;;  %v629_v15 = vld [vmem:[%s5755_s1 + $0x1f0] sm:$0xff] }
  0x64   : > { %3611 = vmatpush3.bf16.msra.mxu0 %v3608_v41  ;;  %v3718_v41 = vpack.c.bf16 %v2549_v24, %v2548_v27  ;;  %v623_v27 = vld [vmem:[%s5755_s1 + $0x1c0] sm:$0xff]  ;;  %v624_v24 = vld [vmem:[%s5755_s1 + $0x1c8] sm:$0xff]  ;;  %v2563_v30 = vld [vmem:[%s5755_s1 + $0x578] sm:$0xff] }
  0x65   : > { %3643 = vmatpush3.bf16.msra.mxu1 %v3642_v53  ;;  %3613 = vmatprep.subr.bf16.mxu0 %v3612_v54  ;;  %v2568_v53 = vld [vmem:[%s5755_s1 + $0x5a0] sm:$0xff] }
  0x66   : > { %3645 = vmatprep.subr.bf16.mxu1 %v3644_v58  ;;  %v4758_v58 = vsel %vm534_vm3, %v544_v34, %v545_v40  ;;  %v3668_v34 = vpack.c.bf16 %v624_v24, %v623_v27  ;;  %v607_v40 = vld [vmem:[%s5755_s1 + $0x140] sm:$0xff]  ;;  %v614_v27 = vld [vmem:[%s5755_s1 + $0x178] sm:$0xff]  ;;  %v2562_v24 = vld [vmem:[%s5755_s1 + $0x570] sm:$0xff] }
  0x68   : > { %3615 = vmatpush3.bf16.msra.mxu0 %v3612_v54  ;;  %v2569_v54 = vld [vmem:[%s5755_s1 + $0x5a8] sm:$0xff] }
  0x69   : > { %3647 = vmatpush3.bf16.msra.mxu1 %v3646_v5  ;;  %3617 = vmatprep.subr.bf16.mxu0 %v3616_v6  ;;  %v3660_v5 = vpack.c.bf16 %v620_v52, %v619_v50  ;;  %v2575_v50 = vld [vmem:[%s5755_s1 + $0x5d8] sm:$0xff] }
  0x6a   : > { %3649 = vmatprep.subr.bf16.mxu1 %v3648_v9  ;;  %v622_v9 = vld [vmem:[%s5755_s1 + $0x1b8] sm:$0xff] }
  0x6b   : > { %v3664_v22 = vpack.c.bf16 %v622_v9, %v621_v8  ;;  %v3738_v8 = vpack.c.bf16 %v2559_v1, %v2558_v62  ;;  %v2582_v62 = vld [vmem:[%s5755_s1 + $0x610] sm:$0xff] }
  0x6c   : > { %3619 = vmatpush3.bf16.msra.mxu0 %v3616_v6  ;;  %v3724_v6 = vpack.c.bf16 %v2569_v54, %v2568_v53 }
  0x6d   : > { %3651 = vmatpush3.bf16.msra.mxu1 %v3650_v18  ;;  %3653 = vmatprep.subr.bf16.mxu0 %v3652_v21  ;;  %v605_v18 = vld [vmem:[%s5755_s1 + $0x130] sm:$0xff] }
  0x6e   : > { %3717 = vmatprep.subr.bf16.mxu1 %v3716_v26  ;;  %v2554_v21 = vld [vmem:[%s5755_s1 + $0x530] sm:$0xff]  ;;  %v2555_v26 = vld [vmem:[%s5755_s1 + $0x538] sm:$0xff] }
  0x6f   : > { %3367 = vmatmul.mubr.f32.vlgmr.msra.gmra.mrb[8].mxu0 %v4727_v32 }
  0x70   : > { %1048 = vmatmul.mubr.f32.vlgmr.msra.gmra.mrb[8].mxu1 %v4575_v3  ;;  %3655 = vmatpush3.bf16.msra.mxu0 %v3654_v33  ;;  %v3730_v33 = vpack.c.bf16 %v2555_v26, %v2554_v21  ;;  %v613_v26 = vld [vmem:[%s5755_s1 + $0x170] sm:$0xff] }
  0x71   : > { %3719 = vmatpush3.bf16.msra.mxu1 %v3718_v41  ;;  %1052 = vmatprep.mubr.f32.mxu1 %v4430_v55  ;;  %v2553_v55 = vld [vmem:[%s5755_s1 + $0x528] sm:$0xff] }
  0x72   : > { %3657 = vmatprep.subr.bf16.mxu0 %v3656_v46  ;;  %3721 = vmatprep.subr.bf16.mxu1 %v3720_v48  ;;  %v3726_v17 = vpack.c.bf16 %v2553_v55, %v2552_v56  ;;  %v608_v41 = vld [vmem:[%s5755_s1 + $0x148] sm:$0xff]  ;;  %v625_v48 = vld [vmem:[%s5755_s1 + $0x1d0] sm:$0xff] }
  0x73   : > { %3369 = vmatprep.mubr.f32.mxu0 %v4758_v58  ;;  %v2557_v46 = vld [vmem:[%s5755_s1 + $0x548] sm:$0xff]  ;;  %v3670_v52 = vpack.c.bf16 %v608_v41, %v607_v40  ;;  %v3672_v54 = vpack.c.bf16 %v626_v49, %v625_v48  ;;  %v3682_v40 = vpack.c.bf16 %v614_v27, %v613_v26  ;;  %v469_v41 = vrot.slane %v4575_v3, 2  ;;  %v2580_v49 = vld [vmem:[%s5755_s1 + $0x600] sm:$0xff] }
  0x74   : > { %1053 = vmatmul.mubr.f32.gmra.mrb[10].mxu1 %v4406_v42  ;;  %3659 = vmatpush3.bf16.msra.mxu0 %v3658_v57  ;;  %v606_v42 = vld [vmem:[%s5755_s1 + $0x138] sm:$0xff]  ;;  %v3734_v53 = vpack.c.bf16 %v2557_v46, %v2556_v44  ;;  %v609_v57 = vld [vmem:[%s5755_s1 + $0x150] sm:$0xff]  ;;  %v2577_v56 = vld [vmem:[%s5755_s1 + $0x5e8] sm:$0xff]  ;;  %v470_v44 = vrot.slane %v4577_v4, 2  ;;  %v536_v26 = vrot.slane %v4577_v4, 4 }
  0x75   : > { %3723 = vmatpush3.bf16.msra.mxu1 %v3722_v63  ;;  %1057 = vmatprep.mubr.f32.mxu1 %v4520_v36  ;;  %v3666_v43 = vpack.c.bf16 %v606_v42, %v605_v18  ;;  %v3736_v63 = vpack.c.bf16 %v2575_v50, %v2574_v38  ;;  %v3674_v55 = vpack.c.bf16 %v610_v60, %v609_v57  ;;  %v2578_v18 = vld [vmem:[%s5755_s1 + $0x5f0] sm:$0xff]  ;;  %v2579_v42 = vld [vmem:[%s5755_s1 + $0x5f8] sm:$0xff]  ;;  %v2581_v38 = vld [vmem:[%s5755_s1 + $0x608] sm:$0xff] }
  0x76   : > { %3661 = vmatprep.subr.bf16.mxu0 %v3660_v5  ;;  %3725 = vmatprep.subr.bf16.mxu1 %v3724_v6  ;;  %v628_v5 = vld [vmem:[%s5755_s1 + $0x1e8] sm:$0xff]  ;;  %v2576_v6 = vld [vmem:[%s5755_s1 + $0x5e0] sm:$0xff]  ;;  %v3744_v29 = vpack.c.bf16 %v2579_v42, %v2578_v18  ;;  %v633_v50 = vld [vmem:[%s5755_s1 + $0x210] sm:$0xff]  ;;  %v471_v57 = vsel %vm468_vm2, %v469_v41, %v470_v44  ;;  %v3750_v60 = vpack.c.bf16 %v2581_v38, %v2580_v49 }
  0x77   : > { %3370 = vmatmul.mubr.f32.gmra.mrb[10].mxu0 %v4790_v13  ;;  %v3676_v9 = vpack.c.bf16 %v628_v5, %v627_v2  ;;  %v2583_v2 = vld [vmem:[%s5755_s1 + $0x618] sm:$0xff]  ;;  %v635_v5 = vld [vmem:[%s5755_s1 + $0x220] sm:$0xff]  ;;  %v2605_v4 = vld [vmem:[%s5755_s1 + $0x6c8] sm:$0xff] }
  0x78   : > { %1058 = vmatmul.mubr.f32.gmra.mrb[12].mxu1 %v4500_v23  ;;  %3663 = vmatpush3.bf16.msra.mxu0 %v3662_v12  ;;  %v3740_v12 = vpack.c.bf16 %v2577_v56, %v2576_v6  ;;  %v636_v6 = vld [vmem:[%s5755_s1 + $0x228] sm:$0xff]  ;;  %v2600_v56 = vld [vmem:[%s5755_s1 + $0x6a0] sm:$0xff]  ;;  %v641_v44 = vld [vmem:[%s5755_s1 + $0x250] sm:$0xff] }
  0x79   : > { %3727 = vmatpush3.bf16.msra.mxu1 %v3726_v17  ;;  %1062 = vmatprep.mubr.f32.mxu1 %v4565_v59  ;;  %v630_v17 = vld [vmem:[%s5755_s1 + $0x1f8] sm:$0xff]  ;;  %v2589_v41 = vld [vmem:[%s5755_s1 + $0x648] sm:$0xff] }
  0x7a   : > { %3665 = vmatprep.subr.bf16.mxu0 %v3664_v22  ;;  %3729 = vmatprep.subr.bf16.mxu1 %v3728_v25  ;;  %v3742_v22 = vpack.c.bf16 %v2561_v14, %v2560_v11  ;;  %v3680_v25 = vpack.c.bf16 %v630_v17, %v629_v15  ;;  %v4967_v11 = vld [vmem:[#allocation2 + $0x58] sm:$0xff]  ;;  %v2602_v15 = vld [vmem:[%s5755_s1 + $0x6b0] sm:$0xff] }
  0x7b   : > { %1132 = vmatprep.mubr.f32.mxu0 %v504_v31  ;;  %v632_v31 = vld [vmem:[%s5755_s1 + $0x208] sm:$0xff]  ;;  %v638_v14 = vld [vmem:[%s5755_s1 + $0x238] sm:$0xff]  ;;  %v452_v42 = vrot.slane %v4967_v11, 1 }
  0x7c   : > { %1063 = vmatmul.mubr.f32.gmra.mrb[14].mxu1 %v4522_v37  ;;  %3667 = vmatpush3.bf16.msra.mxu0 %v3666_v43  ;;  %v631_v43 = vld [vmem:[%s5755_s1 + $0x200] sm:$0xff]  ;;  %v2603_v17 = vld [vmem:[%s5755_s1 + $0x6b8] sm:$0xff] }
  0x7d   : > { %3731 = vmatpush3.bf16.msra.mxu1 %v3730_v33  ;;  %3669 = vmatprep.subr.bf16.mxu0 %v3668_v34  ;;  %v2596_v33 = vld [vmem:[%s5755_s1 + $0x680] sm:$0xff]  ;;  %v2597_v34 = vld [vmem:[%s5755_s1 + $0x688] sm:$0xff]  ;;  %v3684_v46 = vpack.c.bf16 %v632_v31, %v631_v43  ;;  %v3760_v27 = vpack.c.bf16 %v2603_v17, %v2602_v15 }
  0x7e   : > { %3733 = vmatprep.subr.bf16.mxu1 %v3732_v45  ;;  %1383 = vmatprep.mubr.f32.mxu1 %v4520_v36  ;;  %v612_v36 = vld [vmem:[%s5755_s1 + $0x168] sm:$0xff]  ;;  %v3746_v45 = vpack.c.bf16 %v2563_v30, %v2562_v24  ;;  %v3748_v48 = vpack.c.bf16 %v2597_v34, %v2596_v33  ;;  %v2587_v24 = vld [vmem:[%s5755_s1 + $0x638] sm:$0xff]  ;;  %v2588_v33 = vld [vmem:[%s5755_s1 + $0x640] sm:$0xff] }
  0x7f   : > { %v3678_v21 = vpack.c.bf16 %v612_v36, %v611_v10  ;;  %v2584_v10 = vld [vmem:[%s5755_s1 + $0x620] sm:$0xff]  ;;  %v4965_v36 = vld [vmem:[#allocation2 + $0x50] sm:$0xff]  ;;  %v640_v30 = vld [vmem:[%s5755_s1 + $0x248] sm:$0xff]  ;;  %v3766_v49 = vpack.c.bf16 %v2589_v41, %v2588_v33 }
  0x80   : > { %3671 = vmatpush3.bf16.msra.mxu0 %v3670_v52  ;;  %v634_v52 = vld [vmem:[%s5755_s1 + $0x218] sm:$0xff]  ;;  %v451_v18 = vrot.slane %v4965_v36, 1  ;;  %v2644_v15 = vld [vmem:[%s5755_s1 + $0x800] sm:$0xff]  ;;  %v2645_v17 = vld [vmem:[%s5755_s1 + $0x808] sm:$0xff] }
  0x81   : > { %3735 = vmatpush3.bf16.msra.mxu1 %v3734_v53  ;;  %3673 = vmatprep.subr.bf16.mxu0 %v3672_v54  ;;  %v2598_v53 = vld [vmem:[%s5755_s1 + $0x690] sm:$0xff]  ;;  %v2599_v54 = vld [vmem:[%s5755_s1 + $0x698] sm:$0xff]  ;;  %v2617_v33 = vld [vmem:[%s5755_s1 + $0x728] sm:$0xff] }
  0x82   : > { %3737 = vmatprep.subr.bf16.mxu1 %v3736_v63  ;;  %v3688_v63 = vpack.c.bf16 %v634_v52, %v633_v50  ;;  %v3752_v1 = vpack.c.bf16 %v2599_v54, %v2598_v53  ;;  %v5014_v43 = vsel %vm435_vm0, %v451_v18, %v452_v42  ;;  %v2591_v52 = vld [vmem:[%s5755_s1 + $0x658] sm:$0xff]  ;;  %v643_v53 = vld [vmem:[%s5755_s1 + $0x260] sm:$0xff]  ;;  %v644_v54 = vld [vmem:[%s5755_s1 + $0x268] sm:$0xff] }
  0x84   : > { %3675 = vmatpush3.bf16.msra.mxu0 %v3674_v55  ;;  %v2601_v55 = vld [vmem:[%s5755_s1 + $0x6a8] sm:$0xff] }
  0x85   : > { %3739 = vmatpush3.bf16.msra.mxu1 %v3738_v8  ;;  %3677 = vmatprep.subr.bf16.mxu0 %v3676_v9  ;;  %v3754_v8 = vpack.c.bf16 %v2583_v2, %v2582_v62  ;;  %v3692_v9 = vpack.c.bf16 %v636_v6, %v635_v5  ;;  %v2593_v5 = vld [vmem:[%s5755_s1 + $0x668] sm:$0xff]  ;;  %v645_v6 = vld [vmem:[%s5755_s1 + $0x270] sm:$0xff] }
  0x86   : > { %3741 = vmatprep.subr.bf16.mxu1 %v3740_v12  ;;  %v3756_v12 = vpack.c.bf16 %v2601_v55, %v2600_v56  ;;  %v2610_v56 = vld [vmem:[%s5755_s1 + $0x6f0] sm:$0xff]  ;;  %v2611_v55 = vld [vmem:[%s5755_s1 + $0x6f8] sm:$0xff] }
  0x88   : > { %3679 = vmatpush3.bf16.msra.mxu0 %v3678_v21 }
  0x89   : > { %3743 = vmatpush3.bf16.msra.mxu1 %v3742_v22  ;;  %3681 = vmatprep.subr.bf16.mxu0 %v3680_v25  ;;  %v2586_v22 = vld [vmem:[%s5755_s1 + $0x630] sm:$0xff]  ;;  %v535_v25 = vrot.slane %v4575_v3, 4  ;;  %v2604_v3 = vld [vmem:[%s5755_s1 + $0x6c0] sm:$0xff] }
  0x8a   : > { %3745 = vmatprep.subr.bf16.mxu1 %v3744_v29  ;;  %v639_v29 = vld [vmem:[%s5755_s1 + $0x240] sm:$0xff] }
  0x8b   : > { %v3700_v31 = vpack.c.bf16 %v640_v30, %v639_v29  ;;  %v537_v34 = vsel %vm534_vm3, %v535_v25, %v536_v26  ;;  %v2614_v25 = vld [vmem:[%s5755_s1 + $0x710] sm:$0xff]  ;;  %v2615_v26 = vld [vmem:[%s5755_s1 + $0x718] sm:$0xff] }
  0x8c   : > { %3683 = vmatpush3.bf16.msra.mxu0 %v3682_v40  ;;  %v3764_v40 = vpack.c.bf16 %v2605_v4, %v2604_v3  ;;  %v3784_v30 = vpack.c.bf16 %v2615_v26, %v2614_v25  ;;  %v2630_v4 = vld [vmem:[%s5755_s1 + $0x790] sm:$0xff]  ;;  %v2656_v25 = vld [vmem:[%s5755_s1 + $0x860] sm:$0xff]  ;;  %v2657_v26 = vld [vmem:[%s5755_s1 + $0x868] sm:$0xff] }
  0x8d   : > { %3747 = vmatpush3.bf16.msra.mxu1 %v3746_v45  ;;  %3685 = vmatprep.subr.bf16.mxu0 %v3684_v46  ;;  %v642_v45 = vld [vmem:[%s5755_s1 + $0x258] sm:$0xff] }
  0x8e   : > { %3749 = vmatprep.subr.bf16.mxu1 %v3748_v48  ;;  %v2607_v48 = vld [vmem:[%s5755_s1 + $0x6d8] sm:$0xff]  ;;  %v3704_v38 = vpack.c.bf16 %v642_v45, %v641_v44  ;;  %v2632_v45 = vld [vmem:[%s5755_s1 + $0x7a0] sm:$0xff] }
  0x8f   : > { %1133 = vmatmul.mubr.f32.vlgmr.msra.gmra.mrb[12].mxu0 %v471_v57  ;;  %v2608_v57 = vld [vmem:[%s5755_s1 + $0x6e0] sm:$0xff] }
  0x90   : > { %1384 = vmatmul.mubr.f32.vlgmr.msra.gmra.mrb[16].mxu1 %v4500_v23  ;;  %3687 = vmatpush3.bf16.msra.mxu0 %v3684_v46  ;;  %v2585_v23 = vld [vmem:[%s5755_s1 + $0x628] sm:$0xff]  ;;  %v2606_v46 = vld [vmem:[%s5755_s1 + $0x6d0] sm:$0xff] }
  0x91   : > { %3751 = vmatpush3.bf16.msra.mxu1 %v3750_v60  ;;  %1137 = vmatprep.mubr.f32.mxu0 %v4442_v61  ;;  %v637_v61 = vld [vmem:[%s5755_s1 + $0x230] sm:$0xff]  ;;  %v3768_v50 = vpack.c.bf16 %v2607_v48, %v2606_v46  ;;  %v2609_v60 = vld [vmem:[%s5755_s1 + $0x6e8] sm:$0xff]  ;;  %v517_v48 = vrot.slane %v4965_v36, 3 }
  0x92   : > { %3689 = vmatprep.subr.bf16.mxu0 %v3688_v63  ;;  %3753 = vmatprep.subr.bf16.mxu1 %v3752_v1  ;;  %v3696_v21 = vpack.c.bf16 %v638_v14, %v637_v61  ;;  %v2592_v1 = vld [vmem:[%s5755_s1 + $0x660] sm:$0xff]  ;;  %v3772_v2 = vpack.c.bf16 %v2609_v60, %v2608_v57  ;;  %v2613_v14 = vld [vmem:[%s5755_s1 + $0x708] sm:$0xff]  ;;  %v2634_v57 = vld [vmem:[%s5755_s1 + $0x7b0] sm:$0xff] }
  0x93   : > { %1138 = vmatmul.mubr.f32.gmra.mrb[14].mxu0 %v4495_v19  ;;  %1388 = vmatprep.mubr.f32.mxu1 %v4565_v59  ;;  %v3758_v19 = vpack.c.bf16 %v2585_v23, %v2584_v10  ;;  %v2594_v10 = vld [vmem:[%s5755_s1 + $0x670] sm:$0xff]  ;;  %v2595_v23 = vld [vmem:[%s5755_s1 + $0x678] sm:$0xff]  ;;  %v2612_v61 = vld [vmem:[%s5755_s1 + $0x700] sm:$0xff] }
  0x94   : > { %3691 = vmatpush3.bf16.msra.mxu0 %v3688_v63  ;;  %1142 = vmatprep.mubr.f32.mxu0 %v4528_v39  ;;  %v3708_v63 = vpack.c.bf16 %v644_v54, %v643_v53  ;;  %v3778_v18 = vpack.c.bf16 %v2595_v23, %v2594_v10  ;;  %v3780_v42 = vpack.c.bf16 %v2613_v14, %v2612_v61  ;;  %v2633_v46 = vld [vmem:[%s5755_s1 + $0x7a8] sm:$0xff]  ;;  %v484_v53 = vrot.slane %v4965_v36, 2  ;;  %v2622_v23 = vld [vmem:[%s5755_s1 + $0x750] sm:$0xff]  ;;  %v2623_v61 = vld [vmem:[%s5755_s1 + $0x758] sm:$0xff] }
  0x95   : > { %3755 = vmatpush3.bf16.msra.mxu1 %v3754_v8  ;;  %3693 = vmatprep.subr.bf16.mxu0 %v3692_v9  ;;  %v3774_v8 = vpack.c.bf16 %v2593_v5, %v2592_v1  ;;  %v485_v54 = vrot.slane %v4967_v11, 2  ;;  %v2635_v1 = vld [vmem:[%s5755_s1 + $0x7b8] sm:$0xff]  ;;  %v2621_v5 = vld [vmem:[%s5755_s1 + $0x748] sm:$0xff]  ;;  %v2654_v14 = vld [vmem:[%s5755_s1 + $0x850] sm:$0xff] }
  0x96   : > { %3757 = vmatprep.subr.bf16.mxu1 %v3756_v12  ;;  %1389 = vmatmul.mubr.f32.gmra.mrb[18].mxu1 %v4522_v37  ;;  %v3762_v37 = vpack.c.bf16 %v2587_v24, %v2586_v22  ;;  %v3776_v12 = vpack.c.bf16 %v2611_v55, %v2610_v56  ;;  %v2629_v22 = vld [vmem:[%s5755_s1 + $0x788] sm:$0xff]  ;;  %v2647_v24 = vld [vmem:[%s5755_s1 + $0x818] sm:$0xff]  ;;  %v3826_v55 = vpack.c.bf16 %v2635_v1, %v2634_v57 }
  0x97   : > { %1143 = vmatmul.mubr.f32.gmra.mrb[16].mxu0 %v4540_v47  ;;  %1393 = vmatprep.mubr.f32.mxu1 %v4606_v16  ;;  %v5183_v56 = vsel %vm468_vm2, %v484_v53, %v485_v54  ;;  %v2709_v53 = vld [vmem:[%s5755_s1 + $0xa08] sm:$0xff]  ;;  %v2678_v54 = vld [vmem:[%s5755_s1 + $0x910] sm:$0xff]  ;;  %v2679_v57 = vld [vmem:[%s5755_s1 + $0x918] sm:$0xff] }
  0x98   : > { %3695 = vmatpush3.bf16.msra.mxu0 %v3692_v9  ;;  %1147 = vmatprep.mubr.f32.mxu0 %v4571_v0 }
  0x99   : > { %3759 = vmatpush3.bf16.msra.mxu1 %v3758_v19  ;;  %3697 = vmatprep.subr.bf16.mxu0 %v3696_v21  ;;  %v3812_v19 = vpack.c.bf16 %v2645_v17, %v2644_v15  ;;  %v2655_v15 = vld [vmem:[%s5755_s1 + $0x858] sm:$0xff] }
  0x9a   : > { %3761 = vmatprep.subr.bf16.mxu1 %v3760_v27  ;;  %1394 = vmatmul.mubr.f32.gmra.mrb[20].mxu1 %v4545_v51  ;;  %v2590_v51 = vld [vmem:[%s5755_s1 + $0x650] sm:$0xff] }
  0x9b   : > { %1148 = vmatmul.mubr.f32.gmra.mrb[18].mxu0 %v4583_v7  ;;  %1398 = vmatprep.mubr.f32.mxu1 %v5014_v43  ;;  %v3770_v62 = vpack.c.bf16 %v2591_v52, %v2590_v51  ;;  %v2646_v27 = vld [vmem:[%s5755_s1 + $0x810] sm:$0xff]  ;;  %v3822_v52 = vpack.c.bf16 %v2633_v46, %v2632_v45  ;;  %v2677_v45 = vld [vmem:[%s5755_s1 + $0x908] sm:$0xff]  ;;  %v2724_v46 = vld [vmem:[%s5755_s1 + $0xa80] sm:$0xff] }
  0x9c   : > { %3699 = vmatpush3.bf16.msra.mxu0 %v3696_v21  ;;  %3404 = vmatprep.mubr.f32.mxu0 %v537_v34  ;;  %v2628_v21 = vld [vmem:[%s5755_s1 + $0x780] sm:$0xff]  ;;  %v3816_v3 = vpack.c.bf16 %v2647_v24, %v2646_v27  ;;  %v2650_v51 = vld [vmem:[%s5755_s1 + $0x830] sm:$0xff] }
  0x9d   : > { %3763 = vmatpush3.bf16.msra.mxu1 %v3762_v37  ;;  %3701 = vmatprep.subr.bf16.mxu0 %v3700_v31  ;;  %v3814_v29 = vpack.c.bf16 %v2629_v22, %v2628_v21  ;;  %v2631_v37 = vld [vmem:[%s5755_s1 + $0x798] sm:$0xff]  ;;  %v2648_v34 = vld [vmem:[%s5755_s1 + $0x820] sm:$0xff]  ;;  %v2625_v22 = vld [vmem:[%s5755_s1 + $0x768] sm:$0xff] }
  0x9e   : > { %3765 = vmatprep.subr.bf16.mxu1 %v3764_v40  ;;  %1399 = vmatmul.mubr.f32.gmra.mrb[22].mxu1 %v4965_v36  ;;  %v2649_v40 = vld [vmem:[%s5755_s1 + $0x828] sm:$0xff]  ;;  %v3818_v41 = vpack.c.bf16 %v2631_v37, %v2630_v4  ;;  %v2639_v21 = vld [vmem:[%s5755_s1 + $0x7d8] sm:$0xff]  ;;  %v2658_v37 = vld [vmem:[%s5755_s1 + $0x870] sm:$0xff] }
  0x9f   : > { %1468 = vmatprep.mubr.f32.mxu1 %v4528_v39  ;;  %v646_v39 = vld [vmem:[%s5755_s1 + $0x278] sm:$0xff]  ;;  %v3820_v44 = vpack.c.bf16 %v2649_v40, %v2648_v34  ;;  %v2642_v40 = vld [vmem:[%s5755_s1 + $0x7f0] sm:$0xff] }
  0xa0   : > { %3703 = vmatpush3.bf16.msra.mxu0 %v3700_v31  ;;  %v3712_v9 = vpack.c.bf16 %v646_v39, %v645_v6  ;;  %v2616_v31 = vld [vmem:[%s5755_s1 + $0x720] sm:$0xff]  ;;  %v2653_v39 = vld [vmem:[%s5755_s1 + $0x848] sm:$0xff]  ;;  %v2627_v4 = vld [vmem:[%s5755_s1 + $0x778] sm:$0xff] }
  0xa1   : > { %3767 = vmatpush3.bf16.msra.mxu1 %v3766_v49  ;;  %3705 = vmatprep.subr.bf16.mxu0 %v3704_v38  ;;  %v2618_v49 = vld [vmem:[%s5755_s1 + $0x730] sm:$0xff]  ;;  %v2652_v6 = vld [vmem:[%s5755_s1 + $0x840] sm:$0xff] }
  0xa2   : > { %3769 = vmatprep.subr.bf16.mxu1 %v3768_v50  ;;  %v2651_v50 = vld [vmem:[%s5755_s1 + $0x838] sm:$0xff]  ;;  %v3828_v10 = vpack.c.bf16 %v2653_v39, %v2652_v6  ;;  %v2662_v6 = vld [vmem:[%s5755_s1 + $0x890] sm:$0xff] }
  0xa3   : > { %v2663_v39 = vld [vmem:[%s5755_s1 + $0x898] sm:$0xff] }
  0xa4   : > { %3707 = vmatpush3.bf16.msra.mxu0 %v3704_v38  ;;  %v2619_v38 = vld [vmem:[%s5755_s1 + $0x738] sm:$0xff] }
  0xa5   : > { %3771 = vmatpush3.bf16.msra.mxu1 %v3770_v62  ;;  %3709 = vmatprep.subr.bf16.mxu0 %v3708_v63  ;;  %v3792_v62 = vpack.c.bf16 %v2619_v38, %v2618_v49  ;;  %v2660_v38 = vld [vmem:[%s5755_s1 + $0x880] sm:$0xff] }
  0xa6   : > { %3773 = vmatprep.subr.bf16.mxu1 %v3772_v2  ;;  %v2620_v2 = vld [vmem:[%s5755_s1 + $0x740] sm:$0xff] }
  0xa8   : > { %3711 = vmatpush3.bf16.msra.mxu0 %v3708_v63  ;;  %v3824_v63 = vpack.c.bf16 %v2651_v50, %v2650_v51  ;;  %v2661_v51 = vld [vmem:[%s5755_s1 + $0x888] sm:$0xff]  ;;  %v2708_v50 = vld [vmem:[%s5755_s1 + $0xa00] sm:$0xff] }
  0xa9   : > { %3775 = vmatpush3.bf16.msra.mxu1 %v3774_v8  ;;  %3713 = vmatprep.subr.bf16.mxu0 %v3712_v9  ;;  %v3796_v8 = vpack.c.bf16 %v2621_v5, %v2620_v2  ;;  %v3846_v1 = vpack.c.bf16 %v2661_v51, %v2660_v38  ;;  %v3910_v2 = vpack.c.bf16 %v2709_v53, %v2708_v50  ;;  %v2733_v38 = vld [vmem:[%s5755_s1 + $0xac8] sm:$0xff] }
  0xaa   : > { %3777 = vmatprep.subr.bf16.mxu1 %v3776_v12  ;;  %v2637_v12 = vld [vmem:[%s5755_s1 + $0x7c8] sm:$0xff]  ;;  %v3848_v5 = vpack.c.bf16 %v2679_v57, %v2678_v54  ;;  %v2668_v54 = vld [vmem:[%s5755_s1 + $0x8c0] sm:$0xff] }
  0xab   : > { %v2669_v57 = vld [vmem:[%s5755_s1 + $0x8c8] sm:$0xff] }
  0xac   : > { %3715 = vmatpush3.bf16.msra.mxu0 %v3712_v9  ;;  %v2636_v9 = vld [vmem:[%s5755_s1 + $0x7c0] sm:$0xff] }
  0xad   : > { %3779 = vmatpush3.bf16.msra.mxu1 %v3778_v18  ;;  %3781 = vmatprep.subr.bf16.mxu0 %v3780_v42  ;;  %v3830_v17 = vpack.c.bf16 %v2637_v12, %v2636_v9  ;;  %v3800_v18 = vpack.c.bf16 %v2623_v61, %v2622_v23  ;;  %v2711_v9 = vld [vmem:[%s5755_s1 + $0xa18] sm:$0xff]  ;;  %v2681_v12 = vld [vmem:[%s5755_s1 + $0x928] sm:$0xff]  ;;  %v2728_v23 = vld [vmem:[%s5755_s1 + $0xaa0] sm:$0xff] }
  0xae   : > { %3813 = vmatprep.subr.bf16.mxu1 %v3812_v19  ;;  %v3832_v19 = vpack.c.bf16 %v2655_v15, %v2654_v14  ;;  %v2729_v61 = vld [vmem:[%s5755_s1 + $0xaa8] sm:$0xff]  ;;  %v4103_v14 = vld [vmem:[#allocation2 + $0x30] sm:$0xff]  ;;  %v3850_v15 = vpack.c.bf16 %v2663_v39, %v2662_v6  ;;  %v2735_v39 = vld [vmem:[%s5755_s1 + $0xad8] sm:$0xff] }
  0xaf   : > { %3405 = vmatmul.mubr.f32.vlgmr.msra.gmra.mrb[8].mxu0 %v4643_v35  ;;  %v3788_v35 = vpack.c.bf16 %v2617_v33, %v2616_v31  ;;  %v2659_v31 = vld [vmem:[%s5755_s1 + $0x878] sm:$0xff]  ;;  %v2734_v6 = vld [vmem:[%s5755_s1 + $0xad0] sm:$0xff] }
  0xb0   : > { %1469 = vmatmul.mubr.f32.vlgmr.msra.gmra.mrb[24].mxu1 %v4540_v47  ;;  %3783 = vmatpush3.bf16.msra.mxu0 %v3780_v42  ;;  %v518_v47 = vrot.slane %v4967_v11, 3  ;;  %v2638_v42 = vld [vmem:[%s5755_s1 + $0x7d0] sm:$0xff] }
  0xb1   : > { %3815 = vmatpush3.bf16.msra.mxu1 %v3814_v29  ;;  %1473 = vmatprep.mubr.f32.mxu1 %v4571_v0  ;;  %v3834_v27 = vpack.c.bf16 %v2639_v21, %v2638_v42  ;;  %v2640_v29 = vld [vmem:[%s5755_s1 + $0x7e0] sm:$0xff]  ;;  %v550_v42 = vrot.slane %v4965_v36, 4 }
  0xb2   : > { %3785 = vmatprep.subr.bf16.mxu0 %v3784_v30  ;;  %3817 = vmatprep.subr.bf16.mxu1 %v3816_v3  ;;  %v5162_v60 = vsel %vm501_vm1, %v517_v48, %v518_v47  ;;  %v2626_v3 = vld [vmem:[%s5755_s1 + $0x770] sm:$0xff]  ;;  %v2725_v48 = vld [vmem:[%s5755_s1 + $0xa88] sm:$0xff] }
  0xb3   : > { %3407 = vmatprep.mubr.f32.mxu0 %v4727_v32  ;;  %v3808_v34 = vpack.c.bf16 %v2627_v4, %v2626_v3 }
  0xb4   : > { %1474 = vmatmul.mubr.f32.gmra.mrb[26].mxu1 %v4583_v7  ;;  %3787 = vmatpush3.bf16.msra.mxu0 %v3784_v30  ;;  %v3836_v30 = vpack.c.bf16 %v2657_v26, %v2656_v25  ;;  %v2665_v25 = vld [vmem:[%s5755_s1 + $0x8a8] sm:$0xff]  ;;  %v2712_v26 = vld [vmem:[%s5755_s1 + $0xa20] sm:$0xff] }
  0xb5   : > { %3819 = vmatpush3.bf16.msra.mxu1 %v3818_v41  ;;  %1478 = vmatprep.mubr.f32.mxu1 %v4612_v20  ;;  %v3840_v41 = vpack.c.bf16 %v2659_v31, %v2658_v37  ;;  %v5343_v31 = vld [vmem:[#allocation2 + $0x40] sm:$0xff] }
  0xb6   : > { %3789 = vmatprep.subr.bf16.mxu0 %v3788_v35  ;;  %3821 = vmatprep.subr.bf16.mxu1 %v3820_v44  ;;  %v2676_v44 = vld [vmem:[%s5755_s1 + $0x900] sm:$0xff] }
  0xb7   : > { %3408 = vmatmul.mubr.f32.gmra.mrb[10].mxu0 %v4758_v58  ;;  %v3844_v49 = vpack.c.bf16 %v2677_v45, %v2676_v44  ;;  %v2714_v44 = vld [vmem:[%s5755_s1 + $0xa30] sm:$0xff] }
  0xb8   : > { %1479 = vmatmul.mubr.f32.gmra.mrb[28].mxu1 %v4620_v28  ;;  %3791 = vmatpush3.bf16.msra.mxu0 %v3788_v35  ;;  %v2643_v35 = vld [vmem:[%s5755_s1 + $0x7f8] sm:$0xff] }
  0xb9   : > { %3823 = vmatpush3.bf16.msra.mxu1 %v3822_v52  ;;  %1483 = vmatprep.mubr.f32.mxu1 %v5162_v60  ;;  %v3842_v47 = vpack.c.bf16 %v2643_v35, %v2642_v40  ;;  %v3908_v52 = vpack.c.bf16 %v2725_v48, %v2724_v46  ;;  %v2667_v35 = vld [vmem:[%s5755_s1 + $0x8b8] sm:$0xff]  ;;  %v2684_v48 = vld [vmem:[%s5755_s1 + $0x940] sm:$0xff] }
  0xba   : > { %3793 = vmatprep.subr.bf16.mxu0 %v3792_v62  ;;  %3825 = vmatprep.subr.bf16.mxu1 %v3824_v63  ;;  %v2727_v63 = vld [vmem:[%s5755_s1 + $0xa98] sm:$0xff] }
  0xbb   : > { %3442 = vmatprep.mubr.f32.mxu0 %v4727_v32  ;;  %v2624_v32 = vld [vmem:[%s5755_s1 + $0x760] sm:$0xff]  ;;  %v2715_v46 = vld [vmem:[%s5755_s1 + $0xa38] sm:$0xff] }
  0xbc   : > { %1484 = vmatmul.mubr.f32.gmra.mrb[30].mxu1 %v5183_v56  ;;  %3795 = vmatpush3.bf16.msra.mxu0 %v3792_v62  ;;  %v3804_v24 = vpack.c.bf16 %v2625_v22, %v2624_v32  ;;  %v2726_v62 = vld [vmem:[%s5755_s1 + $0xa90] sm:$0xff]  ;;  %v2664_v22 = vld [vmem:[%s5755_s1 + $0x8a0] sm:$0xff] }
  0xbd   : > { %3827 = vmatpush3.bf16.msra.mxu1 %v3826_v55  ;;  %3797 = vmatprep.subr.bf16.mxu0 %v3796_v8  ;;  %v2710_v55 = vld [vmem:[%s5755_s1 + $0xa10] sm:$0xff]  ;;  %v3854_v37 = vpack.c.bf16 %v2665_v25, %v2664_v22  ;;  %v2672_v25 = vld [vmem:[%s5755_s1 + $0x8e0] sm:$0xff] }
  0xbe   : > { %3829 = vmatprep.subr.bf16.mxu1 %v3828_v10  ;;  %1723 = vmatprep.mubr.f32.mxu1 %v4565_v59  ;;  %v2641_v59 = vld [vmem:[%s5755_s1 + $0x7e8] sm:$0xff]  ;;  %v2680_v10 = vld [vmem:[%s5755_s1 + $0x920] sm:$0xff]  ;;  %v3914_v21 = vpack.c.bf16 %v2711_v9, %v2710_v55  ;;  %v3862_v55 = vpack.c.bf16 %v2669_v57, %v2668_v54  ;;  %v2694_v57 = vld [vmem:[%s5755_s1 + $0x990] sm:$0xff] }
  0xbf   : > { %v3838_v33 = vpack.c.bf16 %v2641_v59, %v2640_v29  ;;  %v3852_v32 = vpack.c.bf16 %v2681_v12, %v2680_v10  ;;  %v2683_v29 = vld [vmem:[%s5755_s1 + $0x938] sm:$0xff]  ;;  %v2670_v10 = vld [vmem:[%s5755_s1 + $0x8d0] sm:$0xff]  ;;  %v2741_v54 = vld [vmem:[%s5755_s1 + $0xb08] sm:$0xff] }
  0xc0   : > { %3799 = vmatpush3.bf16.msra.mxu0 %v3796_v8  ;;  %v3912_v8 = vpack.c.bf16 %v2727_v63, %v2726_v62  ;;  %v2731_v59 = vld [vmem:[%s5755_s1 + $0xab8] sm:$0xff]  ;;  %v2716_v62 = vld [vmem:[%s5755_s1 + $0xa40] sm:$0xff] }
  0xc1   : > { %3831 = vmatpush3.bf16.msra.mxu1 %v3830_v17  ;;  %3801 = vmatprep.subr.bf16.mxu0 %v3800_v18  ;;  %v5309_v17 = vld [vmem:[#allocation2 + $0x60] sm:$0xff]  ;;  %v2671_v12 = vld [vmem:[%s5755_s1 + $0x8d8] sm:$0xff] }
  0xc2   : > { %3833 = vmatprep.subr.bf16.mxu1 %v3832_v19  ;;  %v551_v19 = vrot.slane %v4967_v11, 4  ;;  %v2713_v11 = vld [vmem:[%s5755_s1 + $0xa28] sm:$0xff]  ;;  %v454_v3 = vrot.slane %v5309_v17, 1 }
  0xc4   : > { %3803 = vmatpush3.bf16.msra.mxu0 %v3800_v18  ;;  %v5311_v18 = vld [vmem:[#allocation2 + $0x68] sm:$0xff] }
  0xc5   : > { %3835 = vmatpush3.bf16.msra.mxu1 %v3834_v27  ;;  %3805 = vmatprep.subr.bf16.mxu0 %v3804_v24  ;;  %v3916_v27 = vpack.c.bf16 %v2729_v61, %v2728_v23  ;;  %v455_v4 = vrot.slane %v5311_v18, 1  ;;  %v3928_v23 = vpack.c.bf16 %v2735_v39, %v2734_v6  ;;  %v2719_v61 = vld [vmem:[%s5755_s1 + $0xa58] sm:$0xff] }
  0xc6   : > { %3837 = vmatprep.subr.bf16.mxu1 %v3836_v30  ;;  %v2730_v30 = vld [vmem:[%s5755_s1 + $0xab0] sm:$0xff] }
  0xc7   : > { %v3920_v45 = vpack.c.bf16 %v2731_v59, %v2730_v30  ;;  %v5375_v51 = vsel %vm435_vm0, %v454_v3, %v455_v4  ;;  %v2738_v30 = vld [vmem:[%s5755_s1 + $0xaf0] sm:$0xff]  ;;  %v2739_v59 = vld [vmem:[%s5755_s1 + $0xaf8] sm:$0xff] }
  0xc8   : > { %3807 = vmatpush3.bf16.msra.mxu0 %v3804_v24  ;;  %v2682_v24 = vld [vmem:[%s5755_s1 + $0x930] sm:$0xff] }
  0xc9   : > { %3839 = vmatpush3.bf16.msra.mxu1 %v3838_v33  ;;  %3809 = vmatprep.subr.bf16.mxu0 %v3808_v34  ;;  %v5347_v33 = vsel %vm534_vm3, %v550_v42, %v551_v19  ;;  %v3856_v40 = vpack.c.bf16 %v2683_v29, %v2682_v24  ;;  %v2736_v42 = vld [vmem:[%s5755_s1 + $0xae0] sm:$0xff]  ;;  %v2737_v19 = vld [vmem:[%s5755_s1 + $0xae8] sm:$0xff]  ;;  %v2690_v24 = vld [vmem:[%s5755_s1 + $0x970] sm:$0xff] }
  0xca   : > { %3841 = vmatprep.subr.bf16.mxu1 %v3840_v41  ;;  %v2666_v41 = vld [vmem:[%s5755_s1 + $0x8b0] sm:$0xff]  ;;  %v2691_v29 = vld [vmem:[%s5755_s1 + $0x978] sm:$0xff] }
  0xcb   : > { %v3858_v50 = vpack.c.bf16 %v2667_v35, %v2666_v41  ;;  %v2722_v41 = vld [vmem:[%s5755_s1 + $0xa70] sm:$0xff]  ;;  %v3936_v35 = vpack.c.bf16 %v2739_v59, %v2738_v30 }
  0xcc   : > { %3811 = vmatpush3.bf16.msra.mxu0 %v3808_v34  ;;  %v3918_v34 = vpack.c.bf16 %v2713_v11, %v2712_v26  ;;  %v2720_v26 = vld [vmem:[%s5755_s1 + $0xa60] sm:$0xff]  ;;  %v2721_v11 = vld [vmem:[%s5755_s1 + $0xa68] sm:$0xff] }
  0xcd   : > { %3843 = vmatpush3.bf16.msra.mxu1 %v3842_v47  ;;  %3845 = vmatprep.subr.bf16.mxu0 %v3844_v49  ;;  %v2685_v47 = vld [vmem:[%s5755_s1 + $0x948] sm:$0xff]  ;;  %v2732_v49 = vld [vmem:[%s5755_s1 + $0xac0] sm:$0xff]  ;;  %v3934_v4 = vpack.c.bf16 %v2721_v11, %v2720_v26  ;;  %v488_v26 = vrot.slane %v5311_v18, 2 }
  0xce   : > { %3909 = vmatprep.subr.bf16.mxu1 %v3908_v52  ;;  %v3922_v52 = vpack.c.bf16 %v2715_v46, %v2714_v44  ;;  %v3860_v53 = vpack.c.bf16 %v2685_v47, %v2684_v48  ;;  %v3924_v63 = vpack.c.bf16 %v2733_v38, %v2732_v49  ;;  %v2723_v44 = vld [vmem:[%s5755_s1 + $0xa78] sm:$0xff]  ;;  %v2693_v46 = vld [vmem:[%s5755_s1 + $0x988] sm:$0xff]  ;;  %v2756_v48 = vld [vmem:[%s5755_s1 + $0xb80] sm:$0xff] }
  0xcf   : > { %3443 = vmatmul.mubr.f32.vlgmr.msra.gmra.mrb[8].mxu0 %v4758_v58  ;;  %v2757_v47 = vld [vmem:[%s5755_s1 + $0xb88] sm:$0xff]  ;;  %v3938_v38 = vpack.c.bf16 %v2723_v44, %v2722_v41 }
  0xd0   : > { %1724 = vmatmul.mubr.f32.vlgmr.msra.gmra.mrb[32].mxu1 %v4103_v14  ;;  %3847 = vmatpush3.bf16.msra.mxu0 %v3846_v1  ;;  %v2717_v1 = vld [vmem:[%s5755_s1 + $0xa48] sm:$0xff]  ;;  %v2688_v14 = vld [vmem:[%s5755_s1 + $0x960] sm:$0xff] }
  0xd1   : > { %3911 = vmatpush3.bf16.msra.mxu1 %v3910_v2  ;;  %3849 = vmatprep.subr.bf16.mxu0 %v3848_v5  ;;  %v2686_v2 = vld [vmem:[%s5755_s1 + $0x950] sm:$0xff]  ;;  %v2687_v5 = vld [vmem:[%s5755_s1 + $0x958] sm:$0xff] }
  0xd2   : > { %3913 = vmatprep.subr.bf16.mxu1 %v3912_v8  ;;  %1728 = vmatprep.mubr.f32.mxu1 %v4606_v16  ;;  %v3926_v8 = vpack.c.bf16 %v2717_v1, %v2716_v62  ;;  %v3864_v9 = vpack.c.bf16 %v2687_v5, %v2686_v2  ;;  %v2695_v62 = vld [vmem:[%s5755_s1 + $0x998] sm:$0xff]  ;;  %v2742_v5 = vld [vmem:[%s5755_s1 + $0xb10] sm:$0xff] }
  0xd3   : > { %3445 = vmatprep.mubr.f32.mxu0 %v4790_v13  ;;  %v2759_v1 = vld [vmem:[%s5755_s1 + $0xb98] sm:$0xff]  ;;  %v3880_v6 = vpack.c.bf16 %v2695_v62, %v2694_v57  ;;  %v2704_v62 = vld [vmem:[%s5755_s1 + $0x9e0] sm:$0xff] }
  0xd4   : > { %3851 = vmatpush3.bf16.msra.mxu0 %v3850_v15  ;;  %1729 = vmatmul.mubr.f32.gmra.mrb[34].mxu1 %v5343_v31  ;;  %v2689_v15 = vld [vmem:[%s5755_s1 + $0x968] sm:$0xff]  ;;  %v2751_v57 = vld [vmem:[%s5755_s1 + $0xb58] sm:$0xff] }
  0xd5   : > { %3915 = vmatpush3.bf16.msra.mxu1 %v3914_v21  ;;  %3853 = vmatprep.subr.bf16.mxu0 %v3852_v32  ;;  %v3866_v21 = vpack.c.bf16 %v2671_v12, %v2670_v10  ;;  %v3868_v22 = vpack.c.bf16 %v2689_v15, %v2688_v14  ;;  %v2760_v10 = vld [vmem:[%s5755_s1 + $0xba0] sm:$0xff]  ;;  %v2761_v12 = vld [vmem:[%s5755_s1 + $0xba8] sm:$0xff]  ;;  %v521_v14 = vrot.slane %v5311_v18, 3  ;;  %v5523_v15 = vld [vmem:[#allocation2 + $0x70] sm:$0xff] }
  0xd6   : > { %3917 = vmatprep.subr.bf16.mxu1 %v3916_v27  ;;  %1733 = vmatprep.mubr.f32.mxu1 %v5014_v43  ;;  %v3932_v27 = vpack.c.bf16 %v2737_v19, %v2736_v42  ;;  %v5525_v42 = vld [vmem:[#allocation2 + $0x78] sm:$0xff]  ;;  %v2745_v19 = vld [vmem:[%s5755_s1 + $0xb28] sm:$0xff] }
  0xd7   : > { %3446 = vmatmul.mubr.f32.gmra.mrb[10].mxu0 %v5347_v33  ;;  %v458_v11 = vrot.slane %v5525_v42, 1 }
  0xd8   : > { %3855 = vmatpush3.bf16.msra.mxu0 %v3854_v37  ;;  %1734 = vmatmul.mubr.f32.gmra.mrb[36].mxu1 %v4965_v36  ;;  %v3872_v37 = vpack.c.bf16 %v2691_v29, %v2690_v24 }
  0xd9   : > { %3919 = vmatpush3.bf16.msra.mxu1 %v3918_v34  ;;  %3857 = vmatprep.subr.bf16.mxu0 %v3856_v40  ;;  %v2674_v34 = vld [vmem:[%s5755_s1 + $0x8f0] sm:$0xff]  ;;  %v2675_v40 = vld [vmem:[%s5755_s1 + $0x8f8] sm:$0xff] }
  0xda   : > { %3921 = vmatprep.subr.bf16.mxu1 %v3920_v45  ;;  %1738 = vmatprep.mubr.f32.mxu1 %v5375_v51  ;;  %v2692_v45 = vld [vmem:[%s5755_s1 + $0x980] sm:$0xff]  ;;  %v3874_v49 = vpack.c.bf16 %v2675_v40, %v2674_v34  ;;  %v2765_v40 = vld [vmem:[%s5755_s1 + $0xbc8] sm:$0xff] }
  0xdb   : > { %1808 = vmatprep.mubr.f32.mxu0 %v4571_v0  ;;  %v2718_v0 = vld [vmem:[%s5755_s1 + $0xa50] sm:$0xff]  ;;  %v2764_v34 = vld [vmem:[%s5755_s1 + $0xbc0] sm:$0xff] }
  0xdc   : > { %3859 = vmatpush3.bf16.msra.mxu0 %v3858_v50  ;;  %1739 = vmatmul.mubr.f32.gmra.mrb[38].mxu1 %v5309_v17  ;;  %v3930_v32 = vpack.c.bf16 %v2719_v61, %v2718_v0  ;;  %v3876_v50 = vpack.c.bf16 %v2693_v46, %v2692_v45  ;;  %v520_v61 = vrot.slane %v5309_v17, 3  ;;  %v2748_v45 = vld [vmem:[%s5755_s1 + $0xb40] sm:$0xff]  ;;  %v3956_v46 = vpack.c.bf16 %v2765_v40, %v2764_v34  ;;  %v2782_v40 = vld [vmem:[%s5755_s1 + $0xc50] sm:$0xff] }
  0xdd   : > { %3923 = vmatpush3.bf16.msra.mxu1 %v3922_v52  ;;  %3861 = vmatprep.subr.bf16.mxu0 %v3860_v53  ;;  %v3940_v52 = vpack.c.bf16 %v2757_v47, %v2756_v48  ;;  %v2740_v53 = vld [vmem:[%s5755_s1 + $0xb00] sm:$0xff]  ;;  %v2702_v48 = vld [vmem:[%s5755_s1 + $0x9d0] sm:$0xff]  ;;  %v2703_v47 = vld [vmem:[%s5755_s1 + $0x9d8] sm:$0xff] }
  0xde   : > { %3925 = vmatprep.subr.bf16.mxu1 %v3924_v63  ;;  %2063 = vmatprep.mubr.f32.mxu1 %v4606_v16  ;;  %v2673_v16 = vld [vmem:[%s5755_s1 + $0x8e8] sm:$0xff]  ;;  %v2758_v63 = vld [vmem:[%s5755_s1 + $0xb90] sm:$0xff]  ;;  %v3942_v2 = vpack.c.bf16 %v2741_v54, %v2740_v53  ;;  %v5550_v29 = vsel %vm501_vm1, %v520_v61, %v521_v14  ;;  %v2755_v61 = vld [vmem:[%s5755_s1 + $0xb78] sm:$0xff] }
  0xdf   : > { %v3870_v3 = vpack.c.bf16 %v2673_v16, %v2672_v25  ;;  %v3944_v39 = vpack.c.bf16 %v2759_v1, %v2758_v63  ;;  %v2763_v25 = vld [vmem:[%s5755_s1 + $0xbb8] sm:$0xff]  ;;  %v487_v16 = vrot.slane %v5309_v17, 2  ;;  %v2750_v53 = vld [vmem:[%s5755_s1 + $0xb50] sm:$0xff]  ;;  %v2768_v63 = vld [vmem:[%s5755_s1 + $0xbe0] sm:$0xff] }
  0xe0   : > { %3863 = vmatpush3.bf16.msra.mxu0 %v3862_v55  ;;  %v2743_v55 = vld [vmem:[%s5755_s1 + $0xb18] sm:$0xff]  ;;  %v2769_v1 = vld [vmem:[%s5755_s1 + $0xbe8] sm:$0xff]  ;;  %v2772_v14 = vld [vmem:[%s5755_s1 + $0xc00] sm:$0xff] }
  0xe1   : > { %3927 = vmatpush3.bf16.msra.mxu1 %v3926_v8  ;;  %3865 = vmatprep.subr.bf16.mxu0 %v3864_v9  ;;  %v2696_v8 = vld [vmem:[%s5755_s1 + $0x9a0] sm:$0xff]  ;;  %v2697_v9 = vld [vmem:[%s5755_s1 + $0x9a8] sm:$0xff]  ;;  %v3946_v0 = vpack.c.bf16 %v2743_v55, %v2742_v5  ;;  %v5575_v41 = vsel %vm468_vm2, %v487_v16, %v488_v26  ;;  %v554_v16 = vrot.slane %v5311_v18, 4 }
  0xe2   : > { %3929 = vmatprep.subr.bf16.mxu1 %v3928_v23  ;;  %v3884_v23 = vpack.c.bf16 %v2697_v9, %v2696_v8  ;;  %v2753_v55 = vld [vmem:[%s5755_s1 + $0xb68] sm:$0xff]  ;;  %v2706_v8 = vld [vmem:[%s5755_s1 + $0x9f0] sm:$0xff] }
  0xe3   : > { %v2770_v9 = vld [vmem:[%s5755_s1 + $0xbf0] sm:$0xff] }
  0xe4   : > { %3867 = vmatpush3.bf16.msra.mxu0 %v3866_v21  ;;  %v2698_v21 = vld [vmem:[%s5755_s1 + $0x9b0] sm:$0xff] }
  0xe5   : > { %3931 = vmatpush3.bf16.msra.mxu1 %v3930_v32  ;;  %3869 = vmatprep.subr.bf16.mxu0 %v3868_v22  ;;  %v2699_v32 = vld [vmem:[%s5755_s1 + $0x9b8] sm:$0xff]  ;;  %v2762_v22 = vld [vmem:[%s5755_s1 + $0xbb0] sm:$0xff] }
  0xe6   : > { %3933 = vmatprep.subr.bf16.mxu1 %v3932_v27  ;;  %v457_v27 = vrot.slane %v5523_v15, 1  ;;  %v3888_v30 = vpack.c.bf16 %v2699_v32, %v2698_v21  ;;  %v3952_v59 = vpack.c.bf16 %v2763_v25, %v2762_v22  ;;  %v2774_v32 = vld [vmem:[%s5755_s1 + $0xc10] sm:$0xff]  ;;  %v2775_v22 = vld [vmem:[%s5755_s1 + $0xc18] sm:$0xff]  ;;  %v553_v25 = vrot.slane %v5309_v17, 4 }
  0xe7   : > { %v3976_v26 = vpack.c.bf16 %v2775_v22, %v2774_v32 }
  0xe8   : > { %3871 = vmatpush3.bf16.msra.mxu0 %v3870_v3  ;;  %v2747_v3 = vld [vmem:[%s5755_s1 + $0xb38] sm:$0xff] }
  0xe9   : > { %3935 = vmatpush3.bf16.msra.mxu1 %v3934_v4  ;;  %3873 = vmatprep.subr.bf16.mxu0 %v3872_v37  ;;  %v2700_v4 = vld [vmem:[%s5755_s1 + $0x9c0] sm:$0xff]  ;;  %v2701_v37 = vld [vmem:[%s5755_s1 + $0x9c8] sm:$0xff] }
  0xea   : > { %3937 = vmatprep.subr.bf16.mxu1 %v3936_v35  ;;  %v3892_v44 = vpack.c.bf16 %v2701_v37, %v2700_v4  ;;  %v2780_v37 = vld [vmem:[%s5755_s1 + $0xc40] sm:$0xff] }
  0xec   : > { %3875 = vmatpush3.bf16.msra.mxu0 %v3874_v49  ;;  %v2766_v49 = vld [vmem:[%s5755_s1 + $0xbd0] sm:$0xff] }
  0xed   : > { %3939 = vmatpush3.bf16.msra.mxu1 %v3938_v38  ;;  %3877 = vmatprep.subr.bf16.mxu0 %v3876_v50  ;;  %v2767_v38 = vld [vmem:[%s5755_s1 + $0xbd8] sm:$0xff] }
  0xee   : > { %3941 = vmatprep.subr.bf16.mxu1 %v3940_v52  ;;  %v3896_v52 = vpack.c.bf16 %v2703_v47, %v2702_v48  ;;  %v3960_v54 = vpack.c.bf16 %v2767_v38, %v2766_v49 }
  0xef   : > { %1809 = vmatmul.mubr.f32.vlgmr.msra.gmra.mrb[20].mxu0 %v4583_v7  ;;  %v2744_v7 = vld [vmem:[%s5755_s1 + $0xb20] sm:$0xff] }
  0xf0   : > { %2064 = vmatmul.mubr.f32.vlgmr.msra.gmra.mrb[40].mxu1 %v5343_v31  ;;  %3879 = vmatpush3.bf16.msra.mxu0 %v3876_v50  ;;  %v3948_v31 = vpack.c.bf16 %v2761_v12, %v2760_v10  ;;  %v3950_v24 = vpack.c.bf16 %v2745_v19, %v2744_v7  ;;  %v2771_v10 = vld [vmem:[%s5755_s1 + $0xbf8] sm:$0xff] }
  0xf1   : > { %3943 = vmatpush3.bf16.msra.mxu1 %v3942_v2  ;;  %1813 = vmatprep.mubr.f32.mxu0 %v4612_v20  ;;  %v3962_v2 = vpack.c.bf16 %v2751_v57, %v2750_v53  ;;  %v3968_v7 = vpack.c.bf16 %v2771_v10, %v2770_v9 }
  0xf2   : > { %3881 = vmatprep.subr.bf16.mxu0 %v3880_v6  ;;  %3945 = vmatprep.subr.bf16.mxu1 %v3944_v39  ;;  %v3964_v39 = vpack.c.bf16 %v2769_v1, %v2768_v63  ;;  %v556_v1 = vrot.slane %v5523_v15, 4 }
  0xf3   : > { %1814 = vmatmul.mubr.f32.gmra.mrb[22].mxu0 %v4620_v28  ;;  %2068 = vmatprep.mubr.f32.mxu1 %v5014_v43  ;;  %v2746_v43 = vld [vmem:[%s5755_s1 + $0xb30] sm:$0xff] }
  0xf4   : > { %3883 = vmatpush3.bf16.msra.mxu0 %v3880_v6  ;;  %1818 = vmatprep.mubr.f32.mxu0 %v5162_v60  ;;  %v3954_v35 = vpack.c.bf16 %v2747_v3, %v2746_v43  ;;  %v2752_v6 = vld [vmem:[%s5755_s1 + $0xb60] sm:$0xff]  ;;  %v2779_v43 = vld [vmem:[%s5755_s1 + $0xc38] sm:$0xff] }
  0xf5   : > { %3947 = vmatpush3.bf16.msra.mxu1 %v3946_v0  ;;  %3885 = vmatprep.subr.bf16.mxu0 %v3884_v23  ;;  %v3966_v12 = vpack.c.bf16 %v2753_v55, %v2752_v6 }
  0xf6   : > { %3949 = vmatprep.subr.bf16.mxu1 %v3948_v31  ;;  %2069 = vmatmul.mubr.f32.gmra.mrb[42].mxu1 %v4965_v36  ;;  %v459_v36 = vsel %vm435_vm0, %v457_v27, %v458_v11  ;;  %v2773_v31 = vld [vmem:[%s5755_s1 + $0xc08] sm:$0xff]  ;;  %v2776_v27 = vld [vmem:[%s5755_s1 + $0xc20] sm:$0xff] }
  0xf7   : > { %1819 = vmatmul.mubr.f32.gmra.mrb[24].mxu0 %v5183_v56  ;;  %2073 = vmatprep.mubr.f32.mxu1 %v5375_v51  ;;  %v2749_v51 = vld [vmem:[%s5755_s1 + $0xb48] sm:$0xff]  ;;  %v3972_v21 = vpack.c.bf16 %v2773_v31, %v2772_v14 }
  0xf8   : > { %3887 = vmatpush3.bf16.msra.mxu0 %v3884_v23  ;;  %1823 = vmatprep.mubr.f32.mxu0 %v5550_v29  ;;  %v3958_v50 = vpack.c.bf16 %v2749_v51, %v2748_v45  ;;  %v2754_v23 = vld [vmem:[%s5755_s1 + $0xb70] sm:$0xff]  ;;  %v2777_v11 = vld [vmem:[%s5755_s1 + $0xc28] sm:$0xff]  ;;  %v2787_v51 = vld [vmem:[%s5755_s1 + $0xc78] sm:$0xff] }
  0xf9   : > { %3951 = vmatpush3.bf16.msra.mxu1 %v3950_v24  ;;  %3889 = vmatprep.subr.bf16.mxu0 %v3888_v30  ;;  %v3970_v19 = vpack.c.bf16 %v2755_v61, %v2754_v23  ;;  %v3980_v18 = vpack.c.bf16 %v2777_v11, %v2776_v27  ;;  %v523_v24 = vrot.slane %v5523_v15, 3 }
  0xfa   : > { %3953 = vmatprep.subr.bf16.mxu1 %v3952_v59  ;;  %2074 = vmatmul.mubr.f32.gmra.mrb[44].mxu1 %v5309_v17  ;;  %v555_v17 = vsel %vm534_vm3, %v553_v25, %v554_v16  ;;  %v491_v59 = vrot.slane %v5525_v42, 2 }
  0xfb   : > { %1824 = vmatmul.mubr.f32.gmra.mrb[26].mxu0 %v5575_v41  ;;  %2078 = vmatprep.mubr.f32.mxu1 %v459_v36  ;;  %v2783_v36 = vld [vmem:[%s5755_s1 + $0xc58] sm:$0xff] }
  0xfc   : > { %3891 = vmatpush3.bf16.msra.mxu0 %v3888_v30  ;;  %3480 = vmatprep.mubr.f32.mxu0 %v4758_v58  ;;  %v2705_v58 = vld [vmem:[%s5755_s1 + $0x9e8] sm:$0xff]  ;;  %v524_v30 = vrot.slane %v5525_v42, 3 }
  0xfd   : > { %3955 = vmatpush3.bf16.msra.mxu1 %v3954_v35  ;;  %3893 = vmatprep.subr.bf16.mxu0 %v3892_v44  ;;  %v3900_v5 = vpack.c.bf16 %v2705_v58, %v2704_v62  ;;  %v2785_v35 = vld [vmem:[%s5755_s1 + $0xc68] sm:$0xff] }
  0xfe   : > { %3957 = vmatprep.subr.bf16.mxu1 %v3956_v46  ;;  %2079 = vmatmul.mubr.f32.gmra.mrb[46].mxu1 %v5523_v15  ;;  %v525_v3 = vsel %vm501_vm1, %v523_v24, %v524_v30  ;;  %v2786_v46 = vld [vmem:[%s5755_s1 + $0xc70] sm:$0xff] }
  0xff   : > { %2148 = vmatprep.mubr.f32.mxu1 %v4612_v20  ;;  %v2707_v20 = vld [vmem:[%s5755_s1 + $0x9f8] sm:$0xff] }
 0x100   : > { %3895 = vmatpush3.bf16.msra.mxu0 %v3892_v44  ;;  %v3904_v0 = vpack.c.bf16 %v2707_v20, %v2706_v8 }
 0x101   : > { %3959 = vmatpush3.bf16.msra.mxu1 %v3958_v50  ;;  %3897 = vmatprep.subr.bf16.mxu0 %v3896_v52 }
 0x102   : > { %3961 = vmatprep.subr.bf16.mxu1 %v3960_v54 }
 0x104   : > { %3899 = vmatpush3.bf16.msra.mxu0 %v3896_v52  ;;  %v4000_v52 = vpack.c.bf16 %v2787_v51, %v2786_v46 }
 0x105   : > { %3963 = vmatpush3.bf16.msra.mxu1 %v3962_v2  ;;  %3901 = vmatprep.subr.bf16.mxu0 %v3900_v5  ;;  %v557_v2 = vrot.slane %v5525_v42, 4 }
 0x106   : > { %3965 = vmatprep.subr.bf16.mxu1 %v3964_v39 }
 0x107   : > { %v558_v10 = vsel %vm534_vm3, %v556_v1, %v557_v2 }
 0x108   : > { %3903 = vmatpush3.bf16.msra.mxu0 %v3900_v5 }
 0x109   : > { %3967 = vmatpush3.bf16.msra.mxu1 %v3966_v12  ;;  %3905 = vmatprep.subr.bf16.mxu0 %v3904_v0 }
 0x10a   : > { %3969 = vmatprep.subr.bf16.mxu1 %v3968_v7 }
 0x10c   : > { %3907 = vmatpush3.bf16.msra.mxu0 %v3904_v0 }
 0x10d   : > { %3971 = vmatpush3.bf16.msra.mxu1 %v3970_v19  ;;  %3973 = vmatprep.subr.bf16.mxu0 %v3972_v21 }
 0x10e   : > { %4004 = vmatprep.subr.bf16.mxu1 %v3972_v21 }
 0x10f   : > { %3481 = vmatmul.mubr.f32.vlgmr.msra.gmra.mrb[8].mxu0 %v4790_v13 }
 0x110   : > { %2149 = vmatmul.mubr.f32.vlgmr.msra.gmra.mrb[48].mxu1 %v4620_v28  ;;  %3975 = vmatpush3.bf16.msra.mxu0 %v3972_v21  ;;  %v2778_v28 = vld [vmem:[%s5755_s1 + $0xc30] sm:$0xff] }
 0x111   : > { %4012 = vmatpush3.bf16.msra.mxu1 %v3972_v21  ;;  %3483 = vmatprep.mubr.f32.mxu0 %v5347_v33  ;;  %v3984_v4 = vpack.c.bf16 %v2779_v43, %v2778_v28 }
 0x112   : > { %2153 = vmatprep.mubr.f32.mxu1 %v5162_v60  ;;  %3977 = vmatprep.subr.bf16.mxu0 %v3976_v26  ;;  %v490_v60 = vrot.slane %v5523_v15, 2 }
 0x113   : > { %3484 = vmatmul.mubr.f32.gmra.mrb[10].mxu0 %v555_v17  ;;  %4005 = vmatprep.subr.bf16.mxu1 %v3976_v26 }
 0x114   : > { %2154 = vmatmul.mubr.f32.gmra.mrb[50].mxu1 %v5183_v56  ;;  %3979 = vmatpush3.bf16.msra.mxu0 %v3976_v26  ;;  %v2781_v56 = vld [vmem:[%s5755_s1 + $0xc48] sm:$0xff] }
 0x115   : > { %4013 = vmatpush3.bf16.msra.mxu1 %v3976_v26  ;;  %2158 = vmatprep.mubr.f32.mxu1 %v5550_v29  ;;  %v492_v29 = vsel %vm468_vm2, %v490_v60, %v491_v59  ;;  %v3988_v34 = vpack.c.bf16 %v2781_v56, %v2780_v37 }
 0x116   : > { %3981 = vmatprep.subr.bf16.mxu0 %v3980_v18  ;;  %4006 = vmatprep.subr.bf16.mxu1 %v3980_v18 }
 0x117   : > { %3518 = vmatprep.mubr.f32.mxu0 %v4790_v13  ;;  %v3992_v13 = vpack.c.bf16 %v2783_v36, %v2782_v40 }
 0x118   : > { %2159 = vmatmul.mubr.f32.gmra.mrb[52].mxu1 %v5575_v41  ;;  %3983 = vmatpush3.bf16.msra.mxu0 %v3980_v18  ;;  %v2784_v41 = vld [vmem:[%s5755_s1 + $0xc60] sm:$0xff] }
 0x119   : > { %4014 = vmatpush3.bf16.msra.mxu1 %v3980_v18  ;;  %2163 = vmatprep.mubr.f32.mxu1 %v525_v3  ;;  %v3996_v44 = vpack.c.bf16 %v2785_v35, %v2784_v41 }
 0x11a   : > { %3985 = vmatprep.subr.bf16.mxu0 %v3984_v4  ;;  %4007 = vmatprep.subr.bf16.mxu1 %v3984_v4 }
 0x11c   : > { %2164 = vmatmul.mubr.f32.gmra.mrb[54].mxu1 %v492_v29  ;;  %3987 = vmatpush3.bf16.msra.mxu0 %v3984_v4 }
 0x11d   : > { %4015 = vmatpush3.bf16.msra.mxu1 %v3984_v4  ;;  %3989 = vmatprep.subr.bf16.mxu0 %v3988_v34 }
 0x11e   : > { %4008 = vmatprep.subr.bf16.mxu1 %v3988_v34  ;;  %3521 = vmatprep.mubr.f32.mxu1 %v555_v17 }
 0x120   : > { %3991 = vmatpush3.bf16.msra.mxu0 %v3988_v34 }
 0x121   : > { %4016 = vmatpush3.bf16.msra.mxu1 %v3988_v34  ;;  %3993 = vmatprep.subr.bf16.mxu0 %v3992_v13 }
 0x122   : > { %v2826_v45 = vpop.f32.mrb[0].mxu0  ;;  %4009 = vmatprep.subr.bf16.mxu1 %v3992_v13 }
 0x123   : > { %v2870_v48 = vpop.f32.mrb[0].mxu1  ;;  %v2827_v47 = vpop.f32.mrb[1].mxu0 }
 0x124   : > { %v2828_v49 = vadd.f32 %v2827_v47, %v2826_v45  ;;  %v2871_v38 = vpop.f32.mrb[1].mxu1  ;;  %3995 = vmatpush3.bf16.msra.mxu0 %v3992_v13 }
 0x125   : > { %v2872_v50 = vadd.f32 %v2871_v38, %v2870_v48  ;;  %4017 = vmatpush3.bf16.msra.mxu1 %v3992_v13  ;;  %3997 = vmatprep.subr.bf16.mxu0 %v3996_v44 }
 0x126   : > { %4010 = vmatprep.subr.bf16.mxu1 %v3996_v44  ;;  %v2829_v53 = vpop.f32.mrb[2].mxu0 }
 0x127   : > { %v880_v54 = vadd.f32 %v2872_v50, %v2828_v49  ;;  %v2873_v57 = vpop.f32.mrb[2].mxu1  ;;  %v2830_v62 = vpop.f32.mrb[3].mxu0 }
 0x128   : > { %3999 = vmatpush3.bf16.msra.mxu0 %v3996_v44  ;;  %v2831_v58 = vadd.f32 %v2830_v62, %v2829_v53  ;;  %v2874_v63 = vpop.f32.mrb[3].mxu1 }
 0x129   : > { %4018 = vmatpush3.bf16.msra.mxu1 %v3996_v44  ;;  %4001 = vmatprep.subr.bf16.mxu0 %v4000_v52  ;;  %v2875_v5 = vadd.f32 %v2874_v63, %v2873_v57 }
 0x12a   : > { %4011 = vmatprep.subr.bf16.mxu1 %v4000_v52  ;;  %v2832_v6 = vpop.f32.mrb[4].mxu0 }
 0x12b   : > { %v885_v39 = vadd.f32 %v2875_v5, %v2831_v58  ;;  %v2876_v55 = vpop.f32.mrb[4].mxu1  ;;  %v2833_v8 = vpop.f32.mrb[5].mxu0 }
 0x12c   : > { %4003 = vmatpush3.bf16.msra.mxu0 %v4000_v52  ;;  %v2834_v20 = vadd.f32 %v2833_v8, %v2832_v6  ;;  %v2877_v9 = vpop.f32.mrb[5].mxu1 }
 0x12d   : > { %4019 = vmatpush3.bf16.msra.mxu1 %v4000_v52  ;;  %v2878_v12 = vadd.f32 %v2877_v9, %v2876_v55 }
 0x12e   : > { %v2835_v0 = vpop.f32.mrb[6].mxu0 }
 0x12f   : > { %3519 = vmatmul.mubr.f32.vlgmr.msra.gmra.mrb[8].mxu0 %v5347_v33  ;;  %v890_v23 = vadd.f32 %v2878_v12, %v2834_v20  ;;  %v2879_v15 = vpop.f32.mrb[6].mxu1  ;;  %v2836_v7 = vpop.f32.mrb[7].mxu0 }
 0x130   : > { %3522 = vmatmul.mubr.f32.vlgmr.msra.gmra.mrb[56].mxu1 %v558_v10  ;;  %v2837_v42 = vadd.f32 %v2836_v7, %v2835_v0  ;;  %v2880_v61 = vpop.f32.mrb[7].mxu1 }
 0x131   : > { %v2881_v14 = vadd.f32 %v2880_v61, %v2879_v15 }
 0x133   : > { %v895_v31 = vadd.f32 %v2881_v14, %v2837_v42 }
 0x143   : > { %v2934_v19 = vpop.f32.mrb[8].mxu1 }
 0x144   : > { %v2935_v21 = vpop.f32.mrb[9].mxu1 }
 0x145   : > { %v2936_v32 = vadd.f32 %v2935_v21, %v2934_v19 }
 0x147   : > { %v4026_v22 = vadd.f32 %v2936_v32, %v880_v54  ;;  %v2937_v25 = vpop.f32.mrb[10].mxu1 }
 0x148   : > { %v2938_v16 = vpop.f32.mrb[11].mxu1 }
 0x149   : > { %v2939_v26 = vadd.f32 %v2938_v16, %v2937_v25 }
 0x14b   : > { %v4020_v27 = vadd.f32 %v2939_v26, %v885_v39  ;;  %v2940_v11 = vpop.f32.mrb[12].mxu1 }
 0x14c   : > { %v2941_v17 = vpop.f32.mrb[13].mxu1 }
 0x14d   : > { %v2942_v18 = vadd.f32 %v2941_v17, %v2940_v11 }
 0x14f   : > { %v4039_v33 = vadd.f32 %v2942_v18, %v890_v23  ;;  %v2943_v24 = vpop.f32.mrb[14].mxu1  ;;  %v4151_v23 = vmov 0.0  }
 0x150   : > { %v2944_v30 = vpop.f32.mrb[15].mxu1  ;;  %2323 = vst [vmem:[%s4229_s10] sm:$0x3] %v4151_v23  ;;  %2324 = vst [vmem:[%s4229_s10 + $0x10] sm:$0x3] %v4151_v23 }
 0x151   : > { %v2945_v28 = vadd.f32 %v2944_v30, %v2943_v24  ;;  %2325 = vst [vmem:[%s4229_s10 + $0x20] sm:$0x3] %v4151_v23  ;;  %2326 = vst [vmem:[%s4229_s10 + $0x30] sm:$0x3] %v4151_v23 }
 0x152   : > { %2327 = vst [vmem:[%s4229_s10 + $0xa] sm:$0x3f] %v4151_v23  ;;  %2328 = vst [vmem:[%s4229_s10 + $0x1a] sm:$0x3f] %v4151_v23 }
 0x153   : > { %v4032_v43 = vadd.f32 %v2945_v28, %v895_v31  ;;  %2329 = vst [vmem:[%s4229_s10 + $0x2a] sm:$0x3f] %v4151_v23  ;;  %2330 = vst [vmem:[%s4229_s10 + $0x3a] sm:$0x3f] %v4151_v23 }
 0x162   : > { %v2978_v60 = vpop.f32.mrb[12].mxu0 }
 0x163   : > { %v3042_v59 = vpop.f32.mrb[16].mxu1  ;;  %v2979_v3 = vpop.f32.mrb[13].mxu0 }
 0x164   : > { %v2980_v4 = vadd.f32 %v2979_v3, %v2978_v60  ;;  %v3043_v37 = vpop.f32.mrb[17].mxu1 }
 0x165   : > { %v3044_v56 = vadd.f32 %v3043_v37, %v3042_v59 }
 0x166   : > { %v4027_v29 = vadd.f32 %v4026_v22, %v2980_v4  ;;  %v2981_v34 = vpop.f32.mrb[14].mxu0 }
 0x167   : > { %v2982_v40 = vpop.f32.mrb[15].mxu0 }
 0x168   : > { %v2983_v36 = vadd.f32 %v2982_v40, %v2981_v34 }
 0x169   : > { %v3045_v13 = vpop.f32.mrb[18].mxu1 }
 0x16a   : > { %v4021_v41 = vadd.f32 %v4020_v27, %v2983_v36  ;;  %v2984_v35 = vpop.f32.mrb[16].mxu0  ;;  %v3046_v44 = vpop.f32.mrb[19].mxu1 }
 0x16b   : > { %v2985_v45 = vpop.f32.mrb[17].mxu0  ;;  %v3047_v46 = vadd.f32 %v3046_v44, %v3045_v13 }
 0x16c   : > { %v2986_v51 = vadd.f32 %v2985_v45, %v2984_v35 }
 0x16d   : > { %v3048_v48 = vpop.f32.mrb[20].mxu1 }
 0x16e   : > { %v4040_v47 = vadd.f32 %v4039_v33, %v2986_v51  ;;  %v2987_v49 = vpop.f32.mrb[18].mxu0  ;;  %v3049_v38 = vpop.f32.mrb[21].mxu1 }
 0x16f   : > { %v2988_v50 = vpop.f32.mrb[19].mxu0  ;;  %v3050_v52 = vadd.f32 %v3049_v38, %v3048_v48 }
 0x170   : > { %v2989_v53 = vadd.f32 %v2988_v50, %v2987_v49 }
 0x171   : > { %v3051_v54 = vpop.f32.mrb[22].mxu1 }
 0x172   : > { %v4033_v57 = vadd.f32 %v4032_v43, %v2989_v53  ;;  %v3052_v62 = vpop.f32.mrb[23].mxu1 }
 0x173   : > { %v3053_v58 = vadd.f32 %v3052_v62, %v3051_v54 }
 0x183   : > { %v3086_v63 = vpop.f32.mrb[24].mxu1 }
 0x184   : > { %v3087_v1 = vpop.f32.mrb[25].mxu1 }
 0x185   : > { %v3088_v2 = vadd.f32 %v3087_v1, %v3086_v63 }
 0x187   : > { %v1471_v5 = vadd.f32 %v3088_v2, %v3044_v56  ;;  %v3089_v6 = vpop.f32.mrb[26].mxu1 }
 0x188   : > { %v3090_v39 = vpop.f32.mrb[27].mxu1 }
 0x189   : > { %v4028_v55 = vadd.f32 %v4027_v29, %v1471_v5  ;;  %v3091_v8 = vadd.f32 %v3090_v39, %v3089_v6 }
 0x18b   : > { %v1476_v20 = vadd.f32 %v3091_v8, %v3047_v46  ;;  %v3092_v9 = vpop.f32.mrb[28].mxu1 }
 0x18c   : > { %v3093_v10 = vpop.f32.mrb[29].mxu1 }
 0x18d   : > { %v4022_v12 = vadd.f32 %v4021_v41, %v1476_v20  ;;  %v3094_v0 = vadd.f32 %v3093_v10, %v3092_v9 }
 0x18f   : > { %v1481_v15 = vadd.f32 %v3094_v0, %v3050_v52  ;;  %v3095_v7 = vpop.f32.mrb[30].mxu1 }
 0x190   : > { %v3096_v42 = vpop.f32.mrb[31].mxu1 }
 0x191   : > { %v3097_v61 = vadd.f32 %v3096_v42, %v3095_v7  ;;  %v4041_v14 = vadd.f32 %v4040_v47, %v1481_v15 }
 0x193   : > { %v1486_v31 = vadd.f32 %v3097_v61, %v3053_v58 }
 0x195   : > { %v4034_v19 = vadd.f32 %v4033_v57, %v1486_v31 }
 0x1a3   : > { %v3150_v21 = vpop.f32.mrb[32].mxu1 }
 0x1a4   : > { %v3151_v32 = vpop.f32.mrb[33].mxu1 }
 0x1a5   : > { %v3152_v22 = vadd.f32 %v3151_v32, %v3150_v21 }
 0x1a7   : > { %v3153_v25 = vpop.f32.mrb[34].mxu1 }
 0x1a8   : > { %v3154_v16 = vpop.f32.mrb[35].mxu1 }
 0x1a9   : > { %v3155_v26 = vadd.f32 %v3154_v16, %v3153_v25  ;;  %v2285_v16 = vld [vmem:[%s4224_s7 + $0x10] sm:$0xff] }
 0x1ab   : > { %v3156_v27 = vpop.f32.mrb[36].mxu1 }
 0x1ac   : > { %v3157_v11 = vpop.f32.mrb[37].mxu1 }
 0x1ad   : > { %v3158_v17 = vadd.f32 %v3157_v11, %v3156_v27  ;;  %v2289_v27 = vld [vmem:[%s4224_s7 + $0x30] sm:$0xff]  ;;  %v2290_v11 = vld [vmem:[%s4224_s7 + $0x38] sm:$0xff] }
 0x1af   : > { %v3159_v18 = vpop.f32.mrb[38].mxu1 }
 0x1b0   : > { %v3160_v33 = vpop.f32.mrb[39].mxu1 }
 0x1b1   : > { %v3161_v24 = vadd.f32 %v3160_v33, %v3159_v18  ;;  %v2284_v18 = vld [vmem:[%s4224_s7 + $0x8] sm:$0xff]  ;;  %v2788_v33 = vld [vmem:[%s5756_s2] ss:$0 sm:$0xff] }
 0x1c2   : > { %v3194_v30 = vpop.f32.mrb[20].mxu0 }
 0x1c3   : > { %v3258_v28 = vpop.f32.mrb[40].mxu1  ;;  %v3195_v43 = vpop.f32.mrb[21].mxu0 }
 0x1c4   : > { %v3196_v60 = vadd.f32 %v3195_v43, %v3194_v30  ;;  %v3259_v59 = vpop.f32.mrb[41].mxu1  ;;  %v2308_v43 = vrot.slane %v2289_v27, 2 }
 0x1c5   : > { %v3260_v3 = vadd.f32 %v3259_v59, %v3258_v28  ;;  %v2287_v59 = vld [vmem:[%s4224_s7 + $0x20] sm:$0xff] }
 0x1c6   : > { %v1811_v4 = vadd.f32 %v3196_v60, %v3152_v22  ;;  %v3197_v37 = vpop.f32.mrb[22].mxu0  ;;  %v2309_v60 = vrot.slane %v2290_v11, 2 }
 0x1c7   : > { %v3198_v56 = vpop.f32.mrb[23].mxu0 }
 0x1c8   : > { %v3199_v29 = vadd.f32 %v3198_v56, %v3197_v37  ;;  %v4029_v34 = vadd.f32 %v4028_v55, %v1811_v4 }
 0x1c9   : > { %v3261_v40 = vpop.f32.mrb[42].mxu1 }
 0x1ca   : > { %v1816_v36 = vadd.f32 %v3199_v29, %v3155_v26  ;;  %v3200_v13 = vpop.f32.mrb[24].mxu0  ;;  %v3262_v41 = vpop.f32.mrb[43].mxu1  ;;  %v2286_v26 = vld [vmem:[%s4224_s7 + $0x18] sm:$0xff] }
 0x1cb   : > { %v3201_v35 = vpop.f32.mrb[25].mxu0  ;;  %v3263_v44 = vadd.f32 %v3262_v41, %v3261_v40  ;;  %v2303_v28 = vrot.slane %v2286_v26, 2  ;;  %v2274_v40 = vstv %s2269_s21 }
 0x1cc   : > { %v3202_v45 = vadd.f32 %v3201_v35, %v3200_v13  ;;  %v4023_v46 = vadd.f32 %v4022_v12, %v1816_v36 }
 0x1cd   : > { %v3264_v51 = vpop.f32.mrb[44].mxu1 }
 0x1ce   : > { %v1821_v48 = vadd.f32 %v3202_v45, %v3158_v17  ;;  %v3203_v47 = vpop.f32.mrb[26].mxu0  ;;  %v3265_v49 = vpop.f32.mrb[45].mxu1  ;;  %v2283_v17 = vld [vmem:[%s4224_s7] sm:$0xff]  ;;  %v2305_v45 = vrot.slane %v2287_v59, 2 }
 0x1cf   : > { %v3204_v38 = vpop.f32.mrb[27].mxu0  ;;  %v3266_v50 = vadd.f32 %v3265_v49, %v3264_v51  ;;  %v2299_v29 = vrot.slane %v2283_v17, 2 }
 0x1d0   : > { %v3205_v52 = vadd.f32 %v3204_v38, %v3203_v47  ;;  %v4042_v53 = vadd.f32 %v4041_v14, %v1821_v48  ;;  %v2310_v47 = vsel %vm468_vm2, %v2308_v43, %v2309_v60 }
 0x1d1   : > { %v3267_v54 = vpop.f32.mrb[46].mxu1 }
 0x1d2   : > { %v1826_v57 = vadd.f32 %v3205_v52, %v3161_v24  ;;  %v3268_v62 = vpop.f32.mrb[47].mxu1  ;;  %v2302_v24 = vrot.slane %v2285_v16, 2 }
 0x1d3   : > { %v3269_v58 = vadd.f32 %v3268_v62, %v3267_v54 }
 0x1d4   : > { %v4035_v63 = vadd.f32 %v4034_v19, %v1826_v57  ;;  %v2304_v51 = vsel %vm468_vm2, %v2302_v24, %v2303_v28 }
 0x1e3   : > { %v3302_v1 = vpop.f32.mrb[48].mxu1 }
 0x1e4   : > { %v3303_v2 = vpop.f32.mrb[49].mxu1 }
 0x1e5   : > { %v3304_v5 = vadd.f32 %v3303_v2, %v3302_v1 }
 0x1e6   : > { %v3485_v6 = vpop.f32.mrb[10].mxu0 }
 0x1e7   : > { %v2151_v39 = vadd.f32 %v3304_v5, %v3260_v3  ;;  %v4036_v55 = vadd.f32 %v4035_v63, %v3485_v6  ;;  %v3305_v8 = vpop.f32.mrb[50].mxu1  ;;  %v1905_v20 = vpop.f32.mrb[11].mxu0  ;;  %v2288_v3 = vld [vmem:[%s4224_s7 + $0x28] sm:$0xff] }
 0x1e8   : > { %v4043_v9 = vadd.f32 %v4042_v53, %v1905_v20  ;;  %v3306_v10 = vpop.f32.mrb[51].mxu1 }
 0x1e9   : > { %v3307_v12 = vadd.f32 %v3306_v10, %v3305_v8  ;;  %v4030_v0 = vadd.f32 %v4029_v34, %v2151_v39  ;;  %v2300_v34 = vrot.slane %v2284_v18, 2 }
 0x1eb   : > { %v2156_v23 = vadd.f32 %v3307_v12, %v3263_v44  ;;  %v3308_v15 = vpop.f32.mrb[52].mxu1 }
 0x1ec   : > { %v3309_v7 = vpop.f32.mrb[53].mxu1 }
 0x1ed   : > { %v3310_v42 = vadd.f32 %v3309_v7, %v3308_v15  ;;  %v4024_v61 = vadd.f32 %v4023_v46, %v2156_v23  ;;  %v2306_v46 = vrot.slane %v2288_v3, 2 }
 0x1ef   : > { %v2161_v14 = vadd.f32 %v3310_v42, %v3266_v50  ;;  %v3311_v31 = vpop.f32.mrb[54].mxu1  ;;  %v2301_v50 = vsel %vm468_vm2, %v2299_v29, %v2300_v34 }
 0x1f0   : > { %v3312_v19 = vpop.f32.mrb[55].mxu1 }
 0x1f1   : > { %v3313_v21 = vadd.f32 %v3312_v19, %v3311_v31  ;;  %v4044_v32 = vadd.f32 %v4043_v9, %v2161_v14 }
 0x1f3   : > { %v2166_v22 = vadd.f32 %v3313_v21, %v3269_v58  ;;  %v2307_v58 = vsel %vm468_vm2, %v2305_v45, %v2306_v46 }
 0x1f5   : > { %v4037_v25 = vadd.f32 %v4036_v55, %v2166_v22 }
 0x202   : > { %v3520_v30 = vpop.f32.mrb[8].mxu0 }
 0x203   : > { %v4025_v4 = vadd.f32 %v4024_v61, %v3520_v30  ;;  %v3523_v37 = vpop.f32.mrb[56].mxu1  ;;  %v2235_v56 = vpop.f32.mrb[9].mxu0 }
 0x204   : > { %v4038_v36 = vadd.f32 %v4037_v25, %v3523_v37  ;;  %v4031_v13 = vadd.f32 %v4030_v0, %v2235_v56  ;;  %v2245_v41 = vpop.f32.mrb[57].mxu1 }
 0x205   : > { %v2266_v35 = vadd.f32 %v4025_v4, %v2788_v33  ;;  %v4045_v44 = vadd.f32 %v4044_v32, %v2245_v41 }
 0x206   : > { %v2268_v48 = vadd.f32 %v4038_v36, %v2788_v33  ;;  %v2265_v49 = vadd.f32 %v4031_v13, %v2788_v33 }
 0x207   : > { %vm2271_vm4 = vcmp.gt.f32.partialorder %v2266_v35, 0.0  ;;  %v2276_v38 = vmul.f32 %v2274_v40, %v2266_v35  ;;  %v2267_v52 = vadd.f32 %v4045_v44, %v2788_v33 }
 0x208   : > { %vm2273_vm5 = vcmp.gt.f32.partialorder %v2268_v48, 0.0  ;;  %v2278_v53 = vmul.f32 %v2274_v40, %v2268_v48  ;;  %vm2270_vm6 = vcmp.gt.f32.partialorder %v2265_v49, 0.0  ;;  %v2275_v54 = vmul.f32 %v2274_v40, %v2265_v49 }
 0x209   : > { %v2280_v57 = vsel %vm2271_vm4, %v2266_v35, %v2276_v38  ;;  %vm2272_vm7 = vcmp.gt.f32.partialorder %v2267_v52, 0.0  ;;  %v2277_v62 = vmul.f32 %v2274_v40, %v2267_v52 }
 0x20a   : > { %v2316_v63 = vadd.f32 %v2304_v51, %v2280_v57  ;;  %v2282_v1 = vsel %vm2273_vm5, %v2268_v48, %v2278_v53  ;;  %v2279_v2 = vsel %vm2270_vm6, %v2265_v49, %v2275_v54 }
 0x20b   : > { %v2318_v5 = vadd.f32 %v2310_v47, %v2282_v1  ;;  %v2315_v6 = vadd.f32 %v2301_v50, %v2279_v2  ;;  %v2281_v39 = vsel %vm2272_vm7, %v2267_v52, %v2277_v62 }
 0x20c   : > { %2320 = vst [vmem:[%s4229_s10 + $0x12] sm:$0xff] %v2316_v63  ;;  %v2317_v55 = vadd.f32 %v2307_v58, %v2281_v39 }
 0x20d   : > { %2322 = vst [vmem:[%s4229_s10 + $0x32] sm:$0xff] %v2318_v5  ;;  %2319 = vst [vmem:[%s4229_s10 + $0x2] sm:$0xff] %v2315_v6 }
 0x20e   : > { %2321 = vst [vmem:[%s4229_s10 + $0x22] sm:$0xff] %v2317_v55 }
 0x20f PF: > { %s16_s24 = sadd.s32 1, %s4147_s24   ;;  %s5760_s20 = smov %s4139_s22 }
 0x210   : > { %p13_p8 = scmp.ge.s32.totalorder %s16_s24, 6   ;;  %s5761_s21 = smov %s4143_s23 }
 0x211   : > { %s5762_s22 = smov %s5765_s3  ;;  %s5763_s23 = smov %s5769_s25 }
 0x212   :  { %15 = sbr.rel (!%p13_p8) target bundleno = 3 (0x3), region = 166 }
 0x219   :  { %2361 = vsyncmov [#allocation3] }
 0x21c   :  { %s2362_s7 = vpop.sfrf %2361 }
 0x21d   :  { %p2791_p9 = scmp.ne.s32.totalorder %s2362_s7, 0 }
 0x21f   :  { %2366 = shalt.err (%p2791_p9)  }

</bundles_post_ra>
